<compile_context>
chip_gen: v7x
topology: tpu7x:2x2x1
jax: 0.10.0
libtpu: 0.0.40
codegen_flags: <defaults>
</compile_context>

<pallas_src>
import jax
import jax.numpy as jnp
import numpy as np
from jax import lax
from jax.experimental import pallas as pl
from jax.experimental.pallas import tpu as pltpu

EXPANSION = 4
BN_EPS = 1e-5


# ------------------------------ helpers --------------------------------------

def _bn_fold(gamma, beta, mean, var):
    scale = gamma * lax.rsqrt(var + BN_EPS)
    shift = beta - mean * scale
    return scale[None, :].astype(jnp.float32), shift[None, :].astype(jnp.float32)


def _device_kind():
    try:
        return jax.devices()[0].device_kind.lower()
    except Exception:
        return ""


def _tap_group(kind, planes):
    """How many 3x3 taps to fuse per conv2 dot (lane-aligned cases only)."""
    if planes % 128 != 0 or planes >= 256:
        return 1                      # accumulated dots, K = planes
    if "v5" in kind:                  # v5e MXU is 128 deep: K=128 already full
        return 1
    return max(1, min(9, 256 // planes))   # v6e / v7x: pair taps -> K >= 256


def _vmem_limit_bytes(kind, *, Mp, cin, TH, W, planes, cout, has_sc,
                      TE, TL, cdt_bytes):
    """Scoped-VMEM budget computed from the per-tile working set."""
    w_elems = (cin * planes + 9 * planes * planes + planes * cout
               + (cin * cout if has_sc else 0))
    w8 = ((W + 7) // 8) * 8
    est = (2 * Mp * cin * cdt_bytes                 # whole-image x block (x2 bufs)
           + 2 * TH * w8 * cout * cdt_bytes         # output tile (x2 bufs)
           + 2 * w_elems * cdt_bytes                # weights (<= 2 bufs)
           + 2 * TE * 128 * 4                       # mask tile (lane padded)
           + (TE + 16) * planes * cdt_bytes         # a_sc scratch
           + (TE * (cin + planes)
              + TL * (2 * planes + 2 * cout)) * 4)  # live f32 intermediates
    cap = (48 << 20) if "7" in kind else (96 << 20)
    return int(min(max(int(est * 1.4) + (8 << 20), 32 << 20), cap))


# ------------------------------ fused kernel ----------------------------------

def _make_fused_kernel(*, TH, W, Wp, planes, cdtype, has_sc, tap_group):
    """One grid step = (batch n, row-tile t): TH output image rows.

    Flat-row layout: one flat row = one (h_pad, w_pad) position of the padded
    image, channels on lanes.  The tile's window is TE = (TH+2)*Wp flat rows
    (one halo image-row above and below)."""
    TL = TH * Wp                 # output flat rows per tile
    TE = (TH + 2) * Wp           # window flat rows
    PAD = 8                      # sublane-aligned guard rows in a_sc

    def kernel(*refs):
        if has_sc:
            (x_ref, m_ref, s1_ref, b1_ref, w1_ref, s2_ref, b2_ref,
             w2_ref, s3_ref, b3_ref, w3_ref, wsc_ref, out_ref, a_sc) = refs
        else:
            (x_ref, m_ref, s1_ref, b1_ref, w1_ref, s2_ref, b2_ref,
             w2_ref, s3_ref, b3_ref, w3_ref, out_ref, a_sc) = refs
            wsc_ref = None

        t = pl.program_id(1)
        row0 = pl.multiple_of(t * TL, 8)          # window start in the flat image

        # --- stage 1 (pointwise) over the TE-row window -----------------------
        x = x_ref[0, pl.ds(row0, TE), :].astype(jnp.float32)          # (TE, cin)
        pre1 = jnp.maximum(x * s1_ref[...] + b1_ref[...], 0.0)        # relu(bn1)
        h = jnp.dot(pre1.astype(cdtype), w1_ref[...],
                    preferred_element_type=jnp.float32)               # (TE, P)
        a = jnp.maximum(h * s2_ref[...] + b2_ref[...], 0.0) * m_ref[0]

        # Stash `a` in VMEM (compute dtype).  Guard rows keep the 9 shifted tap
        # windows in-bounds; their values only reach pad columns that are
        # dropped before the store.
        a_sc[pl.ds(0, PAD), :] = jnp.zeros((PAD, planes), a_sc.dtype)
        a_sc[pl.ds(PAD, TE), :] = a.astype(a_sc.dtype)
        a_sc[pl.ds(PAD + TE, PAD), :] = jnp.zeros((PAD, planes), a_sc.dtype)

        # --- stage 2: 3x3 conv = grouped shifted-window dots -------------------
        def tap(ti):
            di, dj = divmod(ti, 3)
            start = PAD + di * Wp + dj - 1
            return a_sc[pl.ds(start, TL), :]                          # (TL, P)

        acc = None
        ti = 0
        while ti < 9:
            cnt = min(tap_group, 9 - ti)
            lhs = (tap(ti) if cnt == 1 else
                   jnp.concatenate([tap(ti + c) for c in range(cnt)], axis=1))
            part = jnp.dot(lhs, w2_ref[pl.ds(ti * planes, cnt * planes), :],
                           preferred_element_type=jnp.float32)
            acc = part if acc is None else acc + part
            ti += cnt

        # --- stage 3 + shortcut -------------------------------------------------
        b = jnp.maximum(acc * s3_ref[...] + b3_ref[...], 0.0)         # relu(bn3)
        out = jnp.dot(b.astype(cdtype), w3_ref[...],
                      preferred_element_type=jnp.float32)             # (TL, 4P)
        if has_sc:
            # reuse pre1 (relu(bn1(x))) on the output band: no re-read of x
            sc = jnp.dot(pre1[Wp:Wp + TL, :].astype(cdtype), wsc_ref[...],
                         preferred_element_type=jnp.float32)
        else:
            sc = x[Wp:Wp + TL, :]                                     # identity
        total = out + sc                                              # (TL, 4P) f32

        # --- store: drop the padded columns, one image row per store ------------
        for r in range(TH):
            row = total[r * Wp + 1: r * Wp + 1 + W, :]                # (W, 4P)
            out_ref[0, r] = row.astype(out_ref.dtype)

    return kernel


# ------------------------------- wrapper --------------------------------------

def preact_bottleneck_pallas(x_nhwc, params, stride=1,
                             compute_dtype=jnp.bfloat16,
                             max_tile_flat_rows=None, min_row_tiles=2):
    """Fused pre-activation bottleneck.  NHWC in, NHWC out (compute_dtype)."""
    # TODO(synk): stride > 1 not implemented in this kernel (stride=1 only).
    assert stride == 1, "only stride=1 is supported by this kernel"
    N, H, W, cin = x_nhwc.shape
    planes = params["w1"].shape[0]
    cout = EXPANSION * planes
    has_sc = cin != cout
    kind = _device_kind()

    # Lane/sublane-friendly padded width; extra pad columns are dropped
    # inside the kernel, never written to HBM.
    Wp = ((W + 2 + 7) // 8) * 8

    # Row tiling: TH image rows per grid step, at least `min_row_tiles` tiles
    # (pipeline overlap / megacore sharding), bottom rows padded if needed.
    if max_tile_flat_rows is None:
        max_tile_flat_rows = 1024 if "7" in kind else 2048   # smaller VMEM on v7x
    max_th = max(1, max_tile_flat_rows // Wp)
    nt = min(H, max(min_row_tiles, -(-H // max_th)))
    TH = -(-H // nt)
    HT = nt * TH                                    # padded output rows (>= H)
    TL, TE = TH * Wp, (TH + 2) * Wp
    Mp = (HT + 2) * Wp

    # --- input glue: single pad + cast, stays channels-last -------------------
    xp = jnp.pad(x_nhwc.astype(compute_dtype),
                 ((0, 0), (1, HT - H + 1), (1, Wp - W - 1), (0, 0)))
    x_flat = xp.reshape(N, Mp, cin)                 # (N, Mp, cin)

    # Per-tile interior mask: implements conv2's zero padding on `a` (tiny).
    rows = jnp.arange(nt)[:, None] * TH + jnp.arange(TH + 2)[None, :]
    rowm = ((rows >= 1) & (rows <= H)).astype(jnp.float32)
    colm = ((jnp.arange(Wp) >= 1) & (jnp.arange(Wp) <= W)).astype(jnp.float32)
    mask = (rowm[:, :, None] * colm[None, None, :]).reshape(nt, TE, 1)

    # --- fold BN (inference affine), flatten conv weights for the MXU ---------
    s1, b1 = _bn_fold(*params["bn1"])
    s2, b2 = _bn_fold(*params["bn2"])
    s3, b3 = _bn_fold(*params["bn3"])
    w1m = params["w1"][:, :, 0, 0].T.astype(compute_dtype)            # (cin, P)
    w3m = params["w3"][:, :, 0, 0].T.astype(compute_dtype)            # (P, 4P)
    w2f = jnp.concatenate([params["w2"][:, :, di, dj].T               # (9P, P)
                           for di in range(3) for dj in range(3)],
                          axis=0).astype(compute_dtype)

    inputs = [x_flat, mask, s1, b1, w1m, s2, b2, w2f, s3, b3, w3m]
    w_shapes = [(1, cin), (1, cin), (cin, planes), (1, planes), (1, planes),
                (9 * planes, planes), (1, planes), (1, planes), (planes, cout)]
    if has_sc:
        inputs.append(params["wsc"][:, :, 0, 0].T.astype(compute_dtype))
        w_shapes.append((cin, cout))

    kernel = _make_fused_kernel(TH=TH, W=W, Wp=Wp, planes=planes,
                                cdtype=compute_dtype, has_sc=has_sc,
                                tap_group=_tap_group(kind, planes))

    x_spec = pl.BlockSpec((1, Mp, cin), lambda n, t: (n, 0, 0))
    m_spec = pl.BlockSpec((1, TE, 1), lambda n, t: (t, 0, 0))
    out_spec = pl.BlockSpec((1, TH, W, cout), lambda n, t: (n, t, 0, 0))
    cparams = pltpu.CompilerParams(
        dimension_semantics=("parallel", "parallel"),
        vmem_limit_bytes=_vmem_limit_bytes(
            kind, Mp=Mp, cin=cin, TH=TH, W=W, planes=planes, cout=cout,
            has_sc=has_sc, TE=TE, TL=TL,
            cdt_bytes=jnp.dtype(compute_dtype).itemsize))

    def const_spec(shape, single):
        zeros = tuple(0 for _ in shape)
        if single:
            return pl.BlockSpec(shape, lambda n, t, _z=zeros: _z,
                                pipeline_mode=pl.Buffered(1))
        return pl.BlockSpec(shape, lambda n, t, _z=zeros: _z)

    # Grid-invariant weights/BN: try single-buffered specs first (halves their
    # VMEM footprint); fall back to default double buffering if unsupported.
    attempts = (True, False) if hasattr(pl, "Buffered") else (False,)
    out, err = None, None
    for single_buf in attempts:
        try:
            in_specs = [x_spec, m_spec] + [const_spec(s, single_buf)
                                           for s in w_shapes]
            out = pl.pallas_call(
                kernel,
                out_shape=jax.ShapeDtypeStruct((N, HT, W, cout), compute_dtype),
                grid=(N, nt),
                in_specs=in_specs,
                out_specs=out_spec,
                scratch_shapes=[pltpu.VMEM((TE + 16, planes), compute_dtype)],
                compiler_params=cparams,
            )(*inputs)
            break
        except Exception as e:        # Buffered(1) unsupported on this jax
            err = e
            out = None
    if out is None:
        raise err

    if HT != H:                       # only when H was padded to nt*TH
        out = out[:, :H]
    return out


# ------------------------- pure-JAX reference (NCHW) --------------------------

def preact_bottleneck_reference(x, params, stride=1):
    dn = ("NCHW", "OIHW", "NCHW")

    def bn(y, p):
        g, b, m, v = p
        sc = (g * lax.rsqrt(v + BN_EPS))[None, :, None, None]
        sh = (b - m * g * lax.rsqrt(v + BN_EPS))[None, :, None, None]
        return y * sc + sh

    relu = jax.nn.relu
    cin = x.shape[1]
    planes = params["w1"].shape[0]
    cout = EXPANSION * planes
    has_shortcut = (stride != 1) or (cin != cout)

    pre = relu(bn(x, params["bn1"]))
    shortcut = (lax.conv_general_dilated(pre, params["wsc"], (stride, stride),
                                         "VALID", dimension_numbers=dn)
                if has_shortcut else x)
    out = lax.conv_general_dilated(pre, params["w1"], (1, 1), "VALID",
                                   dimension_numbers=dn)
    out = relu(bn(out, params["bn2"]))
    out = lax.conv_general_dilated(out, params["w2"], (stride, stride),
                                   ((1, 1), (1, 1)), dimension_numbers=dn)
    out = relu(bn(out, params["bn3"]))
    out = lax.conv_general_dilated(out, params["w3"], (1, 1), "VALID",
                                   dimension_numbers=dn)
    return out + shortcut


# ---------------------------------- main --------------------------------------

if __name__ == "__main__":
    N, in_planes, planes, H, W = 2, 4, 4, 16, 16
    cout = EXPANSION * planes
    key = jax.random.PRNGKey(0)
    ks = jax.random.split(key, 12)

    def bn_params(k, c):
        k1, k2, k3, k4 = jax.random.split(k, 4)
        gamma = jax.random.uniform(k1, (c,), jnp.float32, 0.5, 1.5)
        beta = 0.1 * jax.random.normal(k2, (c,), jnp.float32)
        mean = 0.1 * jax.random.normal(k3, (c,), jnp.float32)
        var = jax.random.uniform(k4, (c,), jnp.float32, 0.5, 1.5)
        return (gamma, beta, mean, var)

    params = {
        "bn1": bn_params(ks[1], in_planes),
        "bn2": bn_params(ks[2], planes),
        "bn3": bn_params(ks[3], planes),
        "w1": 0.2 * jax.random.normal(ks[4], (planes, in_planes, 1, 1), jnp.float32),
        "w2": 0.2 * jax.random.normal(ks[5], (planes, planes, 3, 3), jnp.float32),
        "w3": 0.2 * jax.random.normal(ks[6], (cout, planes, 1, 1), jnp.float32),
        "wsc": 0.2 * jax.random.normal(ks[7], (cout, in_planes, 1, 1), jnp.float32),
    }
    x = jax.random.normal(ks[0], (N, in_planes, H, W), jnp.float32)
    y_ref = np.asarray(preact_bottleneck_reference(x, params, stride=1))

    def run(x_nchw, prm, **kw):
        x_nhwc = jnp.transpose(x_nchw, (0, 2, 3, 1))      # test-only conversion
        y = jax.block_until_ready(
            preact_bottleneck_pallas(x_nhwc, prm, stride=1, **kw))
        return np.transpose(np.asarray(y).astype(np.float32), (0, 3, 1, 2))

    # 1) exact f32 compute path, default row tiling (grid = (N, 2))
    np.testing.assert_allclose(run(x, params, compute_dtype=jnp.float32),
                               y_ref, rtol=1e-4, atol=1e-4)

    # 2) f32 path, forced finer tiling incl. bottom-row padding (grid = (N, 3))
    np.testing.assert_allclose(
        run(x, params, compute_dtype=jnp.float32, max_tile_flat_rows=144),
        y_ref, rtol=1e-4, atol=1e-4)

    # 3) identity-shortcut variant (cin == 4*planes): no wsc matmul compiled
    params_id = {k: v for k, v in params.items() if k != "wsc"}
    params_id["bn1"] = bn_params(ks[8], cout)
    params_id["w1"] = 0.2 * jax.random.normal(ks[9], (planes, cout, 1, 1),
                                              jnp.float32)
    x_id = jax.random.normal(ks[10], (N, cout, H, W), jnp.float32)
    y_id_ref = np.asarray(preact_bottleneck_reference(x_id, params_id, stride=1))
    np.testing.assert_allclose(run(x_id, params_id, compute_dtype=jnp.float32),
                               y_id_ref, rtol=1e-4, atol=1e-4)

    # 4) default bf16 MXU path (bf16 output + bf16 scratch, f32 accumulation)
    y_bf16 = run(x, params)
    rel = np.linalg.norm(y_bf16 - y_ref) / np.linalg.norm(y_ref)
    assert rel < 2e-2, f"bf16 path relative RMS error too large: {rel}"

    print("KERNEL_OK")
</pallas_src>

<mosaic_0001>
module attributes {stable_mosaic.version = 11 : i64} {
  func.func @kernel(%arg0: i32, %arg1: i32, %arg2: memref<1x432x4xf32, #tpu.memory_space<vmem>>, %arg3: memref<1x240x1xf32, #tpu.memory_space<vmem>>, %arg4: memref<1x4xf32, #tpu.memory_space<vmem>>, %arg5: memref<1x4xf32, #tpu.memory_space<vmem>>, %arg6: memref<4x4xf32, #tpu.memory_space<vmem>>, %arg7: memref<1x4xf32, #tpu.memory_space<vmem>>, %arg8: memref<1x4xf32, #tpu.memory_space<vmem>>, %arg9: memref<36x4xf32, #tpu.memory_space<vmem>>, %arg10: memref<1x4xf32, #tpu.memory_space<vmem>>, %arg11: memref<1x4xf32, #tpu.memory_space<vmem>>, %arg12: memref<4x16xf32, #tpu.memory_space<vmem>>, %arg13: memref<4x16xf32, #tpu.memory_space<vmem>>, %arg14: memref<1x8x16x16xf32, #tpu.memory_space<vmem>>, %arg15: memref<256x4xf32, #tpu.memory_space<vmem>>) attributes {dimension_semantics = [#tpu.dimension_semantics<parallel>, #tpu.dimension_semantics<parallel>], iteration_bounds = array<i64: 2, 2>, scalar_prefetch = 0 : i64, scratch_operands = 1 : i64, tpu.core_type = #tpu.core_type<tc>, window_params = [{transform_indices = @transform_0, window_bounds = array<i64: 1, 432, 4>}, {transform_indices = @transform_1, window_bounds = array<i64: 1, 240, 1>}, {pipeline_mode = #tpu.pipeline_mode<synchronous>, transform_indices = @transform_2, window_bounds = array<i64: 1, 4>}, {pipeline_mode = #tpu.pipeline_mode<synchronous>, transform_indices = @transform_3, window_bounds = array<i64: 1, 4>}, {pipeline_mode = #tpu.pipeline_mode<synchronous>, transform_indices = @transform_4, window_bounds = array<i64: 4, 4>}, {pipeline_mode = #tpu.pipeline_mode<synchronous>, transform_indices = @transform_5, window_bounds = array<i64: 1, 4>}, {pipeline_mode = #tpu.pipeline_mode<synchronous>, transform_indices = @transform_6, window_bounds = array<i64: 1, 4>}, {pipeline_mode = #tpu.pipeline_mode<synchronous>, transform_indices = @transform_7, window_bounds = array<i64: 36, 4>}, {pipeline_mode = #tpu.pipeline_mode<synchronous>, transform_indices = @transform_8, window_bounds = array<i64: 1, 4>}, {pipeline_mode = #tpu.pipeline_mode<synchronous>, transform_indices = @transform_9, window_bounds = array<i64: 1, 4>}, {pipeline_mode = #tpu.pipeline_mode<synchronous>, transform_indices = @transform_10, window_bounds = array<i64: 4, 16>}, {pipeline_mode = #tpu.pipeline_mode<synchronous>, transform_indices = @transform_11, window_bounds = array<i64: 4, 16>}, {transform_indices = @transform_12, window_bounds = array<i64: 1, 8, 16, 16>}]} {
    %c192_i32 = arith.constant 192 : i32
    %0 = arith.muli %arg1, %c192_i32 : i32
    %1 = tpu.assume_multiple %0, 8 : i32
    %c0 = arith.constant 0 : index
    %2 = arith.index_cast %1 : i32 to index
    %c0_0 = arith.constant 0 : index
    %3 = vector.load %arg2[%c0, %2, %c0_0] : memref<1x432x4xf32, #tpu.memory_space<vmem>>, vector<1x240x4xf32>
    %4 = vector.shape_cast %3 : vector<1x240x4xf32> to vector<240x4xf32>
    %c0_1 = arith.constant 0 : index
    %c0_2 = arith.constant 0 : index
    %5 = vector.load %arg4[%c0_1, %c0_2] : memref<1x4xf32, #tpu.memory_space<vmem>>, vector<1x4xf32>
    %6 = vector.broadcast %5 : vector<1x4xf32> to vector<240x4xf32>
    %7 = arith.mulf %4, %6 : vector<240x4xf32>
    %c0_3 = arith.constant 0 : index
    %c0_4 = arith.constant 0 : index
    %8 = vector.load %arg5[%c0_3, %c0_4] : memref<1x4xf32, #tpu.memory_space<vmem>>, vector<1x4xf32>
    %9 = vector.broadcast %8 : vector<1x4xf32> to vector<240x4xf32>
    %10 = arith.addf %7, %9 : vector<240x4xf32>
    %cst = arith.constant 0.000000e+00 : f32
    %11 = vector.broadcast %cst : f32 to vector<240x4xf32>
    %12 = arith.maximumf %10, %11 : vector<240x4xf32>
    %c0_5 = arith.constant 0 : index
    %c0_6 = arith.constant 0 : index
    %13 = vector.load %arg6[%c0_5, %c0_6] : memref<4x4xf32, #tpu.memory_space<vmem>>, vector<4x4xf32>
    %cst_7 = arith.constant dense<0.000000e+00> : vector<240x4xf32>
    %14 = tpu.matmul %12, %13, %cst_7 {dimension_numbers = #tpu.dot_dimension_numbers<[1], [0], [0], [1], [0, 0, 1, 1], [], []>} : vector<240x4xf32>, vector<4x4xf32>, vector<240x4xf32> -> vector<240x4xf32>
    %c0_8 = arith.constant 0 : index
    %c0_9 = arith.constant 0 : index
    %15 = vector.load %arg7[%c0_8, %c0_9] : memref<1x4xf32, #tpu.memory_space<vmem>>, vector<1x4xf32>
    %16 = vector.broadcast %15 : vector<1x4xf32> to vector<240x4xf32>
    %17 = arith.mulf %14, %16 : vector<240x4xf32>
    %c0_10 = arith.constant 0 : index
    %c0_11 = arith.constant 0 : index
    %18 = vector.load %arg8[%c0_10, %c0_11] : memref<1x4xf32, #tpu.memory_space<vmem>>, vector<1x4xf32>
    %19 = vector.broadcast %18 : vector<1x4xf32> to vector<240x4xf32>
    %20 = arith.addf %17, %19 : vector<240x4xf32>
    %cst_12 = arith.constant 0.000000e+00 : f32
    %21 = vector.broadcast %cst_12 : f32 to vector<240x4xf32>
    %22 = arith.maximumf %20, %21 : vector<240x4xf32>
    %c0_13 = arith.constant 0 : index
    %c0_14 = arith.constant 0 : index
    %c0_15 = arith.constant 0 : index
    %23 = vector.load %arg3[%c0_13, %c0_14, %c0_15] : memref<1x240x1xf32, #tpu.memory_space<vmem>>, vector<1x240x1xf32>
    %24 = vector.shape_cast %23 : vector<1x240x1xf32> to vector<240x1xf32>
    %25 = vector.broadcast %24 : vector<240x1xf32> to vector<240x4xf32>
    %26 = arith.mulf %22, %25 : vector<240x4xf32>
    %cst_16 = arith.constant 0.000000e+00 : f32
    %27 = vector.broadcast %cst_16 : f32 to vector<8x4xf32>
    %c0_17 = arith.constant 0 : index
    %c0_18 = arith.constant 0 : index
    %28 = vector.load %arg15[%c0_17, %c0_18] : memref<256x4xf32, #tpu.memory_space<vmem>>, vector<8x4xf32>
    tpu.vector_store %arg15[%c0_17, %c0_18], %27 {strides = array<i32>} : memref<256x4xf32, #tpu.memory_space<vmem>>, vector<8x4xf32>,
    %c8 = arith.constant 8 : index
    %c0_19 = arith.constant 0 : index
    %29 = vector.load %arg15[%c8, %c0_19] : memref<256x4xf32, #tpu.memory_space<vmem>>, vector<240x4xf32>
    tpu.vector_store %arg15[%c8, %c0_19], %26 {strides = array<i32>} : memref<256x4xf32, #tpu.memory_space<vmem>>, vector<240x4xf32>,
    %cst_20 = arith.constant 0.000000e+00 : f32
    %30 = vector.broadcast %cst_20 : f32 to vector<8x4xf32>
    %c248 = arith.constant 248 : index
    %c0_21 = arith.constant 0 : index
    %31 = vector.load %arg15[%c248, %c0_21] : memref<256x4xf32, #tpu.memory_space<vmem>>, vector<8x4xf32>
    tpu.vector_store %arg15[%c248, %c0_21], %30 {strides = array<i32>} : memref<256x4xf32, #tpu.memory_space<vmem>>, vector<8x4xf32>,
    %c7 = arith.constant 7 : index
    %c0_22 = arith.constant 0 : index
    %32 = vector.load %arg15[%c7, %c0_22] : memref<256x4xf32, #tpu.memory_space<vmem>>, vector<192x4xf32>
    %c0_23 = arith.constant 0 : index
    %c0_24 = arith.constant 0 : index
    %33 = vector.load %arg9[%c0_23, %c0_24] : memref<36x4xf32, #tpu.memory_space<vmem>>, vector<4x4xf32>
    %cst_25 = arith.constant dense<0.000000e+00> : vector<192x4xf32>
    %34 = tpu.matmul %32, %33, %cst_25 {dimension_numbers = #tpu.dot_dimension_numbers<[1], [0], [0], [1], [0, 0, 1, 1], [], []>} : vector<192x4xf32>, vector<4x4xf32>, vector<192x4xf32> -> vector<192x4xf32>
    %c8_26 = arith.constant 8 : index
    %c0_27 = arith.constant 0 : index
    %35 = vector.load %arg15[%c8_26, %c0_27] : memref<256x4xf32, #tpu.memory_space<vmem>>, vector<192x4xf32>
    %c4 = arith.constant 4 : index
    %c0_28 = arith.constant 0 : index
    %36 = vector.load %arg9[%c4, %c0_28] : memref<36x4xf32, #tpu.memory_space<vmem>>, vector<4x4xf32>
    %cst_29 = arith.constant dense<0.000000e+00> : vector<192x4xf32>
    %37 = tpu.matmul %35, %36, %cst_29 {dimension_numbers = #tpu.dot_dimension_numbers<[1], [0], [0], [1], [0, 0, 1, 1], [], []>} : vector<192x4xf32>, vector<4x4xf32>, vector<192x4xf32> -> vector<192x4xf32>
    %38 = arith.addf %34, %37 : vector<192x4xf32>
    %c9 = arith.constant 9 : index
    %c0_30 = arith.constant 0 : index
    %39 = vector.load %arg15[%c9, %c0_30] : memref<256x4xf32, #tpu.memory_space<vmem>>, vector<192x4xf32>
    %c8_31 = arith.constant 8 : index
    %c0_32 = arith.constant 0 : index
    %40 = vector.load %arg9[%c8_31, %c0_32] : memref<36x4xf32, #tpu.memory_space<vmem>>, vector<4x4xf32>
    %cst_33 = arith.constant dense<0.000000e+00> : vector<192x4xf32>
    %41 = tpu.matmul %39, %40, %cst_33 {dimension_numbers = #tpu.dot_dimension_numbers<[1], [0], [0], [1], [0, 0, 1, 1], [], []>} : vector<192x4xf32>, vector<4x4xf32>, vector<192x4xf32> -> vector<192x4xf32>
    %42 = arith.addf %38, %41 : vector<192x4xf32>
    %c31 = arith.constant 31 : index
    %c0_34 = arith.constant 0 : index
    %43 = vector.load %arg15[%c31, %c0_34] : memref<256x4xf32, #tpu.memory_space<vmem>>, vector<192x4xf32>
    %c12 = arith.constant 12 : index
    %c0_35 = arith.constant 0 : index
    %44 = vector.load %arg9[%c12, %c0_35] : memref<36x4xf32, #tpu.memory_space<vmem>>, vector<4x4xf32>
    %cst_36 = arith.constant dense<0.000000e+00> : vector<192x4xf32>
    %45 = tpu.matmul %43, %44, %cst_36 {dimension_numbers = #tpu.dot_dimension_numbers<[1], [0], [0], [1], [0, 0, 1, 1], [], []>} : vector<192x4xf32>, vector<4x4xf32>, vector<192x4xf32> -> vector<192x4xf32>
    %46 = arith.addf %42, %45 : vector<192x4xf32>
    %c32 = arith.constant 32 : index
    %c0_37 = arith.constant 0 : index
    %47 = vector.load %arg15[%c32, %c0_37] : memref<256x4xf32, #tpu.memory_space<vmem>>, vector<192x4xf32>
    %c16 = arith.constant 16 : index
    %c0_38 = arith.constant 0 : index
    %48 = vector.load %arg9[%c16, %c0_38] : memref<36x4xf32, #tpu.memory_space<vmem>>, vector<4x4xf32>
    %cst_39 = arith.constant dense<0.000000e+00> : vector<192x4xf32>
    %49 = tpu.matmul %47, %48, %cst_39 {dimension_numbers = #tpu.dot_dimension_numbers<[1], [0], [0], [1], [0, 0, 1, 1], [], []>} : vector<192x4xf32>, vector<4x4xf32>, vector<192x4xf32> -> vector<192x4xf32>
    %50 = arith.addf %46, %49 : vector<192x4xf32>
    %c33 = arith.constant 33 : index
    %c0_40 = arith.constant 0 : index
    %51 = vector.load %arg15[%c33, %c0_40] : memref<256x4xf32, #tpu.memory_space<vmem>>, vector<192x4xf32>
    %c20 = arith.constant 20 : index
    %c0_41 = arith.constant 0 : index
    %52 = vector.load %arg9[%c20, %c0_41] : memref<36x4xf32, #tpu.memory_space<vmem>>, vector<4x4xf32>
    %cst_42 = arith.constant dense<0.000000e+00> : vector<192x4xf32>
    %53 = tpu.matmul %51, %52, %cst_42 {dimension_numbers = #tpu.dot_dimension_numbers<[1], [0], [0], [1], [0, 0, 1, 1], [], []>} : vector<192x4xf32>, vector<4x4xf32>, vector<192x4xf32> -> vector<192x4xf32>
    %54 = arith.addf %50, %53 : vector<192x4xf32>
    %c55 = arith.constant 55 : index
    %c0_43 = arith.constant 0 : index
    %55 = vector.load %arg15[%c55, %c0_43] : memref<256x4xf32, #tpu.memory_space<vmem>>, vector<192x4xf32>
    %c24 = arith.constant 24 : index
    %c0_44 = arith.constant 0 : index
    %56 = vector.load %arg9[%c24, %c0_44] : memref<36x4xf32, #tpu.memory_space<vmem>>, vector<4x4xf32>
    %cst_45 = arith.constant dense<0.000000e+00> : vector<192x4xf32>
    %57 = tpu.matmul %55, %56, %cst_45 {dimension_numbers = #tpu.dot_dimension_numbers<[1], [0], [0], [1], [0, 0, 1, 1], [], []>} : vector<192x4xf32>, vector<4x4xf32>, vector<192x4xf32> -> vector<192x4xf32>
    %58 = arith.addf %54, %57 : vector<192x4xf32>
    %c56 = arith.constant 56 : index
    %c0_46 = arith.constant 0 : index
    %59 = vector.load %arg15[%c56, %c0_46] : memref<256x4xf32, #tpu.memory_space<vmem>>, vector<192x4xf32>
    %c28 = arith.constant 28 : index
    %c0_47 = arith.constant 0 : index
    %60 = vector.load %arg9[%c28, %c0_47] : memref<36x4xf32, #tpu.memory_space<vmem>>, vector<4x4xf32>
    %cst_48 = arith.constant dense<0.000000e+00> : vector<192x4xf32>
    %61 = tpu.matmul %59, %60, %cst_48 {dimension_numbers = #tpu.dot_dimension_numbers<[1], [0], [0], [1], [0, 0, 1, 1], [], []>} : vector<192x4xf32>, vector<4x4xf32>, vector<192x4xf32> -> vector<192x4xf32>
    %62 = arith.addf %58, %61 : vector<192x4xf32>
    %c57 = arith.constant 57 : index
    %c0_49 = arith.constant 0 : index
    %63 = vector.load %arg15[%c57, %c0_49] : memref<256x4xf32, #tpu.memory_space<vmem>>, vector<192x4xf32>
    %c32_50 = arith.constant 32 : index
    %c0_51 = arith.constant 0 : index
    %64 = vector.load %arg9[%c32_50, %c0_51] : memref<36x4xf32, #tpu.memory_space<vmem>>, vector<4x4xf32>
    %cst_52 = arith.constant dense<0.000000e+00> : vector<192x4xf32>
    %65 = tpu.matmul %63, %64, %cst_52 {dimension_numbers = #tpu.dot_dimension_numbers<[1], [0], [0], [1], [0, 0, 1, 1], [], []>} : vector<192x4xf32>, vector<4x4xf32>, vector<192x4xf32> -> vector<192x4xf32>
    %66 = arith.addf %62, %65 : vector<192x4xf32>
    %c0_53 = arith.constant 0 : index
    %c0_54 = arith.constant 0 : index
    %67 = vector.load %arg10[%c0_53, %c0_54] : memref<1x4xf32, #tpu.memory_space<vmem>>, vector<1x4xf32>
    %68 = vector.broadcast %67 : vector<1x4xf32> to vector<192x4xf32>
    %69 = arith.mulf %66, %68 : vector<192x4xf32>
    %c0_55 = arith.constant 0 : index
    %c0_56 = arith.constant 0 : index
    %70 = vector.load %arg11[%c0_55, %c0_56] : memref<1x4xf32, #tpu.memory_space<vmem>>, vector<1x4xf32>
    %71 = vector.broadcast %70 : vector<1x4xf32> to vector<192x4xf32>
    %72 = arith.addf %69, %71 : vector<192x4xf32>
    %cst_57 = arith.constant 0.000000e+00 : f32
    %73 = vector.broadcast %cst_57 : f32 to vector<192x4xf32>
    %74 = arith.maximumf %72, %73 : vector<192x4xf32>
    %c0_58 = arith.constant 0 : index
    %c0_59 = arith.constant 0 : index
    %75 = vector.load %arg12[%c0_58, %c0_59] : memref<4x16xf32, #tpu.memory_space<vmem>>, vector<4x16xf32>
    %cst_60 = arith.constant dense<0.000000e+00> : vector<192x16xf32>
    %76 = tpu.matmul %74, %75, %cst_60 {dimension_numbers = #tpu.dot_dimension_numbers<[1], [0], [0], [1], [0, 0, 1, 1], [], []>} : vector<192x4xf32>, vector<4x16xf32>, vector<192x16xf32> -> vector<192x16xf32>
    %77 = vector.extract_strided_slice %12 {offsets = [24, 0], sizes = [192, 4], strides = [1, 1]} : vector<240x4xf32> to vector<192x4xf32>
    %c0_61 = arith.constant 0 : index
    %c0_62 = arith.constant 0 : index
    %78 = vector.load %arg13[%c0_61, %c0_62] : memref<4x16xf32, #tpu.memory_space<vmem>>, vector<4x16xf32>
    %cst_63 = arith.constant dense<0.000000e+00> : vector<192x16xf32>
    %79 = tpu.matmul %77, %78, %cst_63 {dimension_numbers = #tpu.dot_dimension_numbers<[1], [0], [0], [1], [0, 0, 1, 1], [], []>} : vector<192x4xf32>, vector<4x16xf32>, vector<192x16xf32> -> vector<192x16xf32>
    %80 = arith.addf %76, %79 : vector<192x16xf32>
    %81 = vector.extract_strided_slice %80 {offsets = [1, 0], sizes = [16, 16], strides = [1, 1]} : vector<192x16xf32> to vector<16x16xf32>
    %c0_64 = arith.constant 0 : index
    %c0_65 = arith.constant 0 : index
    %c0_66 = arith.constant 0 : index
    %c0_67 = arith.constant 0 : index
    %82 = vector.load %arg14[%c0_64, %c0_65, %c0_66, %c0_67] : memref<1x8x16x16xf32, #tpu.memory_space<vmem>>, vector<1x1x16x16xf32>
    %83 = vector.shape_cast %82 : vector<1x1x16x16xf32> to vector<16x16xf32>
    %84 = vector.shape_cast %81 : vector<16x16xf32> to vector<1x1x16x16xf32>
    tpu.vector_store %arg14[%c0_64, %c0_65, %c0_66, %c0_67], %84 {strides = array<i32>} : memref<1x8x16x16xf32, #tpu.memory_space<vmem>>, vector<1x1x16x16xf32>,
    %85 = vector.extract_strided_slice %80 {offsets = [25, 0], sizes = [16, 16], strides = [1, 1]} : vector<192x16xf32> to vector<16x16xf32>
    %c0_68 = arith.constant 0 : index
    %c1 = arith.constant 1 : index
    %c0_69 = arith.constant 0 : index
    %c0_70 = arith.constant 0 : index
    %86 = vector.load %arg14[%c0_68, %c1, %c0_69, %c0_70] : memref<1x8x16x16xf32, #tpu.memory_space<vmem>>, vector<1x1x16x16xf32>
    %87 = vector.shape_cast %86 : vector<1x1x16x16xf32> to vector<16x16xf32>
    %88 = vector.shape_cast %85 : vector<16x16xf32> to vector<1x1x16x16xf32>
    tpu.vector_store %arg14[%c0_68, %c1, %c0_69, %c0_70], %88 {strides = array<i32>} : memref<1x8x16x16xf32, #tpu.memory_space<vmem>>, vector<1x1x16x16xf32>,
    %89 = vector.extract_strided_slice %80 {offsets = [49, 0], sizes = [16, 16], strides = [1, 1]} : vector<192x16xf32> to vector<16x16xf32>
    %c0_71 = arith.constant 0 : index
    %c2 = arith.constant 2 : index
    %c0_72 = arith.constant 0 : index
    %c0_73 = arith.constant 0 : index
    %90 = vector.load %arg14[%c0_71, %c2, %c0_72, %c0_73] : memref<1x8x16x16xf32, #tpu.memory_space<vmem>>, vector<1x1x16x16xf32>
    %91 = vector.shape_cast %90 : vector<1x1x16x16xf32> to vector<16x16xf32>
    %92 = vector.shape_cast %89 : vector<16x16xf32> to vector<1x1x16x16xf32>
    tpu.vector_store %arg14[%c0_71, %c2, %c0_72, %c0_73], %92 {strides = array<i32>} : memref<1x8x16x16xf32, #tpu.memory_space<vmem>>, vector<1x1x16x16xf32>,
    %93 = vector.extract_strided_slice %80 {offsets = [73, 0], sizes = [16, 16], strides = [1, 1]} : vector<192x16xf32> to vector<16x16xf32>
    %c0_74 = arith.constant 0 : index
    %c3 = arith.constant 3 : index
    %c0_75 = arith.constant 0 : index
    %c0_76 = arith.constant 0 : index
    %94 = vector.load %arg14[%c0_74, %c3, %c0_75, %c0_76] : memref<1x8x16x16xf32, #tpu.memory_space<vmem>>, vector<1x1x16x16xf32>
    %95 = vector.shape_cast %94 : vector<1x1x16x16xf32> to vector<16x16xf32>
    %96 = vector.shape_cast %93 : vector<16x16xf32> to vector<1x1x16x16xf32>
    tpu.vector_store %arg14[%c0_74, %c3, %c0_75, %c0_76], %96 {strides = array<i32>} : memref<1x8x16x16xf32, #tpu.memory_space<vmem>>, vector<1x1x16x16xf32>,
    %97 = vector.extract_strided_slice %80 {offsets = [97, 0], sizes = [16, 16], strides = [1, 1]} : vector<192x16xf32> to vector<16x16xf32>
    %c0_77 = arith.constant 0 : index
    %c4_78 = arith.constant 4 : index
    %c0_79 = arith.constant 0 : index
    %c0_80 = arith.constant 0 : index
    %98 = vector.load %arg14[%c0_77, %c4_78, %c0_79, %c0_80] : memref<1x8x16x16xf32, #tpu.memory_space<vmem>>, vector<1x1x16x16xf32>
    %99 = vector.shape_cast %98 : vector<1x1x16x16xf32> to vector<16x16xf32>
    %100 = vector.shape_cast %97 : vector<16x16xf32> to vector<1x1x16x16xf32>
    tpu.vector_store %arg14[%c0_77, %c4_78, %c0_79, %c0_80], %100 {strides = array<i32>} : memref<1x8x16x16xf32, #tpu.memory_space<vmem>>, vector<1x1x16x16xf32>,
    %101 = vector.extract_strided_slice %80 {offsets = [121, 0], sizes = [16, 16], strides = [1, 1]} : vector<192x16xf32> to vector<16x16xf32>
    %c0_81 = arith.constant 0 : index
    %c5 = arith.constant 5 : index
    %c0_82 = arith.constant 0 : index
    %c0_83 = arith.constant 0 : index
    %102 = vector.load %arg14[%c0_81, %c5, %c0_82, %c0_83] : memref<1x8x16x16xf32, #tpu.memory_space<vmem>>, vector<1x1x16x16xf32>
    %103 = vector.shape_cast %102 : vector<1x1x16x16xf32> to vector<16x16xf32>
    %104 = vector.shape_cast %101 : vector<16x16xf32> to vector<1x1x16x16xf32>
    tpu.vector_store %arg14[%c0_81, %c5, %c0_82, %c0_83], %104 {strides = array<i32>} : memref<1x8x16x16xf32, #tpu.memory_space<vmem>>, vector<1x1x16x16xf32>,
    %105 = vector.extract_strided_slice %80 {offsets = [145, 0], sizes = [16, 16], strides = [1, 1]} : vector<192x16xf32> to vector<16x16xf32>
    %c0_84 = arith.constant 0 : index
    %c6 = arith.constant 6 : index
    %c0_85 = arith.constant 0 : index
    %c0_86 = arith.constant 0 : index
    %106 = vector.load %arg14[%c0_84, %c6, %c0_85, %c0_86] : memref<1x8x16x16xf32, #tpu.memory_space<vmem>>, vector<1x1x16x16xf32>
    %107 = vector.shape_cast %106 : vector<1x1x16x16xf32> to vector<16x16xf32>
    %108 = vector.shape_cast %105 : vector<16x16xf32> to vector<1x1x16x16xf32>
    tpu.vector_store %arg14[%c0_84, %c6, %c0_85, %c0_86], %108 {strides = array<i32>} : memref<1x8x16x16xf32, #tpu.memory_space<vmem>>, vector<1x1x16x16xf32>,
    %109 = vector.extract_strided_slice %80 {offsets = [169, 0], sizes = [16, 16], strides = [1, 1]} : vector<192x16xf32> to vector<16x16xf32>
    %c0_87 = arith.constant 0 : index
    %c7_88 = arith.constant 7 : index
    %c0_89 = arith.constant 0 : index
    %c0_90 = arith.constant 0 : index
    %110 = vector.load %arg14[%c0_87, %c7_88, %c0_89, %c0_90] : memref<1x8x16x16xf32, #tpu.memory_space<vmem>>, vector<1x1x16x16xf32>
    %111 = vector.shape_cast %110 : vector<1x1x16x16xf32> to vector<16x16xf32>
    %112 = vector.shape_cast %109 : vector<16x16xf32> to vector<1x1x16x16xf32>
    tpu.vector_store %arg14[%c0_87, %c7_88, %c0_89, %c0_90], %112 {strides = array<i32>} : memref<1x8x16x16xf32, #tpu.memory_space<vmem>>, vector<1x1x16x16xf32>,
    return
  }
  func.func @transform_0(%arg0: i32, %arg1: i32) -> (i32, i32, i32) {
    %c0_i32 = arith.constant 0 : i32
    %c0_i32_0 = arith.constant 0 : i32
    %c0_i32_1 = arith.constant 0 : i32
    return %arg0, %c0_i32, %c0_i32_0 : i32, i32, i32
  }
  func.func @transform_1(%arg0: i32, %arg1: i32) -> (i32, i32, i32) {
    %c0_i32 = arith.constant 0 : i32
    %c0_i32_0 = arith.constant 0 : i32
    %c0_i32_1 = arith.constant 0 : i32
    return %arg1, %c0_i32, %c0_i32_0 : i32, i32, i32
  }
  func.func @transform_2(%arg0: i32, %arg1: i32) -> (i32, i32) {
    %c0_i32 = arith.constant 0 : i32
    %c0_i32_0 = arith.constant 0 : i32
    %c0_i32_1 = arith.constant 0 : i32
    return %c0_i32, %c0_i32_0 : i32, i32
  }
  func.func @transform_3(%arg0: i32, %arg1: i32) -> (i32, i32) {
    %c0_i32 = arith.constant 0 : i32
    %c0_i32_0 = arith.constant 0 : i32
    %c0_i32_1 = arith.constant 0 : i32
    return %c0_i32, %c0_i32_0 : i32, i32
  }
  func.func @transform_4(%arg0: i32, %arg1: i32) -> (i32, i32) {
    %c0_i32 = arith.constant 0 : i32
    %c0_i32_0 = arith.constant 0 : i32
    %c0_i32_1 = arith.constant 0 : i32
    return %c0_i32, %c0_i32_0 : i32, i32
  }
  func.func @transform_5(%arg0: i32, %arg1: i32) -> (i32, i32) {
    %c0_i32 = arith.constant 0 : i32
    %c0_i32_0 = arith.constant 0 : i32
    %c0_i32_1 = arith.constant 0 : i32
    return %c0_i32, %c0_i32_0 : i32, i32
  }
  func.func @transform_6(%arg0: i32, %arg1: i32) -> (i32, i32) {
    %c0_i32 = arith.constant 0 : i32
    %c0_i32_0 = arith.constant 0 : i32
    %c0_i32_1 = arith.constant 0 : i32
    return %c0_i32, %c0_i32_0 : i32, i32
  }
  func.func @transform_7(%arg0: i32, %arg1: i32) -> (i32, i32) {
    %c0_i32 = arith.constant 0 : i32
    %c0_i32_0 = arith.constant 0 : i32
    %c0_i32_1 = arith.constant 0 : i32
    return %c0_i32, %c0_i32_0 : i32, i32
  }
  func.func @transform_8(%arg0: i32, %arg1: i32) -> (i32, i32) {
    %c0_i32 = arith.constant 0 : i32
    %c0_i32_0 = arith.constant 0 : i32
    %c0_i32_1 = arith.constant 0 : i32
    return %c0_i32, %c0_i32_0 : i32, i32
  }
  func.func @transform_9(%arg0: i32, %arg1: i32) -> (i32, i32) {
    %c0_i32 = arith.constant 0 : i32
    %c0_i32_0 = arith.constant 0 : i32
    %c0_i32_1 = arith.constant 0 : i32
    return %c0_i32, %c0_i32_0 : i32, i32
  }
  func.func @transform_10(%arg0: i32, %arg1: i32) -> (i32, i32) {
    %c0_i32 = arith.constant 0 : i32
    %c0_i32_0 = arith.constant 0 : i32
    %c0_i32_1 = arith.constant 0 : i32
    return %c0_i32, %c0_i32_0 : i32, i32
  }
  func.func @transform_11(%arg0: i32, %arg1: i32) -> (i32, i32) {
    %c0_i32 = arith.constant 0 : i32
    %c0_i32_0 = arith.constant 0 : i32
    %c0_i32_1 = arith.constant 0 : i32
    return %c0_i32, %c0_i32_0 : i32, i32
  }
  func.func @transform_12(%arg0: i32, %arg1: i32) -> (i32, i32, i32, i32) {
    %c0_i32 = arith.constant 0 : i32
    %c0_i32_0 = arith.constant 0 : i32
    %c0_i32_1 = arith.constant 0 : i32
    return %arg0, %arg1, %c0_i32, %c0_i32_0 : i32, i32, i32, i32
  }
}

module attributes {stable_mosaic.version = 11 : i64} {
  func.func @kernel(%arg0: i32, %arg1: i32, %arg2: memref<1x432x4xf32, #tpu.memory_space<vmem>>, %arg3: memref<1x240x1xf32, #tpu.memory_space<vmem>>, %arg4: memref<1x4xf32, #tpu.memory_space<vmem>>, %arg5: memref<1x4xf32, #tpu.memory_space<vmem>>, %arg6: memref<4x4xf32, #tpu.memory_space<vmem>>, %arg7: memref<1x4xf32, #tpu.memory_space<vmem>>, %arg8: memref<1x4xf32, #tpu.memory_space<vmem>>, %arg9: memref<36x4xf32, #tpu.memory_space<vmem>>, %arg10: memref<1x4xf32, #tpu.memory_space<vmem>>, %arg11: memref<1x4xf32, #tpu.memory_space<vmem>>, %arg12: memref<4x16xf32, #tpu.memory_space<vmem>>, %arg13: memref<4x16xf32, #tpu.memory_space<vmem>>, %arg14: memref<1x8x16x16xf32, #tpu.memory_space<vmem>>, %arg15: memref<256x4xf32, #tpu.memory_space<vmem>>) attributes {dimension_semantics = [#tpu.dimension_semantics<parallel>, #tpu.dimension_semantics<parallel>], iteration_bounds = array<i64: 2, 2>, scalar_prefetch = 0 : i64, scratch_operands = 1 : i64, tpu.core_type = #tpu.core_type<tc>, window_params = [{transform_indices = @transform_0, window_bounds = array<i64: 1, 432, 4>}, {transform_indices = @transform_1, window_bounds = array<i64: 1, 240, 1>}, {pipeline_mode = #tpu.pipeline_mode<synchronous>, transform_indices = @transform_2, window_bounds = array<i64: 1, 4>}, {pipeline_mode = #tpu.pipeline_mode<synchronous>, transform_indices = @transform_3, window_bounds = array<i64: 1, 4>}, {pipeline_mode = #tpu.pipeline_mode<synchronous>, transform_indices = @transform_4, window_bounds = array<i64: 4, 4>}, {pipeline_mode = #tpu.pipeline_mode<synchronous>, transform_indices = @transform_5, window_bounds = array<i64: 1, 4>}, {pipeline_mode = #tpu.pipeline_mode<synchronous>, transform_indices = @transform_6, window_bounds = array<i64: 1, 4>}, {pipeline_mode = #tpu.pipeline_mode<synchronous>, transform_indices = @transform_7, window_bounds = array<i64: 36, 4>}, {pipeline_mode = #tpu.pipeline_mode<synchronous>, transform_indices = @transform_8, window_bounds = array<i64: 1, 4>}, {pipeline_mode = #tpu.pipeline_mode<synchronous>, transform_indices = @transform_9, window_bounds = array<i64: 1, 4>}, {pipeline_mode = #tpu.pipeline_mode<synchronous>, transform_indices = @transform_10, window_bounds = array<i64: 4, 16>}, {pipeline_mode = #tpu.pipeline_mode<synchronous>, transform_indices = @transform_11, window_bounds = array<i64: 4, 16>}, {transform_indices = @transform_12, window_bounds = array<i64: 1, 8, 16, 16>}]} {
    %c192_i32 = arith.constant 192 : i32
    %0 = arith.muli %arg1, %c192_i32 : i32
    %1 = tpu.assume_multiple %0, 8 : i32
    %c0 = arith.constant 0 : index
    %2 = arith.index_cast %1 : i32 to index
    %c0_0 = arith.constant 0 : index
    %3 = vector.load %arg2[%c0, %2, %c0_0] : memref<1x432x4xf32, #tpu.memory_space<vmem>>, vector<1x240x4xf32>
    %4 = vector.shape_cast %3 : vector<1x240x4xf32> to vector<240x4xf32>
    %c0_1 = arith.constant 0 : index
    %c0_2 = arith.constant 0 : index
    %5 = vector.load %arg4[%c0_1, %c0_2] : memref<1x4xf32, #tpu.memory_space<vmem>>, vector<1x4xf32>
    %6 = vector.broadcast %5 : vector<1x4xf32> to vector<240x4xf32>
    %7 = arith.mulf %4, %6 : vector<240x4xf32>
    %c0_3 = arith.constant 0 : index
    %c0_4 = arith.constant 0 : index
    %8 = vector.load %arg5[%c0_3, %c0_4] : memref<1x4xf32, #tpu.memory_space<vmem>>, vector<1x4xf32>
    %9 = vector.broadcast %8 : vector<1x4xf32> to vector<240x4xf32>
    %10 = arith.addf %7, %9 : vector<240x4xf32>
    %cst = arith.constant 0.000000e+00 : f32
    %11 = vector.broadcast %cst : f32 to vector<240x4xf32>
    %12 = arith.maximumf %10, %11 : vector<240x4xf32>
    %c0_5 = arith.constant 0 : index
    %c0_6 = arith.constant 0 : index
    %13 = vector.load %arg6[%c0_5, %c0_6] : memref<4x4xf32, #tpu.memory_space<vmem>>, vector<4x4xf32>
    %cst_7 = arith.constant dense<0.000000e+00> : vector<240x4xf32>
    %14 = tpu.matmul %12, %13, %cst_7 {dimension_numbers = #tpu.dot_dimension_numbers<[1], [0], [0], [1], [0, 0, 1, 1], [], []>} : vector<240x4xf32>, vector<4x4xf32>, vector<240x4xf32> -> vector<240x4xf32>
    %c0_8 = arith.constant 0 : index
    %c0_9 = arith.constant 0 : index
    %15 = vector.load %arg7[%c0_8, %c0_9] : memref<1x4xf32, #tpu.memory_space<vmem>>, vector<1x4xf32>
    %16 = vector.broadcast %15 : vector<1x4xf32> to vector<240x4xf32>
    %17 = arith.mulf %14, %16 : vector<240x4xf32>
    %c0_10 = arith.constant 0 : index
    %c0_11 = arith.constant 0 : index
    %18 = vector.load %arg8[%c0_10, %c0_11] : memref<1x4xf32, #tpu.memory_space<vmem>>, vector<1x4xf32>
    %19 = vector.broadcast %18 : vector<1x4xf32> to vector<240x4xf32>
    %20 = arith.addf %17, %19 : vector<240x4xf32>
    %cst_12 = arith.constant 0.000000e+00 : f32
    %21 = vector.broadcast %cst_12 : f32 to vector<240x4xf32>
    %22 = arith.maximumf %20, %21 : vector<240x4xf32>
    %c0_13 = arith.constant 0 : index
    %c0_14 = arith.constant 0 : index
    %c0_15 = arith.constant 0 : index
    %23 = vector.load %arg3[%c0_13, %c0_14, %c0_15] : memref<1x240x1xf32, #tpu.memory_space<vmem>>, vector<1x240x1xf32>
    %24 = vector.shape_cast %23 : vector<1x240x1xf32> to vector<240x1xf32>
    %25 = vector.broadcast %24 : vector<240x1xf32> to vector<240x4xf32>
    %26 = arith.mulf %22, %25 : vector<240x4xf32>
    %cst_16 = arith.constant 0.000000e+00 : f32
    %27 = vector.broadcast %cst_16 : f32 to vector<8x4xf32>
    %c0_17 = arith.constant 0 : index
    %c0_18 = arith.constant 0 : index
    %28 = vector.load %arg15[%c0_17, %c0_18] : memref<256x4xf32, #tpu.memory_space<vmem>>, vector<8x4xf32>
    tpu.vector_store %arg15[%c0_17, %c0_18], %27 {strides = array<i32>} : memref<256x4xf32, #tpu.memory_space<vmem>>, vector<8x4xf32>,
    %c8 = arith.constant 8 : index
    %c0_19 = arith.constant 0 : index
    %29 = vector.load %arg15[%c8, %c0_19] : memref<256x4xf32, #tpu.memory_space<vmem>>, vector<240x4xf32>
    tpu.vector_store %arg15[%c8, %c0_19], %26 {strides = array<i32>} : memref<256x4xf32, #tpu.memory_space<vmem>>, vector<240x4xf32>,
    %cst_20 = arith.constant 0.000000e+00 : f32
    %30 = vector.broadcast %cst_20 : f32 to vector<8x4xf32>
    %c248 = arith.constant 248 : index
    %c0_21 = arith.constant 0 : index
    %31 = vector.load %arg15[%c248, %c0_21] : memref<256x4xf32, #tpu.memory_space<vmem>>, vector<8x4xf32>
    tpu.vector_store %arg15[%c248, %c0_21], %30 {strides = array<i32>} : memref<256x4xf32, #tpu.memory_space<vmem>>, vector<8x4xf32>,
    %c7 = arith.constant 7 : index
    %c0_22 = arith.constant 0 : index
    %32 = vector.load %arg15[%c7, %c0_22] : memref<256x4xf32, #tpu.memory_space<vmem>>, vector<192x4xf32>
    %c0_23 = arith.constant 0 : index
    %c0_24 = arith.constant 0 : index
    %33 = vector.load %arg9[%c0_23, %c0_24] : memref<36x4xf32, #tpu.memory_space<vmem>>, vector<4x4xf32>
    %cst_25 = arith.constant dense<0.000000e+00> : vector<192x4xf32>
    %34 = tpu.matmul %32, %33, %cst_25 {dimension_numbers = #tpu.dot_dimension_numbers<[1], [0], [0], [1], [0, 0, 1, 1], [], []>} : vector<192x4xf32>, vector<4x4xf32>, vector<192x4xf32> -> vector<192x4xf32>
    %c8_26 = arith.constant 8 : index
    %c0_27 = arith.constant 0 : index
    %35 = vector.load %arg15[%c8_26, %c0_27] : memref<256x4xf32, #tpu.memory_space<vmem>>, vector<192x4xf32>
    %c4 = arith.constant 4 : index
    %c0_28 = arith.constant 0 : index
    %36 = vector.load %arg9[%c4, %c0_28] : memref<36x4xf32, #tpu.memory_space<vmem>>, vector<4x4xf32>
    %cst_29 = arith.constant dense<0.000000e+00> : vector<192x4xf32>
    %37 = tpu.matmul %35, %36, %cst_29 {dimension_numbers = #tpu.dot_dimension_numbers<[1], [0], [0], [1], [0, 0, 1, 1], [], []>} : vector<192x4xf32>, vector<4x4xf32>, vector<192x4xf32> -> vector<192x4xf32>
    %38 = arith.addf %34, %37 : vector<192x4xf32>
    %c9 = arith.constant 9 : index
    %c0_30 = arith.constant 0 : index
    %39 = vector.load %arg15[%c9, %c0_30] : memref<256x4xf32, #tpu.memory_space<vmem>>, vector<192x4xf32>
    %c8_31 = arith.constant 8 : index
    %c0_32 = arith.constant 0 : index
    %40 = vector.load %arg9[%c8_31, %c0_32] : memref<36x4xf32, #tpu.memory_space<vmem>>, vector<4x4xf32>
    %cst_33 = arith.constant dense<0.000000e+00> : vector<192x4xf32>
    %41 = tpu.matmul %39, %40, %cst_33 {dimension_numbers = #tpu.dot_dimension_numbers<[1], [0], [0], [1], [0, 0, 1, 1], [], []>} : vector<192x4xf32>, vector<4x4xf32>, vector<192x4xf32> -> vector<192x4xf32>
    %42 = arith.addf %38, %41 : vector<192x4xf32>
    %c31 = arith.constant 31 : index
    %c0_34 = arith.constant 0 : index
    %43 = vector.load %arg15[%c31, %c0_34] : memref<256x4xf32, #tpu.memory_space<vmem>>, vector<192x4xf32>
    %c12 = arith.constant 12 : index
    %c0_35 = arith.constant 0 : index
    %44 = vector.load %arg9[%c12, %c0_35] : memref<36x4xf32, #tpu.memory_space<vmem>>, vector<4x4xf32>
    %cst_36 = arith.constant dense<0.000000e+00> : vector<192x4xf32>
    %45 = tpu.matmul %43, %44, %cst_36 {dimension_numbers = #tpu.dot_dimension_numbers<[1], [0], [0], [1], [0, 0, 1, 1], [], []>} : vector<192x4xf32>, vector<4x4xf32>, vector<192x4xf32> -> vector<192x4xf32>
    %46 = arith.addf %42, %45 : vector<192x4xf32>
    %c32 = arith.constant 32 : index
    %c0_37 = arith.constant 0 : index
    %47 = vector.load %arg15[%c32, %c0_37] : memref<256x4xf32, #tpu.memory_space<vmem>>, vector<192x4xf32>
    %c16 = arith.constant 16 : index
    %c0_38 = arith.constant 0 : index
    %48 = vector.load %arg9[%c16, %c0_38] : memref<36x4xf32, #tpu.memory_space<vmem>>, vector<4x4xf32>
    %cst_39 = arith.constant dense<0.000000e+00> : vector<192x4xf32>
    %49 = tpu.matmul %47, %48, %cst_39 {dimension_numbers = #tpu.dot_dimension_numbers<[1], [0], [0], [1], [0, 0, 1, 1], [], []>} : vector<192x4xf32>, vector<4x4xf32>, vector<192x4xf32> -> vector<192x4xf32>
    %50 = arith.addf %46, %49 : vector<192x4xf32>
    %c33 = arith.constant 33 : index
    %c0_40 = arith.constant 0 : index
    %51 = vector.load %arg15[%c33, %c0_40] : memref<256x4xf32, #tpu.memory_space<vmem>>, vector<192x4xf32>
    %c20 = arith.constant 20 : index
    %c0_41 = arith.constant 0 : index
    %52 = vector.load %arg9[%c20, %c0_41] : memref<36x4xf32, #tpu.memory_space<vmem>>, vector<4x4xf32>
    %cst_42 = arith.constant dense<0.000000e+00> : vector<192x4xf32>
    %53 = tpu.matmul %51, %52, %cst_42 {dimension_numbers = #tpu.dot_dimension_numbers<[1], [0], [0], [1], [0, 0, 1, 1], [], []>} : vector<192x4xf32>, vector<4x4xf32>, vector<192x4xf32> -> vector<192x4xf32>
    %54 = arith.addf %50, %53 : vector<192x4xf32>
    %c55 = arith.constant 55 : index
    %c0_43 = arith.constant 0 : index
    %55 = vector.load %arg15[%c55, %c0_43] : memref<256x4xf32, #tpu.memory_space<vmem>>, vector<192x4xf32>
    %c24 = arith.constant 24 : index
    %c0_44 = arith.constant 0 : index
    %56 = vector.load %arg9[%c24, %c0_44] : memref<36x4xf32, #tpu.memory_space<vmem>>, vector<4x4xf32>
    %cst_45 = arith.constant dense<0.000000e+00> : vector<192x4xf32>
    %57 = tpu.matmul %55, %56, %cst_45 {dimension_numbers = #tpu.dot_dimension_numbers<[1], [0], [0], [1], [0, 0, 1, 1], [], []>} : vector<192x4xf32>, vector<4x4xf32>, vector<192x4xf32> -> vector<192x4xf32>
    %58 = arith.addf %54, %57 : vector<192x4xf32>
    %c56 = arith.constant 56 : index
    %c0_46 = arith.constant 0 : index
    %59 = vector.load %arg15[%c56, %c0_46] : memref<256x4xf32, #tpu.memory_space<vmem>>, vector<192x4xf32>
    %c28 = arith.constant 28 : index
    %c0_47 = arith.constant 0 : index
    %60 = vector.load %arg9[%c28, %c0_47] : memref<36x4xf32, #tpu.memory_space<vmem>>, vector<4x4xf32>
    %cst_48 = arith.constant dense<0.000000e+00> : vector<192x4xf32>
    %61 = tpu.matmul %59, %60, %cst_48 {dimension_numbers = #tpu.dot_dimension_numbers<[1], [0], [0], [1], [0, 0, 1, 1], [], []>} : vector<192x4xf32>, vector<4x4xf32>, vector<192x4xf32> -> vector<192x4xf32>
    %62 = arith.addf %58, %61 : vector<192x4xf32>
    %c57 = arith.constant 57 : index
    %c0_49 = arith.constant 0 : index
    %63 = vector.load %arg15[%c57, %c0_49] : memref<256x4xf32, #tpu.memory_space<vmem>>, vector<192x4xf32>
    %c32_50 = arith.constant 32 : index
    %c0_51 = arith.constant 0 : index
    %64 = vector.load %arg9[%c32_50, %c0_51] : memref<36x4xf32, #tpu.memory_space<vmem>>, vector<4x4xf32>
    %cst_52 = arith.constant dense<0.000000e+00> : vector<192x4xf32>
    %65 = tpu.matmul %63, %64, %cst_52 {dimension_numbers = #tpu.dot_dimension_numbers<[1], [0], [0], [1], [0, 0, 1, 1], [], []>} : vector<192x4xf32>, vector<4x4xf32>, vector<192x4xf32> -> vector<192x4xf32>
    %66 = arith.addf %62, %65 : vector<192x4xf32>
    %c0_53 = arith.constant 0 : index
    %c0_54 = arith.constant 0 : index
    %67 = vector.load %arg10[%c0_53, %c0_54] : memref<1x4xf32, #tpu.memory_space<vmem>>, vector<1x4xf32>
    %68 = vector.broadcast %67 : vector<1x4xf32> to vector<192x4xf32>
    %69 = arith.mulf %66, %68 : vector<192x4xf32>
    %c0_55 = arith.constant 0 : index
    %c0_56 = arith.constant 0 : index
    %70 = vector.load %arg11[%c0_55, %c0_56] : memref<1x4xf32, #tpu.memory_space<vmem>>, vector<1x4xf32>
    %71 = vector.broadcast %70 : vector<1x4xf32> to vector<192x4xf32>
    %72 = arith.addf %69, %71 : vector<192x4xf32>
    %cst_57 = arith.constant 0.000000e+00 : f32
    %73 = vector.broadcast %cst_57 : f32 to vector<192x4xf32>
    %74 = arith.maximumf %72, %73 : vector<192x4xf32>
    %c0_58 = arith.constant 0 : index
    %c0_59 = arith.constant 0 : index
    %75 = vector.load %arg12[%c0_58, %c0_59] : memref<4x16xf32, #tpu.memory_space<vmem>>, vector<4x16xf32>
    %cst_60 = arith.constant dense<0.000000e+00> : vector<192x16xf32>
    %76 = tpu.matmul %74, %75, %cst_60 {dimension_numbers = #tpu.dot_dimension_numbers<[1], [0], [0], [1], [0, 0, 1, 1], [], []>} : vector<192x4xf32>, vector<4x16xf32>, vector<192x16xf32> -> vector<192x16xf32>
    %77 = vector.extract_strided_slice %12 {offsets = [24, 0], sizes = [192, 4], strides = [1, 1]} : vector<240x4xf32> to vector<192x4xf32>
    %c0_61 = arith.constant 0 : index
    %c0_62 = arith.constant 0 : index
    %78 = vector.load %arg13[%c0_61, %c0_62] : memref<4x16xf32, #tpu.memory_space<vmem>>, vector<4x16xf32>
    %cst_63 = arith.constant dense<0.000000e+00> : vector<192x16xf32>
    %79 = tpu.matmul %77, %78, %cst_63 {dimension_numbers = #tpu.dot_dimension_numbers<[1], [0], [0], [1], [0, 0, 1, 1], [], []>} : vector<192x4xf32>, vector<4x16xf32>, vector<192x16xf32> -> vector<192x16xf32>
    %80 = arith.addf %76, %79 : vector<192x16xf32>
    %81 = vector.extract_strided_slice %80 {offsets = [1, 0], sizes = [16, 16], strides = [1, 1]} : vector<192x16xf32> to vector<16x16xf32>
    %c0_64 = arith.constant 0 : index
    %c0_65 = arith.constant 0 : index
    %c0_66 = arith.constant 0 : index
    %c0_67 = arith.constant 0 : index
    %82 = vector.load %arg14[%c0_64, %c0_65, %c0_66, %c0_67] : memref<1x8x16x16xf32, #tpu.memory_space<vmem>>, vector<1x1x16x16xf32>
    %83 = vector.shape_cast %82 : vector<1x1x16x16xf32> to vector<16x16xf32>
    %84 = vector.shape_cast %81 : vector<16x16xf32> to vector<1x1x16x16xf32>
    tpu.vector_store %arg14[%c0_64, %c0_65, %c0_66, %c0_67], %84 {strides = array<i32>} : memref<1x8x16x16xf32, #tpu.memory_space<vmem>>, vector<1x1x16x16xf32>,
    %85 = vector.extract_strided_slice %80 {offsets = [25, 0], sizes = [16, 16], strides = [1, 1]} : vector<192x16xf32> to vector<16x16xf32>
    %c0_68 = arith.constant 0 : index
    %c1 = arith.constant 1 : index
    %c0_69 = arith.constant 0 : index
    %c0_70 = arith.constant 0 : index
    %86 = vector.load %arg14[%c0_68, %c1, %c0_69, %c0_70] : memref<1x8x16x16xf32, #tpu.memory_space<vmem>>, vector<1x1x16x16xf32>
    %87 = vector.shape_cast %86 : vector<1x1x16x16xf32> to vector<16x16xf32>
    %88 = vector.shape_cast %85 : vector<16x16xf32> to vector<1x1x16x16xf32>
    tpu.vector_store %arg14[%c0_68, %c1, %c0_69, %c0_70], %88 {strides = array<i32>} : memref<1x8x16x16xf32, #tpu.memory_space<vmem>>, vector<1x1x16x16xf32>,
    %89 = vector.extract_strided_slice %80 {offsets = [49, 0], sizes = [16, 16], strides = [1, 1]} : vector<192x16xf32> to vector<16x16xf32>
    %c0_71 = arith.constant 0 : index
    %c2 = arith.constant 2 : index
    %c0_72 = arith.constant 0 : index
    %c0_73 = arith.constant 0 : index
    %90 = vector.load %arg14[%c0_71, %c2, %c0_72, %c0_73] : memref<1x8x16x16xf32, #tpu.memory_space<vmem>>, vector<1x1x16x16xf32>
    %91 = vector.shape_cast %90 : vector<1x1x16x16xf32> to vector<16x16xf32>
    %92 = vector.shape_cast %89 : vector<16x16xf32> to vector<1x1x16x16xf32>
    tpu.vector_store %arg14[%c0_71, %c2, %c0_72, %c0_73], %92 {strides = array<i32>} : memref<1x8x16x16xf32, #tpu.memory_space<vmem>>, vector<1x1x16x16xf32>,
    %93 = vector.extract_strided_slice %80 {offsets = [73, 0], sizes = [16, 16], strides = [1, 1]} : vector<192x16xf32> to vector<16x16xf32>
    %c0_74 = arith.constant 0 : index
    %c3 = arith.constant 3 : index
    %c0_75 = arith.constant 0 : index
    %c0_76 = arith.constant 0 : index
    %94 = vector.load %arg14[%c0_74, %c3, %c0_75, %c0_76] : memref<1x8x16x16xf32, #tpu.memory_space<vmem>>, vector<1x1x16x16xf32>
    %95 = vector.shape_cast %94 : vector<1x1x16x16xf32> to vector<16x16xf32>
    %96 = vector.shape_cast %93 : vector<16x16xf32> to vector<1x1x16x16xf32>
    tpu.vector_store %arg14[%c0_74, %c3, %c0_75, %c0_76], %96 {strides = array<i32>} : memref<1x8x16x16xf32, #tpu.memory_space<vmem>>, vector<1x1x16x16xf32>,
    %97 = vector.extract_strided_slice %80 {offsets = [97, 0], sizes = [16, 16], strides = [1, 1]} : vector<192x16xf32> to vector<16x16xf32>
    %c0_77 = arith.constant 0 : index
    %c4_78 = arith.constant 4 : index
    %c0_79 = arith.constant 0 : index
    %c0_80 = arith.constant 0 : index
    %98 = vector.load %arg14[%c0_77, %c4_78, %c0_79, %c0_80] : memref<1x8x16x16xf32, #tpu.memory_space<vmem>>, vector<1x1x16x16xf32>
    %99 = vector.shape_cast %98 : vector<1x1x16x16xf32> to vector<16x16xf32>
    %100 = vector.shape_cast %97 : vector<16x16xf32> to vector<1x1x16x16xf32>
    tpu.vector_store %arg14[%c0_77, %c4_78, %c0_79, %c0_80], %100 {strides = array<i32>} : memref<1x8x16x16xf32, #tpu.memory_space<vmem>>, vector<1x1x16x16xf32>,
    %101 = vector.extract_strided_slice %80 {offsets = [121, 0], sizes = [16, 16], strides = [1, 1]} : vector<192x16xf32> to vector<16x16xf32>
    %c0_81 = arith.constant 0 : index
    %c5 = arith.constant 5 : index
    %c0_82 = arith.constant 0 : index
    %c0_83 = arith.constant 0 : index
    %102 = vector.load %arg14[%c0_81, %c5, %c0_82, %c0_83] : memref<1x8x16x16xf32, #tpu.memory_space<vmem>>, vector<1x1x16x16xf32>
    %103 = vector.shape_cast %102 : vector<1x1x16x16xf32> to vector<16x16xf32>
    %104 = vector.shape_cast %101 : vector<16x16xf32> to vector<1x1x16x16xf32>
    tpu.vector_store %arg14[%c0_81, %c5, %c0_82, %c0_83], %104 {strides = array<i32>} : memref<1x8x16x16xf32, #tpu.memory_space<vmem>>, vector<1x1x16x16xf32>,
    %105 = vector.extract_strided_slice %80 {offsets = [145, 0], sizes = [16, 16], strides = [1, 1]} : vector<192x16xf32> to vector<16x16xf32>
    %c0_84 = arith.constant 0 : index
    %c6 = arith.constant 6 : index
    %c0_85 = arith.constant 0 : index
    %c0_86 = arith.constant 0 : index
    %106 = vector.load %arg14[%c0_84, %c6, %c0_85, %c0_86] : memref<1x8x16x16xf32, #tpu.memory_space<vmem>>, vector<1x1x16x16xf32>
    %107 = vector.shape_cast %106 : vector<1x1x16x16xf32> to vector<16x16xf32>
    %108 = vector.shape_cast %105 : vector<16x16xf32> to vector<1x1x16x16xf32>
    tpu.vector_store %arg14[%c0_84, %c6, %c0_85, %c0_86], %108 {strides = array<i32>} : memref<1x8x16x16xf32, #tpu.memory_space<vmem>>, vector<1x1x16x16xf32>,
    %109 = vector.extract_strided_slice %80 {offsets = [169, 0], sizes = [16, 16], strides = [1, 1]} : vector<192x16xf32> to vector<16x16xf32>
    %c0_87 = arith.constant 0 : index
    %c7_88 = arith.constant 7 : index
    %c0_89 = arith.constant 0 : index
    %c0_90 = arith.constant 0 : index
    %110 = vector.load %arg14[%c0_87, %c7_88, %c0_89, %c0_90] : memref<1x8x16x16xf32, #tpu.memory_space<vmem>>, vector<1x1x16x16xf32>
    %111 = vector.shape_cast %110 : vector<1x1x16x16xf32> to vector<16x16xf32>
    %112 = vector.shape_cast %109 : vector<16x16xf32> to vector<1x1x16x16xf32>
    tpu.vector_store %arg14[%c0_87, %c7_88, %c0_89, %c0_90], %112 {strides = array<i32>} : memref<1x8x16x16xf32, #tpu.memory_space<vmem>>, vector<1x1x16x16xf32>,
    return
  }
  func.func @transform_0(%arg0: i32, %arg1: i32) -> (i32, i32, i32) {
    %c0_i32 = arith.constant 0 : i32
    %c0_i32_0 = arith.constant 0 : i32
    %c0_i32_1 = arith.constant 0 : i32
    return %arg0, %c0_i32, %c0_i32_0 : i32, i32, i32
  }
  func.func @transform_1(%arg0: i32, %arg1: i32) -> (i32, i32, i32) {
    %c0_i32 = arith.constant 0 : i32
    %c0_i32_0 = arith.constant 0 : i32
    %c0_i32_1 = arith.constant 0 : i32
    return %arg1, %c0_i32, %c0_i32_0 : i32, i32, i32
  }
  func.func @transform_2(%arg0: i32, %arg1: i32) -> (i32, i32) {
    %c0_i32 = arith.constant 0 : i32
    %c0_i32_0 = arith.constant 0 : i32
    %c0_i32_1 = arith.constant 0 : i32
    return %c0_i32, %c0_i32_0 : i32, i32
  }
  func.func @transform_3(%arg0: i32, %arg1: i32) -> (i32, i32) {
    %c0_i32 = arith.constant 0 : i32
    %c0_i32_0 = arith.constant 0 : i32
    %c0_i32_1 = arith.constant 0 : i32
    return %c0_i32, %c0_i32_0 : i32, i32
  }
  func.func @transform_4(%arg0: i32, %arg1: i32) -> (i32, i32) {
    %c0_i32 = arith.constant 0 : i32
    %c0_i32_0 = arith.constant 0 : i32
    %c0_i32_1 = arith.constant 0 : i32
    return %c0_i32, %c0_i32_0 : i32, i32
  }
  func.func @transform_5(%arg0: i32, %arg1: i32) -> (i32, i32) {
    %c0_i32 = arith.constant 0 : i32
    %c0_i32_0 = arith.constant 0 : i32
    %c0_i32_1 = arith.constant 0 : i32
    return %c0_i32, %c0_i32_0 : i32, i32
  }
  func.func @transform_6(%arg0: i32, %arg1: i32) -> (i32, i32) {
    %c0_i32 = arith.constant 0 : i32
    %c0_i32_0 = arith.constant 0 : i32
    %c0_i32_1 = arith.constant 0 : i32
    return %c0_i32, %c0_i32_0 : i32, i32
  }
  func.func @transform_7(%arg0: i32, %arg1: i32) -> (i32, i32) {
    %c0_i32 = arith.constant 0 : i32
    %c0_i32_0 = arith.constant 0 : i32
    %c0_i32_1 = arith.constant 0 : i32
    return %c0_i32, %c0_i32_0 : i32, i32
  }
  func.func @transform_8(%arg0: i32, %arg1: i32) -> (i32, i32) {
    %c0_i32 = arith.constant 0 : i32
    %c0_i32_0 = arith.constant 0 : i32
    %c0_i32_1 = arith.constant 0 : i32
    return %c0_i32, %c0_i32_0 : i32, i32
  }
  func.func @transform_9(%arg0: i32, %arg1: i32) -> (i32, i32) {
    %c0_i32 = arith.constant 0 : i32
    %c0_i32_0 = arith.constant 0 : i32
    %c0_i32_1 = arith.constant 0 : i32
    return %c0_i32, %c0_i32_0 : i32, i32
  }
  func.func @transform_10(%arg0: i32, %arg1: i32) -> (i32, i32) {
    %c0_i32 = arith.constant 0 : i32
    %c0_i32_0 = arith.constant 0 : i32
    %c0_i32_1 = arith.constant 0 : i32
    return %c0_i32, %c0_i32_0 : i32, i32
  }
  func.func @transform_11(%arg0: i32, %arg1: i32) -> (i32, i32) {
    %c0_i32 = arith.constant 0 : i32
    %c0_i32_0 = arith.constant 0 : i32
    %c0_i32_1 = arith.constant 0 : i32
    return %c0_i32, %c0_i32_0 : i32, i32
  }
  func.func @transform_12(%arg0: i32, %arg1: i32) -> (i32, i32, i32, i32) {
    %c0_i32 = arith.constant 0 : i32
    %c0_i32_0 = arith.constant 0 : i32
    %c0_i32_1 = arith.constant 0 : i32
    return %arg0, %arg1, %c0_i32, %c0_i32_0 : i32, i32, i32, i32
  }
}

</mosaic_0001>

<bundles_post_ra>
// kernel: tpu_custom_call.1
= control target key start
LH: loop header
LB: loop body
LE: loop exit
PB: predicated region body
PF: predicated region fallthrough
CT: control target
= control target key end

     0   :  { %s7715_s0 = inlined_call_operand.vmem [shape: f32[2,432,4], index: 0, kind: input, shape index: {}]   ;;  %s7716_s1 = inlined_call_operand.vmem [shape: f32[2,240,1], index: 1, kind: input, shape index: {}]   ;;  %s7717_s2 = inlined_call_operand.vmem [shape: f32[1,4], index: 2, kind: input, shape index: {}]   ;;  %s7718_s3 = inlined_call_operand.vmem [shape: f32[1,4], index: 3, kind: input, shape index: {}]   ;;  %s7719_s4 = inlined_call_operand.vmem [shape: f32[4,4], index: 4, kind: input, shape index: {}]   ;;  %s7720_s5 = inlined_call_operand.vmem [shape: f32[1,4], index: 5, kind: input, shape index: {}]   ;;  %s7721_s6 = inlined_call_operand.vmem [shape: f32[1,4], index: 6, kind: input, shape index: {}]   ;;  %s7722_s7 = inlined_call_operand.vmem [shape: f32[36,4], index: 7, kind: input, shape index: {}]   ;;  %s7723_s8 = inlined_call_operand.vmem [shape: f32[1,4], index: 8, kind: input, shape index: {}]   ;;  %s7724_s9 = inlined_call_operand.vmem [shape: f32[1,4], index: 9, kind: input, shape index: {}]   ;;  %s7725_s10 = inlined_call_operand.vmem [shape: f32[4,16], index: 10, kind: input, shape index: {}]   ;;  %s7726_s11 = inlined_call_operand.vmem [shape: f32[4,16], index: 11, kind: input, shape index: {}]   ;;  %s7727_s12 = inlined_call_operand.hbm [shape: f32[2,16,16,16], index: 12, kind: output, shape index: {}]  }
   0x1   :  { %7782 = sst [smem:[#allocation37_spill]] %s7719_s4 }
   0x2   :  { %17 = vsyncpa [#allocation4], 0 }
   0x3   :  { %19 = vsyncpa [#allocation4 + $0x1], 0  ;;  %s6233_s21 = smov 0   ;;  %s6235_s22 = smov 0  }
   0x4   :  { %s6237_s23 = smov 0   ;;  %s6239_s24 = smov 0  }
   0x5   :  { %s6241_s25 = smov 0   ;;  %s6243_s26 = smov 0  }
   0x6   :  { %s6245_s27 = smov 0   ;;  %s6247_s28 = smov 0  }
   0x7 LB: > { %7783 = sst [smem:[#allocation6_spill]] %s6141_s23  ;;  %s4650_s29 = sadd.s32 4294967295, %s6161_s28   ;;  %s6161_s28 = sphi %s6247_s28, %s25_s28   ;;  %s6157_s27 = sphi %s6245_s27, %s7871_s27   ;;  %s6153_s26 = sphi %s6243_s26, %s7870_s26   ;;  %s6149_s25 = sphi %s6241_s25, %s7869_s25   ;;  %s6145_s24 = sphi %s6239_s24, %s7868_s24   ;;  %s6141_s23 = sphi %s6237_s23, %s7867_s23   ;;  %s6137_s22 = sphi %s6235_s22, %s7873_s22   ;;  %s6133_s21 = sphi %s6233_s21, %s7872_s21  }
   0x8   : > { %7784 = sst [smem:[#allocation7_spill]] %s6153_s26  ;;  %s4651_s30 = sadd.s32 4294967294, %s6161_s28  }
   0x9   : > { %7785 = sst [smem:[#allocation8_spill]] %s6157_s27  ;;  %s34_s13 = sadd.s32 1, %s6153_s26 }
   0xa   : > { %p35_p0 = scmp.ge.s32.totalorder %s34_s13, 2  ;;  %s37_s14 = sadd.s32 1, %s6157_s27 }
   0xb   : > { %p318_p1 = scmp.ne.s32.totalorder %s6141_s23, %s6137_s22  ;;  %p319_p2 = scmp.eq.s32.totalorder %s4650_s29, 3 }
   0xc   : > { %s7875_s13 = smov (%p35_p0, %s34_s13), 0  ;;  %s7877_s14 = smov (!%p35_p0, %s37_s14), %s6157_s27 }
   0xd   : > { %7786 = sst [smem:[#allocation9_spill]] %s7875_s13  ;;  %s304_s15 = ssub.s32 %s6153_s26, %s7875_s13 }
   0xe   : > { %p6284_p3 = por %p319_p2, %p318_p1  ;;  %p39_p4 = scmp.ge.s32.totalorder %s7877_s14, 2 }
   0xf   : > { %p324_p5 = scmp.ne.s32.totalorder %s6137_s22, %s6133_s21  ;;  %p325_p6 = scmp.eq.s32.totalorder %s4651_s30, 3 }
  0x10   : > { %p4654_p7 = scmp.ge.s32.totalorder %s6161_s28, 1  ;;  %s7879_s14 = smov (%p39_p4, %s7877_s14), 0 }
  0x11   : > { %7788 = sst [smem:[#allocation10_spill]] %s7879_s14  ;;  %p6293_p8 = por %p325_p6, %p324_p5 }
  0x12   : > { %p389_p9 = scmp.lt.s32.totalorder %s6161_s28, 5  ;;  %s303_s18 = ssub.s32 %s6157_s27, %s7879_s14 }
  0x13   : > { %s308_s19 = sadd.s32 1, %s6141_s23  ;;  %s305_s20 = sor.u32 %s304_s15, %s303_s18 }
  0x14   : > { %p390_p10 = pnand %p4654_p7, %p389_p9  ;;  %p306_p11 = scmp.eq.s32.totalorder %s305_s20, 0 }
  0x16   : > { %s6302_s29 = scalar_select %p306_p11, %s6141_s23, %s308_s19  }
  0x17   : > { %393 = sbr.rel (%p390_p10) target bundleno = 1061 (0x425), region = 68 }
  0x18   : > { %7790 = sst [smem:[#allocation11_spill]] %s6302_s29 }
  0x1e   : > { %s7791_s4 = sld [smem:[#allocation37_spill]]  ;;  %vm675_vm0 = vcmask 1043456   ;;  %p436_p12 = scmp.lt.s32.totalorder %s6149_s25, 1  ;;  %v6163_v1 = vmov 0   ;;  %v6320_v2 = vld [vmem:[%s7717_s2] ss:$0 sm:$0xff] }
  0x1f   : > { %s447_s30 = smul.u32 192, %s6145_s24  ;;  %p441_p13 = scmp.lt.s32.totalorder %s6145_s24, 1  ;;  %6066 = vset.pattern.permute.xlu1 %v6163_v1  ;;  %6065 = vset.pattern.permute.xlu0 %v6163_v1  ;;  %v6327_v3 = vld [vmem:[%s7718_s3] ss:$0 sm:$0xff]  ;;  %vm584_vm1 = vcmask 31744   ;;  %vm4511_vm2 = vcmask 130048  }
  0x20   : > { %s437_s15 = scalar_select %p436_p12, %s6149_s25, 1  ;;  %vm4509_vm3 = vcmask 130049   ;;  %vm4513_vm4 = vcmask 122880  }
  0x21   : > { %s442_s18 = scalar_select %p441_p13, %s6145_s24, 1 }
  0x22   : > { %s5988_s26 = smul.u32 432, %s437_s15  ;;  %s433_s19 = sand.u32 1, %s6137_s22  }
  0x23   : > { %s5989_s15 = smul.u32 240, %s442_s18  ;;  %s4994_s23 = sshll.u32 %s6149_s25, 5 }
  0x24   : > { %v583_v0 = vld [vmem:[%s7791_s4] sm:$0xf]  ;;  %s440_s20 = scalar_lea.vmem %s7715_s0, %s5988_s26  ;;  %s4998_s4 = sshll.u32 %s6145_s24, 4 }
  0x25   : > { %5305 = vmatprep.subr.msk.mxu0 %vm675_vm0, %v583_v0  ;;  %s6322_s27 = scalar_lea.vmem %s440_s20, %s447_s30  ;;  %s6347_s14 = scalar_lea.vmem %s7716_s1, %s5989_s15 }
  0x26   : > { %5306 = vmatpush3.msk.msra.mxu0 %vm675_vm0, %v583_v0  ;;  %v449_v4 = vld [vmem:[%s6322_s27] sm:$0xff]  ;;  %v450_v5 = vld [vmem:[%s6322_s27 + $0x8] sm:$0xff]  ;;  %v451_v6 = vld [vmem:[%s6322_s27 + $0x10] sm:$0xff]  ;;  %s4655_s20 = sshll.u32 %s433_s19, 7  ;;  %s7663_s18 = scalar_lea.sflag [#allocation4], %s433_s19 }
  0x27   : > { %v486_v7 = vmul.f32 %v6320_v2, %v449_v4  ;;  %v487_v8 = vmul.f32 %v6320_v2, %v450_v5  ;;  %v488_v9 = vmul.f32 %v6320_v2, %v451_v6  ;;  %v452_v10 = vld [vmem:[%s6322_s27 + $0x18] sm:$0xff]  ;;  %v453_v11 = vld [vmem:[%s6322_s27 + $0x20] sm:$0xff]  ;;  %v454_v12 = vld [vmem:[%s6322_s27 + $0x28] sm:$0xff]  ;;  %s7601_s15 = scalar_lea.vmem [#allocation3], %s4655_s20  ;;  %s6165_s13 = smov [#allocation3]  }
  0x28   : > { %v489_v13 = vmul.f32 %v6320_v2, %v452_v10  ;;  %v490_v14 = vmul.f32 %v6320_v2, %v453_v11  ;;  %v455_v15 = vld [vmem:[%s6322_s27 + $0x30] sm:$0xff]  ;;  %v491_v20 = vmul.f32 %v6320_v2, %v454_v12  ;;  %v456_v26 = vld [vmem:[%s6322_s27 + $0x38] sm:$0xff]  ;;  %v457_v27 = vld [vmem:[%s6322_s27 + $0x40] sm:$0xff]  ;;  %s4560_s29 = sshll.u32 %s7601_s15, 4  ;;  %s6071_s20 = sshll.u32 %s6165_s13, 4  ;;  %s7655_s29 = int_to_ptr.vmem [resolvable:$true] %s4560_s29  ;;  %s6072_s20 = int_to_ptr.vmem [resolvable:$false] %s6071_s20 }
  0x29   : > { %v523_v16 = vadd.f32 %v6327_v3, %v486_v7  ;;  %v524_v17 = vadd.f32 %v6327_v3, %v487_v8  ;;  %v525_v18 = vadd.f32 %v6327_v3, %v488_v9  ;;  %v492_v21 = vmul.f32 %v6320_v2, %v455_v15  ;;  %v1022_v28 = vld [vmem:[%s6347_s14 + $0xc0] sm:$0xff]  ;;  %v1020_v29 = vld [vmem:[%s6347_s14 + $0xb0] sm:$0xff]  ;;  %v458_v37 = vld [vmem:[%s6322_s27 + $0x48] sm:$0xff]  ;;  %s6067_s26 = scalar_lea.vmem %s7655_s29, 2048  ;;  %p6074_p4 = scmp.lt.s32.totalorder %s7655_s29, %s6072_s20 }
  0x2a   : > { %v6350_v19 = vadd.f32 %v6327_v3, %v489_v13  ;;  %v6355_v25 = vadd.f32 %v6327_v3, %v490_v14  ;;  %1150 = vperm.xlu1 %6066, %v1022_v28   ;;  %v6365_v31 = vadd.f32 %v6327_v3, %v491_v20  ;;  %v493_v32 = vmul.f32 %v6320_v2, %v456_v26  ;;  %v1000_v33 = vld [vmem:[%s6347_s14 + $0x10] sm:$0xff]  ;;  %v1021_v38 = vld [vmem:[%s6347_s14 + $0xb8] sm:$0xff]  ;;  %v1002_v43 = vld [vmem:[%s6347_s14 + $0x20] sm:$0xff]  ;;  %p6068_p0 = scmp.ne.s32.totalorder %s7655_s29, %s6067_s26 }
  0x2b   : > { %v553_v22 = vmax.f32 %v523_v16, 0.0  ;;  %v554_v23 = vmax.f32 %v524_v17, 0.0  ;;  %v555_v24 = vmax.f32 %v525_v18, 0.0  ;;  %1140 = vperm.xlu0 %6065, %v1020_v29   ;;  %v6372_v35 = vadd.f32 %v6327_v3, %v492_v21  ;;  %v459_v39 = vld [vmem:[%s6322_s27 + $0x50] sm:$0xff]  ;;  %v460_v47 = vld [vmem:[%s6322_s27 + $0x58] sm:$0xff]  ;;  %v461_v48 = vld [vmem:[%s6322_s27 + $0x60] sm:$0xff] }
  0x2c   : > { %v7756_v30 = vmax.f32 %v6350_v19, 0.0  ;;  %v7755_v34 = vmax.f32 %v6355_v25, 0.0  ;;  %v494_v36 = vmul.f32 %v6320_v2, %v457_v27  ;;  %v7754_v40 = vmax.f32 %v6365_v31, 0.0  ;;  %v1001_v49 = vld [vmem:[%s6347_s14 + $0x18] sm:$0xff]  ;;  %v1004_v53 = vld [vmem:[%s6347_s14 + $0x30] sm:$0xff]  ;;  %v462_v57 = vld [vmem:[%s6322_s27 + $0x68] sm:$0xff]  ;;  %p6069_p1 = pnand %p6068_p0, %p6284_p3 }
  0x2d   : > { %5307 = vmatprep.mubr.msk.f32.mxu0 %vm584_vm1, %v553_v22  ;;  %v6383_v41 = vadd.f32 %v6327_v3, %v493_v32  ;;  %v495_v42 = vmul.f32 %v6320_v2, %v458_v37  ;;  %v7753_v44 = vmax.f32 %v6372_v35, 0.0  ;;  %v496_v46 = vmul.f32 %v6320_v2, %v459_v39  ;;  %v463_v58 = vld [vmem:[%s6322_s27 + $0x70] sm:$0xff]  ;;  %v1003_v59 = vld [vmem:[%s6347_s14 + $0x28] sm:$0xff]  ;;  %v1006_v63 = vld [vmem:[%s6347_s14 + $0x40] sm:$0xff] }
  0x2e   : > { %5308 = vmatmul.mubr.msk.f32.vlgmr.msra.gmra.mrb[0].mxu0 %vm584_vm1, %v554_v23  ;;  %1040 = vperm.xlu1 %6066, %v1000_v33   ;;  %v6392_v45 = vadd.f32 %v6327_v3, %v494_v36  ;;  %v497_v52 = vmul.f32 %v6320_v2, %v460_v47  ;;  %v498_v56 = vmul.f32 %v6320_v2, %v461_v48  ;;  %v464_v5 = vld [vmem:[%s6322_s27 + $0x78] sm:$0xff]  ;;  %v465_v6 = vld [vmem:[%s6322_s27 + $0x80] sm:$0xff]  ;;  %v1008_v11 = vld [vmem:[%s6347_s14 + $0x50] sm:$0xff]  ;;  %p6070_p2 = pneg %p6069_p1 }
  0x2f   : > { %5310 = vmatprep.mubr.msk.f32.mxu0 %vm584_vm1, %v555_v24  ;;  %1145 = vperm.xlu0 %6065, %v1021_v38   ;;  %v7752_v50 = vmax.f32 %v6383_v41, 0.0  ;;  %v6403_v51 = vadd.f32 %v6327_v3, %v495_v42  ;;  %v6412_v55 = vadd.f32 %v6327_v3, %v496_v46  ;;  %v499_v62 = vmul.f32 %v6320_v2, %v462_v57  ;;  %v1005_v7 = vld [vmem:[%s6347_s14 + $0x38] sm:$0xff]  ;;  %v466_v15 = vld [vmem:[%s6322_s27 + $0x88] sm:$0xff]  ;;  %v467_v16 = vld [vmem:[%s6322_s27 + $0x90] sm:$0xff] }
  0x30   : > { %v7751_v54 = vmax.f32 %v6392_v45, 0.0  ;;  %v6423_v61 = vadd.f32 %v6327_v3, %v497_v52  ;;  %v6432_v1 = vadd.f32 %v6327_v3, %v498_v56  ;;  %v500_v4 = vmul.f32 %v6320_v2, %v463_v58  ;;  %v1007_v17 = vld [vmem:[%s6347_s14 + $0x48] sm:$0xff]  ;;  %v1010_v22 = vld [vmem:[%s6347_s14 + $0x60] sm:$0xff]  ;;  %v468_v27 = vld [vmem:[%s6322_s27 + $0x98] sm:$0xff] }
  0x31   : > { %v7750_v60 = vmax.f32 %v6403_v51, 0.0  ;;  %v7749_v0 = vmax.f32 %v6412_v55, 0.0  ;;  %v6443_v9 = vadd.f32 %v6327_v3, %v499_v62  ;;  %v501_v10 = vmul.f32 %v6320_v2, %v464_v5  ;;  %v469_v28 = vld [vmem:[%s6322_s27 + $0xa0] sm:$0xff]  ;;  %v1009_v29 = vld [vmem:[%s6347_s14 + $0x58] sm:$0xff]  ;;  %v1012_v37 = vld [vmem:[%s6347_s14 + $0x70] sm:$0xff] }
  0x32   : > { %5311 = vmatmul.mubr.msk.f32.gmra.mrb[2].mxu0 %vm584_vm1, %v7756_v30  ;;  %1050 = vperm.xlu1 %6066, %v1002_v43   ;;  %v7748_v8 = vmax.f32 %v6423_v61, 0.0  ;;  %v7747_v12 = vmax.f32 %v6432_v1, 0.0  ;;  %v6452_v13 = vadd.f32 %v6327_v3, %v500_v4  ;;  %v502_v14 = vmul.f32 %v6320_v2, %v465_v6  ;;  %v470_v43 = vld [vmem:[%s6322_s27 + $0xa8] sm:$0xff]  ;;  %v471_v46 = vld [vmem:[%s6322_s27 + $0xb0] sm:$0xff]  ;;  %v473_v62 = vld [vmem:[%s6322_s27 + $0xc0] sm:$0xff] }
  0x33   : > { %5313 = vmatprep.mubr.msk.f32.mxu0 %vm584_vm1, %v7755_v34  ;;  %1045 = vperm.xlu0 %6065, %v1001_v49   ;;  %v7746_v18 = vmax.f32 %v6443_v9, 0.0  ;;  %v6463_v20 = vadd.f32 %v6327_v3, %v501_v10  ;;  %v503_v21 = vmul.f32 %v6320_v2, %v466_v15  ;;  %v504_v26 = vmul.f32 %v6320_v2, %v467_v16  ;;  %v1011_v47 = vld [vmem:[%s6347_s14 + $0x68] sm:$0xff]  ;;  %v475_v16 = vld [vmem:[%s6322_s27 + $0xd0] sm:$0xff] }
  0x34   : > { %v7745_v23 = vmax.f32 %v6452_v13, 0.0  ;;  %v6472_v24 = vadd.f32 %v6327_v3, %v502_v14  ;;  %v505_v36 = vmul.f32 %v6320_v2, %v468_v27  ;;  %v506_v42 = vmul.f32 %v6320_v2, %v469_v28  ;;  %v474_v15 = vld [vmem:[%s6322_s27 + $0xc8] sm:$0xff]  ;;  %v1018_v27 = vld [vmem:[%s6347_s14 + $0xa0] sm:$0xff] }
  0x35   : > { %v7744_v32 = vmax.f32 %v6463_v20, 0.0  ;;  %v6483_v33 = vadd.f32 %v6327_v3, %v503_v21  ;;  %v6492_v39 = vadd.f32 %v6327_v3, %v504_v26  ;;  %v507_v52 = vmul.f32 %v6320_v2, %v470_v43  ;;  %v1017_v43 = vld [vmem:[%s6347_s14 + $0x98] sm:$0xff] }
  0x36   : > { %5314 = vmatmul.mubr.msk.f32.gmra.mrb[4].mxu0 %vm584_vm1, %v7754_v40  ;;  %1060 = vperm.xlu1 %6066, %v1004_v53   ;;  %7792 = vst [vmem:[#allocation12_spill] sm:$0xff] %v6472_v24  ;;  %v7743_v38 = vmax.f32 %v6472_v24, 0.0  ;;  %v6503_v49 = vadd.f32 %v6327_v3, %v505_v36  ;;  %v1014_v53 = vld [vmem:[%s6347_s14 + $0x80] sm:$0xff]  ;;  %v6512_v57 = vadd.f32 %v6327_v3, %v506_v42 }
  0x37   : > { %5316 = vmatprep.mubr.msk.f32.mxu0 %vm584_vm1, %v7753_v44  ;;  %1055 = vperm.xlu0 %6065, %v1003_v59   ;;  %7793 = vst [vmem:[#allocation13_spill] sm:$0xff] %v6483_v33  ;;  %7794 = vst [vmem:[#allocation14_spill] sm:$0xff] %v6492_v39  ;;  %v7742_v48 = vmax.f32 %v6483_v33, 0.0  ;;  %v7741_v56 = vmax.f32 %v6492_v39, 0.0  ;;  %v508_v58 = vmul.f32 %v6320_v2, %v471_v46  ;;  %v472_v59 = vld [vmem:[%s6322_s27 + $0xb8] sm:$0xff]  ;;  %v477_v42 = vld [vmem:[%s6322_s27 + $0xe0] sm:$0xff] }
  0x38   : > { %7795 = vst [vmem:[#allocation15_spill] sm:$0xff] %v6503_v49  ;;  %7796 = vst [vmem:[#allocation16_spill] sm:$0xff] %v6512_v57  ;;  %v7740_v4 = vmax.f32 %v6503_v49, 0.0  ;;  %v6523_v5 = vadd.f32 %v6327_v3, %v507_v52  ;;  %v509_v6 = vmul.f32 %v6320_v2, %v472_v59  ;;  %v7739_v10 = vmax.f32 %v6512_v57, 0.0 }
  0x39   : > { %v510_v14 = vmul.f32 %v6320_v2, %v473_v62  ;;  %v511_v26 = vmul.f32 %v6320_v2, %v474_v15  ;;  %v512_v36 = vmul.f32 %v6320_v2, %v475_v16  ;;  %v514_v62 = vmul.f32 %v6320_v2, %v477_v42  ;;  %v1025_v16 = vld [vmem:[%s6347_s14 + $0xd8] sm:$0xff] }
  0x3a   : > { %5317 = vmatmul.mubr.msk.f32.gmra.mrb[6].mxu0 %vm584_vm1, %v7752_v50  ;;  %1070 = vperm.xlu1 %6066, %v1006_v63   ;;  %v1013_v63 = vld [vmem:[%s6347_s14 + $0x78] sm:$0xff]  ;;  %7797 = vst [vmem:[#allocation17_spill] sm:$0xff] %v6523_v5  ;;  %v7738_v21 = vmax.f32 %v6523_v5, 0.0 }
  0x3b   : > { %5319 = vmatprep.mubr.msk.f32.mxu0 %vm584_vm1, %v7751_v54  ;;  %1065 = vperm.xlu0 %6065, %v1005_v7   ;;  %v1016_v7 = vld [vmem:[%s6347_s14 + $0x90] sm:$0xff]  ;;  %v6572_v59 = vadd.f32 %v6327_v3, %v512_v36 }
  0x3d   : > { %7802 = vst [vmem:[#allocation22_spill] sm:$0xff] %v6572_v59 }
  0x3e   : > { %5320 = vmatmul.mubr.msk.f32.gmra.mrb[8].mxu0 %vm584_vm1, %v7750_v60  ;;  %1080 = vperm.xlu1 %6066, %v1008_v11   ;;  %v6532_v11 = vadd.f32 %v6327_v3, %v508_v58 }
  0x3f   : > { %5322 = vmatprep.mubr.msk.f32.mxu0 %vm584_vm1, %v7749_v0  ;;  %1075 = vperm.xlu0 %6065, %v1007_v17   ;;  %v1015_v17 = vld [vmem:[%s6347_s14 + $0x88] sm:$0xff] }
  0x40   : > { %7798 = vst [vmem:[#allocation18_spill] sm:$0xff] %v6532_v11  ;;  %v7737_v28 = vmax.f32 %v6532_v11, 0.0 }
  0x42   : > { %5323 = vmatmul.mubr.msk.f32.gmra.mrb[10].mxu0 %vm584_vm1, %v7748_v8  ;;  %1090 = vperm.xlu1 %6066, %v1010_v22   ;;  %v6543_v22 = vadd.f32 %v6327_v3, %v509_v6  ;;  %v1019_v6 = vld [vmem:[%s6347_s14 + $0xa8] sm:$0xff]  ;;  %v6688_v8 = vld [vmem:[%s7721_s6] ss:$0 sm:$0xff] }
  0x43   : > { %5325 = vmatprep.mubr.msk.f32.mxu0 %vm584_vm1, %v7747_v12  ;;  %1085 = vperm.xlu0 %6065, %v1009_v29   ;;  %v6552_v29 = vadd.f32 %v6327_v3, %v510_v14 }
  0x44   : > { %7799 = vst [vmem:[#allocation19_spill] sm:$0xff] %v6543_v22  ;;  %v7736_v46 = vmax.f32 %v6543_v22, 0.0 }
  0x45   : > { %7800 = vst [vmem:[#allocation20_spill] sm:$0xff] %v6552_v29  ;;  %v7735_v58 = vmax.f32 %v6552_v29, 0.0 }
  0x46   : > { %5326 = vmatmul.mubr.msk.f32.gmra.mrb[12].mxu0 %vm584_vm1, %v7746_v18  ;;  %1100 = vperm.xlu1 %6066, %v1012_v37   ;;  %v476_v37 = vld [vmem:[%s6322_s27 + $0xd8] sm:$0xff] }
  0x47   : > { %5328 = vmatprep.mubr.msk.f32.mxu0 %vm584_vm1, %v7745_v23  ;;  %1095 = vperm.xlu0 %6065, %v1011_v47   ;;  %v6563_v47 = vadd.f32 %v6327_v3, %v511_v26  ;;  %v513_v52 = vmul.f32 %v6320_v2, %v476_v37  ;;  %v551_v26 = vadd.f32 %v6327_v3, %v514_v62  ;;  %v999_v37 = vld [vmem:[%s6347_s14 + $0x8] sm:$0xff]  ;;  %v1026_v62 = vld [vmem:[%s6347_s14 + $0xe0] sm:$0xff] }
  0x49   : > { %7801 = vst [vmem:[#allocation21_spill] sm:$0xff] %v6563_v47  ;;  %v550_v14 = vadd.f32 %v6327_v3, %v513_v52  ;;  %v581_v42 = vmax.f32 %v551_v26, 0.0  ;;  %v6620_v26 = vld [vmem:[%s7722_s7 + $0x8] sm:$0xf] }
  0x4a   : > { %5329 = vmatmul.mubr.msk.f32.gmra.mrb[14].mxu0 %vm584_vm1, %v7744_v32  ;;  %1110 = vperm.xlu1 %6066, %v1014_v53   ;;  %v1023_v53 = vld [vmem:[%s6347_s14 + $0xc8] sm:$0xff]  ;;  %v6679_v32 = vld [vmem:[%s7720_s5] ss:$0 sm:$0xff] }
  0x4b   : > { %5331 = vmatprep.mubr.msk.f32.mxu0 %vm584_vm1, %v7743_v38  ;;  %1105 = vperm.xlu0 %6065, %v1013_v63   ;;  %v478_v63 = vld [vmem:[%s6322_s27 + $0xe8] sm:$0xff]  ;;  %v580_v36 = vmax.f32 %v550_v14, 0.0 }
  0x4c   : > { %v515_v15 = vmul.f32 %v6320_v2, %v478_v63  ;;  %v1289_v63 = vld [vmem:[%s7722_s7 + $0x4] sm:$0xf]  ;;  %5770 = vmatprep.subr.msk.mxu1 %vm675_vm0, %v6620_v26 }
  0x4d   : > { %5352 = vmatprep.subr.msk.mxu0 %vm675_vm0, %v1289_v63  ;;  %5771 = vmatpush3.msk.msra.mxu1 %vm675_vm0, %v6620_v26 }
  0x4e   : > { %5332 = vmatmul.mubr.msk.f32.gmra.mrb[16].mxu0 %vm584_vm1, %v7742_v48  ;;  %1120 = vperm.xlu1 %6066, %v1016_v7   ;;  %v7734_v7 = vmax.f32 %v6563_v47, 0.0  ;;  %v552_v2 = vadd.f32 %v6327_v3, %v515_v15  ;;  %v6164_v3 = vmov 0.0  }
  0x4f   : > { %5334 = vmatprep.mubr.msk.f32.mxu0 %vm584_vm1, %v7741_v56  ;;  %1115 = vperm.xlu0 %6065, %v1015_v17   ;;  %v7733_v17 = vmax.f32 %v6572_v59, 0.0  ;;  %1208 = vst.msk [vmem:[#allocation2] sm:$0xff] %vm584_vm1, %v6164_v3  ;;  %1239 = vst.msk [vmem:[#allocation2 + $0xf8] sm:$0xff] %vm584_vm1, %v6164_v3 }
  0x50   : > { %v582_v52 = vmax.f32 %v552_v2, 0.0  ;;  %5353 = vmatpush3.msk.msra.mxu0 %vm675_vm0, %v1289_v63  ;;  %v6638_v2 = vld [vmem:[%s7722_s7 + $0xc] sm:$0xf] }
  0x51   : > { %5466 = vmatprep.subr.msk.mxu1 %vm675_vm0, %v6638_v2 }
  0x52   : > { %5335 = vmatmul.mubr.msk.f32.gmra.mrb[18].mxu0 %vm584_vm1, %v7740_v4  ;;  %1130 = vperm.xlu1 %6066, %v1018_v27   ;;  %v1024_v27 = vld [vmem:[%s6347_s14 + $0xd0] sm:$0xff] }
  0x53   : > { %5337 = vmatprep.mubr.msk.f32.mxu0 %vm584_vm1, %v7739_v10  ;;  %1125 = vperm.xlu0 %6065, %v1017_v43   ;;  %v998_v43 = vld [vmem:[%s6347_s14] sm:$0xff] }
  0x56   : > { %5338 = vmatmul.mubr.msk.f32.gmra.mrb[20].mxu0 %vm584_vm1, %v7738_v21  ;;  %1155 = vperm.xlu1 %6066, %v1023_v53   ;;  %v1027_v53 = vld [vmem:[%s6347_s14 + $0xe8] sm:$0xff]  ;;  %s4557_s14 = sadd.s32 %s4998_s4, %s4994_s23  ;;  %s6073_s4 = scalar_lea.vmem %s6072_s20, 4096 }
  0x57   : > { %5340 = vmatprep.mubr.msk.f32.mxu0 %vm584_vm1, %v7737_v28  ;;  %1135 = vperm.xlu0 %6065, %v1019_v6   ;;  %s4995_s27 = sshll.u32 %s4557_s14, 7  ;;  %p6075_p5 = scmp.lt.s32.totalorder %s6073_s4, %s6067_s26 }
  0x58   : > { %s7653_s30 = scalar_lea.hbm %s7727_s12, %s4995_s27 }
  0x59   : > { %p6076_p6 = por %p6075_p5, %p6074_p4 }
  0x5a   : > { %5341 = vmatmul.mubr.msk.f32.gmra.mrb[22].mxu0 %vm584_vm1, %v7736_v46  ;;  %1165 = vperm.xlu1 %6066, %v1025_v16  }
  0x5b   : > { %5343 = vmatprep.mubr.msk.f32.mxu0 %vm584_vm1, %v7735_v58  ;;  %1160 = vperm.xlu0 %6065, %v1024_v27   ;;  %v6627_v27 = vld [vmem:[%s7722_s7] sm:$0xf]  ;;  %p6077_p7 = pnand %p6076_p6, %p6070_p2 }
  0x5c   : > { %5390 = vmatprep.subr.msk.mxu0 %vm675_vm0, %v6627_v27 }
  0x5e   : > { %5344 = vmatmul.mubr.msk.f32.gmra.mrb[24].mxu0 %vm584_vm1, %v7734_v7  ;;  %1035 = vperm.xlu1 %6066, %v999_v37  }
  0x5f   : > { %5346 = vmatprep.mubr.msk.f32.mxu0 %vm584_vm1, %v7733_v17  ;;  %1030 = vperm.xlu0 %6065, %v998_v43  }
  0x62   : > { %5347 = vmatmul.mubr.msk.f32.gmra.mrb[26].mxu0 %vm584_vm1, %v580_v36  ;;  %1175 = vperm.xlu1 %6066, %v1027_v53  }
  0x63   : > { %5349 = vmatprep.mubr.msk.f32.mxu0 %vm584_vm1, %v581_v42  ;;  %1170 = vperm.xlu0 %6065, %v1026_v62  }
  0x66   : > { %5350 = vmatmul.mubr.msk.f32.gmra.mrb[28].mxu0 %vm584_vm1, %v582_v52 }
  0xa9   : > { %v6611_v6 = vpop.permute.xlu1 %1150 }
  0xaa   : > { %v6613_v14 = vpop.permute.xlu0 %1140 }
  0xad   : > { %v1041_v15 = vpop.permute.xlu1 %1040 }
  0xae   : > { %v6615_v16 = vpop.permute.xlu0 %1145 }
  0xb1   : > { %v6633_v36 = vpop.permute.xlu1 %1050 }
  0xb2   : > { %v1046_v37 = vpop.permute.xlu0 %1045 }
  0xb5   : > { %v6642_v42 = vpop.permute.xlu1 %1060 }
  0xb6   : > { %v1056_v43 = vpop.permute.xlu0 %1055 }
  0xb9   : > { %v6644_v52 = vpop.permute.xlu1 %1070 }
  0xba   : > { %v6646_v53 = vpop.permute.xlu0 %1065 }
  0xbd   : > { %v6648_v62 = vpop.permute.xlu1 %1080 }
  0xbe   : > { %v6650_v3 = vpop.permute.xlu0 %1075 }
  0xc1   : > { %v6652_v63 = vpop.permute.xlu1 %1090 }
  0xc2   : > { %v6654_v17 = vpop.permute.xlu0 %1085 }
  0xc5   : > { %v6656_v7 = vpop.permute.xlu1 %1100 }
  0xc6   : > { %v6658_v58 = vpop.permute.xlu0 %1095 }
  0xc9   : > { %v6660_v46 = vpop.permute.xlu1 %1110 }
  0xca   : > { %v6662_v28 = vpop.permute.xlu0 %1105 }
  0xcd   : > { %v6664_v21 = vpop.permute.xlu1 %1120 }
  0xce   : > { %v6666_v10 = vpop.permute.xlu0 %1115 }
  0xd1   : > { %v6668_v4 = vpop.permute.xlu1 %1130 }
  0xd2   : > { %v6670_v56 = vpop.permute.xlu0 %1125 }
  0xd5   : > { %v6672_v48 = vpop.permute.xlu1 %1155 }
  0xd6   : > { %v6674_v38 = vpop.permute.xlu0 %1135 }
  0xd9   : > { %v6681_v23 = vpop.permute.xlu1 %1165 }
  0xda   : > { %v6683_v18 = vpop.permute.xlu0 %1160 }
  0xdd   : > { %v1036_v34 = vpop.permute.xlu1 %1035 }
  0xde   : > { %v1031_v29 = vpop.permute.xlu0 %1030 }
 0x101   : > { %v5309_v12 = vpop.f32.mrb[0].mxu0 }
 0x102   : > { %v902_v0 = vmul.f32 %v5309_v12, %v6679_v32  ;;  %v745_v60 = vpop.f32.mrb[1].mxu0 }
 0x103   : > { %v901_v54 = vmul.f32 %v6679_v32, %v745_v60 }
 0x104   : > { %v939_v50 = vadd.f32 %v6688_v8, %v902_v0 }
 0x105   : > { %v938_v44 = vadd.f32 %v6688_v8, %v901_v54  ;;  %v5312_v40 = vpop.f32.mrb[2].mxu0 }
 0x106   : > { %v904_v30 = vmul.f32 %v5312_v40, %v6679_v32  ;;  %v755_v59 = vpop.f32.mrb[3].mxu0  ;;  %v969_v47 = vmax.f32 %v939_v50, 0.0 }
 0x107   : > { %v903_v22 = vmul.f32 %v6679_v32, %v755_v59  ;;  %v968_v11 = vmax.f32 %v938_v44, 0.0 }
 0x108   : > { %v941_v5 = vadd.f32 %v6688_v8, %v904_v30  ;;  %v1179_v12 = vmul.f32 %v1036_v34, %v969_v47 }
 0x109   : > { %v940_v57 = vadd.f32 %v6688_v8, %v903_v22  ;;  %v1178_v60 = vmul.f32 %v1031_v29, %v968_v11  ;;  %v5315_v49 = vpop.f32.mrb[4].mxu0 }
 0x10a   : > { %v971_v0 = vmax.f32 %v941_v5, 0.0  ;;  %1210 = vst.msk [vmem:[#allocation2 + $0x10] sm:$0xff] %vm584_vm1, %v1179_v12  ;;  %v906_v54 = vmul.f32 %v5315_v49, %v6679_v32  ;;  %v765_v39 = vpop.f32.mrb[5].mxu0 }
 0x10b   : > { %v970_v40 = vmax.f32 %v940_v57, 0.0  ;;  %1209 = vst.msk [vmem:[#allocation2 + $0x8] sm:$0xff] %vm584_vm1, %v1178_v60  ;;  %v905_v50 = vmul.f32 %v6679_v32, %v765_v39 }
 0x10c   : > { %v1181_v59 = vmul.f32 %v1046_v37, %v971_v0  ;;  %v943_v44 = vadd.f32 %v6688_v8, %v906_v54 }
 0x10d   : > { %v1180_v30 = vmul.f32 %v1041_v15, %v970_v40  ;;  %v942_v34 = vadd.f32 %v6688_v8, %v905_v50  ;;  %v5318_v22 = vpop.f32.mrb[6].mxu0 }
 0x10e   : > { %1212 = vst.msk [vmem:[#allocation2 + $0x20] sm:$0xff] %vm584_vm1, %v1181_v59  ;;  %v973_v5 = vmax.f32 %v943_v44, 0.0  ;;  %v908_v11 = vmul.f32 %v5318_v22, %v6679_v32  ;;  %v775_v29 = vpop.f32.mrb[7].mxu0 }
 0x10f   : > { %1211 = vst.msk [vmem:[#allocation2 + $0x18] sm:$0xff] %vm584_vm1, %v1180_v30  ;;  %v972_v49 = vmax.f32 %v942_v34, 0.0  ;;  %v907_v57 = vmul.f32 %v6679_v32, %v775_v29 }
 0x110   : > { %v1183_v47 = vmul.f32 %v1056_v43, %v973_v5  ;;  %v945_v39 = vadd.f32 %v6688_v8, %v908_v11 }
 0x111   : > { %v1182_v37 = vmul.f32 %v6633_v36, %v972_v49  ;;  %v944_v15 = vadd.f32 %v6688_v8, %v907_v57  ;;  %v5321_v12 = vpop.f32.mrb[8].mxu0  ;;  %v1266_v43 = vld [vmem:[#allocation2 + $0x10] sm:$0xff] }
 0x112   : > { %1214 = vst.msk [vmem:[#allocation2 + $0x30] sm:$0xff] %vm584_vm1, %v1183_v47  ;;  %v975_v60 = vmax.f32 %v945_v39, 0.0  ;;  %v910_v0 = vmul.f32 %v5321_v12, %v6679_v32  ;;  %v785_v54 = vpop.f32.mrb[9].mxu0  ;;  %v1265_v40 = vld [vmem:[#allocation2 + $0x8] sm:$0xff] }
 0x113   : > { %1213 = vst.msk [vmem:[#allocation2 + $0x28] sm:$0xff] %vm584_vm1, %v1182_v37  ;;  %v974_v50 = vmax.f32 %v944_v15, 0.0  ;;  %v909_v59 = vmul.f32 %v6679_v32, %v785_v54  ;;  %5354 = vmatprep.mubr.msk.f32.mxu0 %vm584_vm1, %v1265_v40 }
 0x114   : > { %v1185_v36 = vmul.f32 %v6646_v53, %v975_v60  ;;  %v947_v44 = vadd.f32 %v6688_v8, %v910_v0  ;;  %5355 = vmatmul.mubr.msk.f32.vlgmr.msra.gmra.mrb[30].mxu0 %vm584_vm1, %v1266_v43 }
 0x115   : > { %v1184_v30 = vmul.f32 %v6642_v42, %v974_v50  ;;  %v946_v34 = vadd.f32 %v6688_v8, %v909_v59  ;;  %v5324_v22 = vpop.f32.mrb[10].mxu0  ;;  %5391 = vmatpush3.msk.msra.mxu0 %vm675_vm0, %v6627_v27  ;;  %v6730_v57 = vld [vmem:[#allocation2 + $0x20] sm:$0xff] }
 0x116   : > { %1216 = vst.msk [vmem:[#allocation2 + $0x40] sm:$0xff] %vm584_vm1, %v1185_v36  ;;  %v977_v5 = vmax.f32 %v947_v44, 0.0  ;;  %v912_v11 = vmul.f32 %v5324_v22, %v6679_v32  ;;  %v795_v29 = vpop.f32.mrb[11].mxu0  ;;  %v1267_v49 = vld [vmem:[#allocation2 + $0x18] sm:$0xff]  ;;  %5428 = vmatprep.subr.msk.mxu0 %vm675_vm0, %v6620_v26 }
 0x117   : > { %1215 = vst.msk [vmem:[#allocation2 + $0x38] sm:$0xff] %vm584_vm1, %v1184_v30  ;;  %v976_v53 = vmax.f32 %v946_v34, 0.0  ;;  %v911_v42 = vmul.f32 %v6679_v32, %v795_v29  ;;  %5357 = vmatprep.mubr.msk.f32.mxu0 %vm584_vm1, %v1267_v49 }
 0x118   : > { %v1187_v27 = vmul.f32 %v6650_v3, %v977_v5  ;;  %v949_v47 = vadd.f32 %v6688_v8, %v912_v11  ;;  %5358 = vmatmul.mubr.msk.f32.gmra.mrb[32].mxu0 %vm584_vm1, %v6730_v57 }
 0x119   : > { %v1186_v39 = vmul.f32 %v6644_v52, %v976_v53  ;;  %v948_v37 = vadd.f32 %v6688_v8, %v911_v42  ;;  %v5327_v15 = vpop.f32.mrb[12].mxu0  ;;  %v6746_v52 = vld [vmem:[#allocation2 + $0x30] sm:$0xff] }
 0x11a   : > { %1218 = vst.msk [vmem:[#allocation2 + $0x50] sm:$0xff] %vm584_vm1, %v1187_v27  ;;  %v979_v12 = vmax.f32 %v949_v47, 0.0  ;;  %v914_v60 = vmul.f32 %v5327_v15, %v6679_v32  ;;  %v805_v0 = vpop.f32.mrb[13].mxu0  ;;  %v6740_v54 = vld [vmem:[#allocation2 + $0x28] sm:$0xff] }
 0x11b   : > { %1217 = vst.msk [vmem:[#allocation2 + $0x48] sm:$0xff] %vm584_vm1, %v1186_v39  ;;  %v978_v3 = vmax.f32 %v948_v37, 0.0  ;;  %v913_v40 = vmul.f32 %v6679_v32, %v805_v0  ;;  %5360 = vmatprep.mubr.msk.f32.mxu0 %vm584_vm1, %v6740_v54 }
 0x11c   : > { %v1189_v50 = vmul.f32 %v6654_v17, %v979_v12  ;;  %v951_v59 = vadd.f32 %v6688_v8, %v914_v60  ;;  %5361 = vmatmul.mubr.msk.f32.gmra.mrb[34].mxu0 %vm584_vm1, %v6746_v52 }
 0x11d   : > { %v1188_v43 = vmul.f32 %v6648_v62, %v978_v3  ;;  %v950_v36 = vadd.f32 %v6688_v8, %v913_v40  ;;  %v5330_v44 = vpop.f32.mrb[14].mxu0  ;;  %v6762_v62 = vld [vmem:[#allocation2 + $0x40] sm:$0xff] }
 0x11e   : > { %1220 = vst.msk [vmem:[#allocation2 + $0x60] sm:$0xff] %vm584_vm1, %v1189_v50  ;;  %v981_v30 = vmax.f32 %v951_v59, 0.0  ;;  %v916_v34 = vmul.f32 %v5330_v44, %v6679_v32  ;;  %v815_v22 = vpop.f32.mrb[15].mxu0  ;;  %v6756_v5 = vld [vmem:[#allocation2 + $0x38] sm:$0xff] }
 0x11f   : > { %1219 = vst.msk [vmem:[#allocation2 + $0x58] sm:$0xff] %vm584_vm1, %v1188_v43  ;;  %v980_v17 = vmax.f32 %v950_v36, 0.0  ;;  %v915_v11 = vmul.f32 %v6679_v32, %v815_v22  ;;  %5363 = vmatprep.mubr.msk.f32.mxu0 %vm584_vm1, %v6756_v5 }
 0x120   : > { %v1191_v29 = vmul.f32 %v6658_v58, %v981_v30  ;;  %v953_v49 = vadd.f32 %v6688_v8, %v916_v34  ;;  %5364 = vmatmul.mubr.msk.f32.gmra.mrb[36].mxu0 %vm584_vm1, %v6762_v62 }
 0x121   : > { %v1190_v53 = vmul.f32 %v6652_v63, %v980_v17  ;;  %v952_v42 = vadd.f32 %v6688_v8, %v915_v11  ;;  %v5333_v27 = vpop.f32.mrb[16].mxu0  ;;  %v6778_v63 = vld [vmem:[#allocation2 + $0x50] sm:$0xff] }
 0x122   : > { %1222 = vst.msk [vmem:[#allocation2 + $0x70] sm:$0xff] %vm584_vm1, %v1191_v29  ;;  %v983_v47 = vmax.f32 %v953_v49, 0.0  ;;  %v918_v39 = vmul.f32 %v5333_v27, %v6679_v32  ;;  %v825_v37 = vpop.f32.mrb[17].mxu0  ;;  %v6772_v15 = vld [vmem:[#allocation2 + $0x48] sm:$0xff]  ;;  %7803 = vst [vmem:[#allocation23_spill] sm:$0xff] %v6778_v63 }
 0x123   : > { %1221 = vst.msk [vmem:[#allocation2 + $0x68] sm:$0xff] %vm584_vm1, %v1190_v53  ;;  %v982_v58 = vmax.f32 %v952_v42, 0.0  ;;  %v917_v12 = vmul.f32 %v6679_v32, %v825_v37  ;;  %5366 = vmatprep.mubr.msk.f32.mxu0 %vm584_vm1, %v6772_v15 }
 0x124   : > { %v1193_v60 = vmul.f32 %v6662_v28, %v983_v47  ;;  %v955_v0 = vadd.f32 %v6688_v8, %v918_v39  ;;  %5367 = vmatmul.mubr.msk.f32.gmra.mrb[38].mxu0 %vm584_vm1, %v6778_v63 }
 0x125   : > { %v1192_v3 = vmul.f32 %v6656_v7, %v982_v58  ;;  %v954_v40 = vadd.f32 %v6688_v8, %v917_v12  ;;  %v5336_v50 = vpop.f32.mrb[18].mxu0  ;;  %v6794_v7 = vld [vmem:[#allocation2 + $0x60] sm:$0xff] }
 0x126   : > { %1224 = vst.msk [vmem:[#allocation2 + $0x80] sm:$0xff] %vm584_vm1, %v1193_v60  ;;  %v985_v59 = vmax.f32 %v955_v0, 0.0  ;;  %v920_v43 = vmul.f32 %v5336_v50, %v6679_v32  ;;  %v835_v36 = vpop.f32.mrb[19].mxu0  ;;  %v6788_v44 = vld [vmem:[#allocation2 + $0x58] sm:$0xff]  ;;  %7805 = vst [vmem:[#allocation25_spill] sm:$0xff] %v6794_v7 }
 0x127   : > { %7804 = vst [vmem:[#allocation24_spill] sm:$0xff] %v6788_v44  ;;  %1223 = vst.msk [vmem:[#allocation2 + $0x78] sm:$0xff] %vm584_vm1, %v1192_v3  ;;  %v984_v28 = vmax.f32 %v954_v40, 0.0  ;;  %v919_v30 = vmul.f32 %v6679_v32, %v835_v36  ;;  %5369 = vmatprep.mubr.msk.f32.mxu0 %vm584_vm1, %v6788_v44  ;;  %v7102_v33 = vld [vmem:[#allocation2 + $0x59] sm:$0xff] }
 0x128   : > { %v1195_v34 = vmul.f32 %v6666_v10, %v985_v59  ;;  %v957_v22 = vadd.f32 %v6688_v8, %v920_v43  ;;  %5370 = vmatmul.mubr.msk.f32.gmra.mrb[40].mxu0 %vm584_vm1, %v6794_v7 }
 0x129   : > { %v1194_v17 = vmul.f32 %v6660_v46, %v984_v28  ;;  %v956_v11 = vadd.f32 %v6688_v8, %v919_v30  ;;  %v5339_v29 = vpop.f32.mrb[20].mxu0  ;;  %v6810_v46 = vld [vmem:[#allocation2 + $0x70] sm:$0xff] }
 0x12a   : > { %1226 = vst.msk [vmem:[#allocation2 + $0x90] sm:$0xff] %vm584_vm1, %v1195_v34  ;;  %v987_v49 = vmax.f32 %v957_v22, 0.0  ;;  %v922_v53 = vmul.f32 %v5339_v29, %v6679_v32  ;;  %v845_v42 = vpop.f32.mrb[21].mxu0  ;;  %v6804_v27 = vld [vmem:[#allocation2 + $0x68] sm:$0xff]  ;;  %7807 = vst [vmem:[#allocation27_spill] sm:$0xff] %v6810_v46 }
 0x12b   : > { %7806 = vst [vmem:[#allocation26_spill] sm:$0xff] %v6804_v27  ;;  %1225 = vst.msk [vmem:[#allocation2 + $0x88] sm:$0xff] %vm584_vm1, %v1194_v17  ;;  %v986_v10 = vmax.f32 %v956_v11, 0.0  ;;  %v921_v47 = vmul.f32 %v6679_v32, %v845_v42  ;;  %5372 = vmatprep.mubr.msk.f32.mxu0 %vm584_vm1, %v6804_v27  ;;  %v7108_v24 = vld [vmem:[#allocation2 + $0x61] sm:$0xff] }
 0x12c   : > { %v1197_v39 = vmul.f32 %v6670_v56, %v987_v49  ;;  %v959_v37 = vadd.f32 %v6688_v8, %v922_v53  ;;  %5373 = vmatmul.mubr.msk.f32.gmra.mrb[42].mxu0 %vm584_vm1, %v6810_v46 }
 0x12d   : > { %v1196_v58 = vmul.f32 %v6664_v21, %v986_v10  ;;  %v958_v12 = vadd.f32 %v6688_v8, %v921_v47  ;;  %v5342_v60 = vpop.f32.mrb[22].mxu0  ;;  %v6826_v21 = vld [vmem:[#allocation2 + $0x80] sm:$0xff] }
 0x12e   : > { %1228 = vst.msk [vmem:[#allocation2 + $0xa0] sm:$0xff] %vm584_vm1, %v1197_v39  ;;  %v989_v0 = vmax.f32 %v959_v37, 0.0  ;;  %v924_v3 = vmul.f32 %v5342_v60, %v6679_v32  ;;  %v855_v40 = vpop.f32.mrb[23].mxu0  ;;  %v6820_v50 = vld [vmem:[#allocation2 + $0x78] sm:$0xff]  ;;  %7809 = vst [vmem:[#allocation29_spill] sm:$0xff] %v6826_v21 }
 0x12f   : > { %7808 = vst [vmem:[#allocation28_spill] sm:$0xff] %v6820_v50  ;;  %1227 = vst.msk [vmem:[#allocation2 + $0x98] sm:$0xff] %vm584_vm1, %v1196_v58  ;;  %v988_v56 = vmax.f32 %v958_v12, 0.0  ;;  %v923_v59 = vmul.f32 %v6679_v32, %v855_v40  ;;  %5375 = vmatprep.mubr.msk.f32.mxu0 %vm584_vm1, %v6820_v50 }
 0x130   : > { %v1199_v43 = vmul.f32 %v6674_v38, %v989_v0  ;;  %v961_v36 = vadd.f32 %v6688_v8, %v924_v3  ;;  %5376 = vmatmul.mubr.msk.f32.gmra.mrb[44].mxu0 %vm584_vm1, %v6826_v21 }
 0x131   : > { %v1198_v28 = vmul.f32 %v6668_v4, %v988_v56  ;;  %v960_v30 = vadd.f32 %v6688_v8, %v923_v59  ;;  %v5345_v34 = vpop.f32.mrb[24].mxu0  ;;  %v6842_v4 = vld [vmem:[#allocation2 + $0x90] sm:$0xff] }
 0x132   : > { %1230 = vst.msk [vmem:[#allocation2 + $0xb0] sm:$0xff] %vm584_vm1, %v1199_v43  ;;  %v991_v22 = vmax.f32 %v961_v36, 0.0  ;;  %v926_v17 = vmul.f32 %v5345_v34, %v6679_v32  ;;  %v865_v11 = vpop.f32.mrb[25].mxu0  ;;  %v6836_v29 = vld [vmem:[#allocation2 + $0x88] sm:$0xff]  ;;  %7811 = vst [vmem:[#allocation31_spill] sm:$0xff] %v6842_v4 }
 0x133   : > { %7810 = vst [vmem:[#allocation30_spill] sm:$0xff] %v6836_v29  ;;  %1229 = vst.msk [vmem:[#allocation2 + $0xa8] sm:$0xff] %vm584_vm1, %v1198_v28  ;;  %v990_v38 = vmax.f32 %v960_v30, 0.0  ;;  %v925_v49 = vmul.f32 %v6679_v32, %v865_v11  ;;  %5378 = vmatprep.mubr.msk.f32.mxu0 %vm584_vm1, %v6836_v29 }
 0x134   : > { %v1201_v53 = vmul.f32 %v6615_v16, %v991_v22  ;;  %v963_v42 = vadd.f32 %v6688_v8, %v926_v17  ;;  %5379 = vmatmul.mubr.msk.f32.gmra.mrb[46].mxu0 %vm584_vm1, %v6842_v4 }
 0x135   : > { %v1200_v10 = vmul.f32 %v6613_v14, %v990_v38  ;;  %v962_v47 = vadd.f32 %v6688_v8, %v925_v49  ;;  %v5348_v39 = vpop.f32.mrb[26].mxu0  ;;  %v6858_v14 = vld [vmem:[#allocation2 + $0xa0] sm:$0xff] }
 0x136   : > { %1232 = vst.msk [vmem:[#allocation2 + $0xc0] sm:$0xff] %vm584_vm1, %v1201_v53  ;;  %v993_v37 = vmax.f32 %v963_v42, 0.0  ;;  %v928_v58 = vmul.f32 %v5348_v39, %v6679_v32  ;;  %v875_v12 = vpop.f32.mrb[27].mxu0  ;;  %v6852_v60 = vld [vmem:[#allocation2 + $0x98] sm:$0xff]  ;;  %7813 = vst [vmem:[#allocation33_spill] sm:$0xff] %v6858_v14  ;;  %v1240_v39 = vld [vmem:[#allocation2 + $0x7] sm:$0xff] }
 0x137   : > { %7812 = vst [vmem:[#allocation32_spill] sm:$0xff] %v6852_v60  ;;  %1231 = vst.msk [vmem:[#allocation2 + $0xb8] sm:$0xff] %vm584_vm1, %v1200_v10  ;;  %v992_v16 = vmax.f32 %v962_v47, 0.0  ;;  %v927_v0 = vmul.f32 %v6679_v32, %v875_v12  ;;  %5381 = vmatprep.mubr.msk.f32.mxu0 %vm584_vm1, %v6852_v60  ;;  %v1176_v10 = vpop.permute.xlu1 %1175  ;;  %v1241_v12 = vld [vmem:[#allocation2 + $0xf] sm:$0xff] }
 0x138   : > { %v1203_v3 = vmul.f32 %v6672_v48, %v993_v37  ;;  %v965_v40 = vadd.f32 %v6688_v8, %v928_v58  ;;  %5382 = vmatmul.mubr.msk.f32.gmra.mrb[48].mxu0 %vm584_vm1, %v6858_v14 }
 0x139   : > { %v1202_v56 = vmul.f32 %v6611_v6, %v992_v16  ;;  %v964_v59 = vadd.f32 %v6688_v8, %v927_v0  ;;  %v5351_v43 = vpop.f32.mrb[28].mxu0  ;;  %v6874_v6 = vld [vmem:[#allocation2 + $0xb0] sm:$0xff]  ;;  %v2119_v0 = vld [vmem:[#allocation2 + $0x1f] sm:$0xff] }
 0x13a   : > { %1234 = vst.msk [vmem:[#allocation2 + $0xd0] sm:$0xff] %vm584_vm1, %v1203_v3  ;;  %v995_v36 = vmax.f32 %v965_v40, 0.0  ;;  %v930_v28 = vmul.f32 %v5351_v43, %v6679_v32  ;;  %v885_v30 = vpop.f32.mrb[29].mxu0  ;;  %v6868_v34 = vld [vmem:[#allocation2 + $0xa8] sm:$0xff]  ;;  %7815 = vst [vmem:[#allocation35_spill] sm:$0xff] %v6874_v6  ;;  %v1242_v3 = vld [vmem:[#allocation2 + $0x17] sm:$0xff] }
 0x13b   : > { %7814 = vst [vmem:[#allocation34_spill] sm:$0xff] %v6868_v34  ;;  %1233 = vst.msk [vmem:[#allocation2 + $0xc8] sm:$0xff] %vm584_vm1, %v1202_v56  ;;  %v994_v48 = vmax.f32 %v964_v59, 0.0  ;;  %v929_v22 = vmul.f32 %v6679_v32, %v885_v30  ;;  %5384 = vmatprep.mubr.msk.f32.mxu0 %vm584_vm1, %v6868_v34  ;;  %v2452_v16 = vld [vmem:[%s7722_s7 + $0x10] sm:$0xf]  ;;  %v2120_v40 = vld [vmem:[#allocation2 + $0x27] sm:$0xff] }
 0x13c   : > { %v1205_v17 = vmul.f32 %v6681_v23, %v995_v36  ;;  %v967_v11 = vadd.f32 %v6688_v8, %v930_v28  ;;  %5385 = vmatmul.mubr.msk.f32.gmra.mrb[50].mxu0 %vm584_vm1, %v6874_v6  ;;  %v2121_v56 = vld [vmem:[#allocation2 + $0x2f] sm:$0xff]  ;;  %v6924_v59 = vld [vmem:[#allocation2 + $0x37] sm:$0xff]  ;;  %v6937_v43 = vld [vmem:[#allocation2 + $0x47] sm:$0xff] }
 0x13d   : > { %v1204_v38 = vmul.f32 %v6683_v18, %v994_v48  ;;  %v966_v49 = vadd.f32 %v6688_v8, %v929_v22  ;;  %v6892_v18 = vld [vmem:[#allocation2 + $0xc0] sm:$0xff]  ;;  %v1171_v8 = vpop.permute.xlu0 %1170  ;;  %v6941_v36 = vld [vmem:[#allocation2 + $0x4f] sm:$0xff]  ;;  %v6949_v28 = vld [vmem:[#allocation2 + $0x57] sm:$0xff] }
 0x13e   : > { %1236 = vst.msk [vmem:[#allocation2 + $0xe0] sm:$0xff] %vm584_vm1, %v1205_v17  ;;  %v997_v53 = vmax.f32 %v967_v11, 0.0  ;;  %v6883_v32 = vld [vmem:[#allocation2 + $0xb8] sm:$0xff]  ;;  %v6961_v48 = vld [vmem:[#allocation2 + $0x67] sm:$0xff]  ;;  %v6965_v22 = vld [vmem:[#allocation2 + $0x6f] sm:$0xff] }
 0x13f   : > { %7816 = vst [vmem:[#allocation36_spill] sm:$0xff] %v6883_v32  ;;  %v6885_v42 = vld [vmem:[#allocation2 + $0xb9] sm:$0xff]  ;;  %1235 = vst.msk [vmem:[#allocation2 + $0xd8] sm:$0xff] %vm584_vm1, %v1204_v38  ;;  %v996_v23 = vmax.f32 %v966_v49, 0.0  ;;  %5387 = vmatprep.mubr.msk.f32.mxu0 %vm584_vm1, %v6883_v32  ;;  %v6985_v38 = vld [vmem:[#allocation2 + $0x87] sm:$0xff] }
 0x140   : > { %5463 = vmatprep.mubr.msk.f32.mxu1 %vm584_vm1, %v6885_v42  ;;  %v1207_v47 = vmul.f32 %v1176_v10, %v997_v53  ;;  %5388 = vmatmul.mubr.msk.f32.gmra.mrb[52].mxu0 %vm584_vm1, %v6892_v18  ;;  %v6953_v30 = vld [vmem:[#allocation2 + $0x5f] sm:$0xff]  ;;  %v6973_v17 = vld [vmem:[#allocation2 + $0x77] sm:$0xff]  ;;  %v6989_v49 = vld [vmem:[#allocation2 + $0x8f] sm:$0xff] }
 0x141   : > { %v1206_v37 = vmul.f32 %v1171_v8, %v996_v23  ;;  %5392 = vmatprep.mubr.msk.f32.mxu0 %vm584_vm1, %v1240_v39  ;;  %v6977_v11 = vld [vmem:[#allocation2 + $0x7f] sm:$0xff]  ;;  %v6997_v53 = vld [vmem:[#allocation2 + $0x97] sm:$0xff]  ;;  %v7009_v23 = vld [vmem:[#allocation2 + $0xa7] sm:$0xff] }
 0x142   : > { %1238 = vst.msk [vmem:[#allocation2 + $0xf0] sm:$0xff] %vm584_vm1, %v1207_v47  ;;  %v6898_v58 = vld [vmem:[#allocation2 + $0xc1] sm:$0xff]  ;;  %v7013_v8 = vld [vmem:[#allocation2 + $0xaf] sm:$0xff]  ;;  %v7021_v47 = vld [vmem:[#allocation2 + $0xb7] sm:$0xff] }
 0x143   : > { %1237 = vst.msk [vmem:[#allocation2 + $0xe8] sm:$0xff] %vm584_vm1, %v1206_v37  ;;  %5464 = vmatmul.mubr.msk.f32.vlgmr.msra.gmra.mrb[0].mxu1 %vm584_vm1, %v6898_v58  ;;  %v7001_v10 = vld [vmem:[#allocation2 + $0x9f] sm:$0xff]  ;;  %v7033_v37 = vld [vmem:[#allocation2 + $0xc7] sm:$0xff] }
 0x144   : > { %5467 = vmatpush3.msk.msra.mxu1 %vm675_vm0, %v6638_v2  ;;  %5393 = vmatmul.mubr.msk.f32.vlgmr.msra.gmra.mrb[30].mxu0 %vm584_vm1, %v1241_v12  ;;  %v6918_v2 = vld [vmem:[%s7722_s7 + $0x14] sm:$0xf]  ;;  %v7025_v39 = vld [vmem:[#allocation2 + $0xbf] sm:$0xff] }
 0x145   : > { %5468 = vmatprep.mubr.msk.f32.mxu1 %vm584_vm1, %v2119_v0  ;;  %5395 = vmatprep.mubr.msk.f32.mxu0 %vm584_vm1, %v1242_v3  ;;  %v7037_v12 = vld [vmem:[#allocation2 + $0xcf] sm:$0xff] }
 0x146   : > { %5504 = vmatprep.subr.msk.mxu1 %vm675_vm0, %v2452_v16  ;;  %5429 = vmatpush3.msk.msra.mxu0 %vm675_vm0, %v6620_v26  ;;  %v6930_v26 = vld [vmem:[#allocation2 + $0x3f] sm:$0xff]  ;;  %v1811_v3 = vld [vmem:[#allocation2 + $0x11] sm:$0xff] }
 0x147   : > { %5469 = vmatmul.mubr.msk.f32.vlgmr.msra.gmra.mrb[2].mxu1 %vm584_vm1, %v2120_v40 }
 0x148   : > { %5505 = vmatpush3.msk.msra.mxu1 %vm675_vm0, %v2452_v16  ;;  %5396 = vmatmul.mubr.msk.f32.gmra.mrb[32].mxu0 %vm584_vm1, %v2119_v0  ;;  %v1810_v16 = vld [vmem:[#allocation2 + $0x9] sm:$0xff]  ;;  %v7044_v0 = vld [vmem:[#allocation2 + $0xd7] sm:$0xff] }
 0x149   : > { %5471 = vmatprep.mubr.msk.f32.mxu1 %vm584_vm1, %v2121_v56  ;;  %5398 = vmatprep.mubr.msk.f32.mxu0 %vm584_vm1, %v2120_v40  ;;  %v1812_v40 = vld [vmem:[#allocation2 + $0x19] sm:$0xff] }
 0x14a   : > { %5542 = vmatprep.subr.msk.mxu1 %vm675_vm0, %v6918_v2 }
 0x14b   : > { %5472 = vmatmul.mubr.msk.f32.gmra.mrb[4].mxu1 %vm584_vm1, %v6924_v59 }
 0x14c   : > { %5399 = vmatmul.mubr.msk.f32.gmra.mrb[34].mxu0 %vm584_vm1, %v2121_v56  ;;  %5474 = vmatprep.mubr.msk.f32.mxu1 %vm584_vm1, %v6930_v26  ;;  %v7054_v56 = vld [vmem:[#allocation2 + $0x21] sm:$0xff] }
 0x14d   : > { %5401 = vmatprep.mubr.msk.f32.mxu0 %vm584_vm1, %v6924_v59 }
 0x14f   : > { %5475 = vmatmul.mubr.msk.f32.gmra.mrb[6].mxu1 %vm584_vm1, %v6937_v43 }
 0x150   : > { %5402 = vmatmul.mubr.msk.f32.gmra.mrb[36].mxu0 %vm584_vm1, %v6930_v26  ;;  %5477 = vmatprep.mubr.msk.f32.mxu1 %vm584_vm1, %v6941_v36 }
 0x151   : > { %5404 = vmatprep.mubr.msk.f32.mxu0 %vm584_vm1, %v6937_v43 }
 0x153   : > { %5478 = vmatmul.mubr.msk.f32.gmra.mrb[8].mxu1 %vm584_vm1, %v6949_v28 }
 0x154   : > { %5405 = vmatmul.mubr.msk.f32.gmra.mrb[38].mxu0 %vm584_vm1, %v6941_v36  ;;  %5480 = vmatprep.mubr.msk.f32.mxu1 %vm584_vm1, %v6953_v30 }
 0x155   : > { %5407 = vmatprep.mubr.msk.f32.mxu0 %vm584_vm1, %v6949_v28 }
 0x157   : > { %5481 = vmatmul.mubr.msk.f32.gmra.mrb[10].mxu1 %vm584_vm1, %v6961_v48 }
 0x158   : > { %5408 = vmatmul.mubr.msk.f32.gmra.mrb[40].mxu0 %vm584_vm1, %v6953_v30  ;;  %5483 = vmatprep.mubr.msk.f32.mxu1 %vm584_vm1, %v6965_v22 }
 0x159   : > { %5410 = vmatprep.mubr.msk.f32.mxu0 %vm584_vm1, %v6961_v48 }
 0x15b   : > { %5484 = vmatmul.mubr.msk.f32.gmra.mrb[12].mxu1 %vm584_vm1, %v6973_v17 }
 0x15c   : > { %5411 = vmatmul.mubr.msk.f32.gmra.mrb[42].mxu0 %vm584_vm1, %v6965_v22  ;;  %5486 = vmatprep.mubr.msk.f32.mxu1 %vm584_vm1, %v6977_v11 }
 0x15d   : > { %5413 = vmatprep.mubr.msk.f32.mxu0 %vm584_vm1, %v6973_v17 }
 0x15f   : > { %5487 = vmatmul.mubr.msk.f32.gmra.mrb[14].mxu1 %vm584_vm1, %v6985_v38 }
 0x160   : > { %5414 = vmatmul.mubr.msk.f32.gmra.mrb[44].mxu0 %vm584_vm1, %v6977_v11  ;;  %5489 = vmatprep.mubr.msk.f32.mxu1 %vm584_vm1, %v6989_v49 }
 0x161   : > { %5416 = vmatprep.mubr.msk.f32.mxu0 %vm584_vm1, %v6985_v38 }
 0x163   : > { %5490 = vmatmul.mubr.msk.f32.gmra.mrb[16].mxu1 %vm584_vm1, %v6997_v53 }
 0x164   : > { %5417 = vmatmul.mubr.msk.f32.gmra.mrb[46].mxu0 %vm584_vm1, %v6989_v49  ;;  %5492 = vmatprep.mubr.msk.f32.mxu1 %vm584_vm1, %v7001_v10 }
 0x165   : > { %5419 = vmatprep.mubr.msk.f32.mxu0 %vm584_vm1, %v6997_v53 }
 0x167   : > { %5493 = vmatmul.mubr.msk.f32.gmra.mrb[18].mxu1 %vm584_vm1, %v7009_v23 }
 0x168   : > { %5420 = vmatmul.mubr.msk.f32.gmra.mrb[48].mxu0 %vm584_vm1, %v7001_v10  ;;  %5495 = vmatprep.mubr.msk.f32.mxu1 %vm584_vm1, %v7013_v8 }
 0x169   : > { %5422 = vmatprep.mubr.msk.f32.mxu0 %vm584_vm1, %v7009_v23 }
 0x16b   : > { %5496 = vmatmul.mubr.msk.f32.gmra.mrb[20].mxu1 %vm584_vm1, %v7021_v47 }
 0x16c   : > { %5423 = vmatmul.mubr.msk.f32.gmra.mrb[50].mxu0 %vm584_vm1, %v7013_v8  ;;  %5498 = vmatprep.mubr.msk.f32.mxu1 %vm584_vm1, %v7025_v39 }
 0x16d   : > { %5425 = vmatprep.mubr.msk.f32.mxu0 %vm584_vm1, %v7021_v47 }
 0x16f   : > { %5499 = vmatmul.mubr.msk.f32.gmra.mrb[22].mxu1 %vm584_vm1, %v7033_v37 }
 0x170   : > { %5426 = vmatmul.mubr.msk.f32.gmra.mrb[52].mxu0 %vm584_vm1, %v7025_v39  ;;  %5501 = vmatprep.mubr.msk.f32.mxu1 %vm584_vm1, %v7037_v12 }
 0x171   : > { %5430 = vmatprep.mubr.msk.f32.mxu0 %vm584_vm1, %v1810_v16  ;;  %v7059_v16 = vld [vmem:[%s7722_s7 + $0x18] sm:$0xf] }
 0x173   : > { %5502 = vmatmul.mubr.msk.f32.gmra.mrb[0].mxu1 %vm584_vm1, %v7044_v0 }
 0x174   : > { %5431 = vmatmul.mubr.msk.f32.vlgmr.msra.gmra.mrb[30].mxu0 %vm584_vm1, %v1811_v3  ;;  %5506 = vmatprep.mubr.msk.f32.mxu1 %vm584_vm1, %v6730_v57  ;;  %v7065_v57 = vld [vmem:[#allocation2 + $0x29] sm:$0xff] }
 0x175   : > { %5433 = vmatprep.mubr.msk.f32.mxu0 %vm584_vm1, %v1812_v40  ;;  %v7090_v3 = vld [vmem:[#allocation2 + $0x49] sm:$0xff]  ;;  %v7096_v40 = vld [vmem:[#allocation2 + $0x51] sm:$0xff] }
 0x177   : > { %5507 = vmatmul.mubr.msk.f32.vlgmr.msra.gmra.mrb[2].mxu1 %vm584_vm1, %v6740_v54  ;;  %v1815_v54 = vld [vmem:[#allocation2 + $0x31] sm:$0xff] }
 0x178   : > { %5543 = vmatpush3.msk.msra.mxu1 %vm675_vm0, %v6918_v2  ;;  %5434 = vmatmul.mubr.msk.f32.gmra.mrb[32].mxu0 %vm584_vm1, %v7054_v56  ;;  %v7078_v2 = vld [vmem:[#allocation2 + $0x39] sm:$0xff] }
 0x179   : > { %5509 = vmatprep.mubr.msk.f32.mxu1 %vm584_vm1, %v6746_v52  ;;  %5436 = vmatprep.mubr.msk.f32.mxu0 %vm584_vm1, %v7065_v57  ;;  %v7084_v52 = vld [vmem:[#allocation2 + $0x41] sm:$0xff] }
 0x17a   : > { %5580 = vmatprep.subr.msk.mxu1 %vm675_vm0, %v7059_v16 }
 0x17b   : > { %5510 = vmatmul.mubr.msk.f32.gmra.mrb[4].mxu1 %vm584_vm1, %v6756_v5 }
 0x17c   : > { %5437 = vmatmul.mubr.msk.f32.gmra.mrb[34].mxu0 %vm584_vm1, %v1815_v54  ;;  %5512 = vmatprep.mubr.msk.f32.mxu1 %vm584_vm1, %v6762_v62 }
 0x17d   : > { %5439 = vmatprep.mubr.msk.f32.mxu0 %vm584_vm1, %v7078_v2 }
 0x17f   : > { %5513 = vmatmul.mubr.msk.f32.gmra.mrb[6].mxu1 %vm584_vm1, %v6772_v15 }
 0x180   : > { %5440 = vmatmul.mubr.msk.f32.gmra.mrb[36].mxu0 %vm584_vm1, %v7084_v52  ;;  %5515 = vmatprep.mubr.msk.f32.mxu1 %vm584_vm1, %v6778_v63  ;;  %v7181_v63 = vld [vmem:[#allocation2 + $0xd0] sm:$0xff] }
 0x181   : > { %5442 = vmatprep.mubr.msk.f32.mxu0 %vm584_vm1, %v7090_v3 }
 0x183   : > { %5516 = vmatmul.mubr.msk.f32.gmra.mrb[8].mxu1 %vm584_vm1, %v6788_v44  ;;  %v7114_v44 = vld [vmem:[#allocation2 + $0x69] sm:$0xff] }
 0x184   : > { %5443 = vmatmul.mubr.msk.f32.gmra.mrb[38].mxu0 %vm584_vm1, %v7096_v40  ;;  %5518 = vmatprep.mubr.msk.f32.mxu1 %vm584_vm1, %v6794_v7  ;;  %v7120_v7 = vld [vmem:[#allocation2 + $0x71] sm:$0xff] }
 0x185   : > { %5445 = vmatprep.mubr.msk.f32.mxu0 %vm584_vm1, %v7102_v33 }
 0x187   : > { %5519 = vmatmul.mubr.msk.f32.gmra.mrb[10].mxu1 %vm584_vm1, %v6804_v27  ;;  %v7126_v27 = vld [vmem:[#allocation2 + $0x79] sm:$0xff] }
 0x188   : > { %5446 = vmatmul.mubr.msk.f32.gmra.mrb[40].mxu0 %vm584_vm1, %v7108_v24  ;;  %5521 = vmatprep.mubr.msk.f32.mxu1 %vm584_vm1, %v6810_v46  ;;  %v7132_v46 = vld [vmem:[#allocation2 + $0x81] sm:$0xff] }
 0x189   : > { %5448 = vmatprep.mubr.msk.f32.mxu0 %vm584_vm1, %v7114_v44 }
 0x18b   : > { %5522 = vmatmul.mubr.msk.f32.gmra.mrb[12].mxu1 %vm584_vm1, %v6820_v50  ;;  %v7138_v50 = vld [vmem:[#allocation2 + $0x89] sm:$0xff] }
 0x18c   : > { %5449 = vmatmul.mubr.msk.f32.gmra.mrb[42].mxu0 %vm584_vm1, %v7120_v7  ;;  %5524 = vmatprep.mubr.msk.f32.mxu1 %vm584_vm1, %v6826_v21  ;;  %v7144_v21 = vld [vmem:[#allocation2 + $0x91] sm:$0xff] }
 0x18d   : > { %5451 = vmatprep.mubr.msk.f32.mxu0 %vm584_vm1, %v7126_v27 }
 0x18f   : > { %5525 = vmatmul.mubr.msk.f32.gmra.mrb[14].mxu1 %vm584_vm1, %v6836_v29  ;;  %v7150_v29 = vld [vmem:[#allocation2 + $0x99] sm:$0xff] }
 0x190   : > { %5452 = vmatmul.mubr.msk.f32.gmra.mrb[44].mxu0 %vm584_vm1, %v7132_v46  ;;  %5527 = vmatprep.mubr.msk.f32.mxu1 %vm584_vm1, %v6842_v4  ;;  %v7156_v4 = vld [vmem:[#allocation2 + $0xa1] sm:$0xff] }
 0x191   : > { %5454 = vmatprep.mubr.msk.f32.mxu0 %vm584_vm1, %v7138_v50 }
 0x193   : > { %5528 = vmatmul.mubr.msk.f32.gmra.mrb[16].mxu1 %vm584_vm1, %v6852_v60  ;;  %v7162_v60 = vld [vmem:[#allocation2 + $0xa9] sm:$0xff] }
 0x194   : > { %5455 = vmatmul.mubr.msk.f32.gmra.mrb[46].mxu0 %vm584_vm1, %v7144_v21  ;;  %5530 = vmatprep.mubr.msk.f32.mxu1 %vm584_vm1, %v6858_v14  ;;  %v7168_v14 = vld [vmem:[#allocation2 + $0xb1] sm:$0xff] }
 0x195   : > { %5457 = vmatprep.mubr.msk.f32.mxu0 %vm584_vm1, %v7150_v29 }
 0x197   : > { %5531 = vmatmul.mubr.msk.f32.gmra.mrb[18].mxu1 %vm584_vm1, %v6868_v34  ;;  %v7817_v34 = vmax.f32 %v6350_v19, 0.0  ;;  %v3379_v19 = vld [vmem:[%s7722_s7 + $0x1c] sm:$0xf] }
 0x198   : > { %5458 = vmatmul.mubr.msk.f32.gmra.mrb[48].mxu0 %vm584_vm1, %v7156_v4  ;;  %5533 = vmatprep.mubr.msk.f32.mxu1 %vm584_vm1, %v6874_v6  ;;  %v7177_v6 = vld [vmem:[#allocation2 + $0xc8] sm:$0xff] }
 0x199   : > { %5460 = vmatprep.mubr.msk.f32.mxu0 %vm584_vm1, %v7162_v60 }
 0x19b   : > { %5534 = vmatmul.mubr.msk.f32.gmra.mrb[20].mxu1 %vm584_vm1, %v6883_v32  ;;  %v7185_v32 = vld [vmem:[#allocation2 + $0xd8] sm:$0xff] }
 0x19c   : > { %5461 = vmatmul.mubr.msk.f32.gmra.mrb[50].mxu0 %vm584_vm1, %v7168_v14  ;;  %5536 = vmatprep.mubr.msk.f32.mxu1 %vm584_vm1, %v6892_v18 }
 0x19d   : > { %5696 = vmatprep.mubr.msk.f32.mxu0 %vm584_vm1, %v7817_v34  ;;  %v7236_v34 = vld [vmem:[#allocation2 + $0xc9] sm:$0xff] }
 0x19f   : > { %5537 = vmatmul.mubr.msk.f32.gmra.mrb[22].mxu1 %vm584_vm1, %v7177_v6 }
 0x1a0   : > { %5539 = vmatprep.mubr.msk.f32.mxu1 %vm584_vm1, %v7181_v63 }
 0x1a3   : > { %5540 = vmatmul.mubr.msk.f32.gmra.mrb[0].mxu1 %vm584_vm1, %v7185_v32 }
 0x1a4   : > { %5544 = vmatprep.mubr.msk.f32.mxu1 %vm584_vm1, %v7054_v56  ;;  %v7240_v56 = vld [vmem:[#allocation2 + $0xd1] sm:$0xff] }
 0x1a7   : > { %5545 = vmatmul.mubr.msk.f32.vlgmr.msra.gmra.mrb[2].mxu1 %vm584_vm1, %v7065_v57  ;;  %v3688_v57 = vld [vmem:[%s7722_s7 + $0x20] sm:$0xf] }
 0x1a8   : > { %5581 = vmatpush3.msk.msra.mxu1 %vm675_vm0, %v7059_v16  ;;  %5547 = vmatprep.mubr.msk.f32.mxu1 %vm584_vm1, %v1815_v54  ;;  %v7244_v16 = vld [vmem:[#allocation2 + $0xd9] sm:$0xff]  ;;  %v7849_v54 = vld [vmem:[#allocation30_spill] sm:$0xff] }
 0x1a9   : > { %5618 = vmatprep.subr.msk.mxu1 %vm675_vm0, %v3379_v19 }
 0x1ab   : > { %5548 = vmatmul.mubr.msk.f32.gmra.mrb[4].mxu1 %vm584_vm1, %v7078_v2 }
 0x1ac   : > { %5550 = vmatprep.mubr.msk.f32.mxu1 %vm584_vm1, %v7084_v52 }
 0x1af   : > { %5551 = vmatmul.mubr.msk.f32.gmra.mrb[6].mxu1 %vm584_vm1, %v7090_v3 }
 0x1b0   : > { %5553 = vmatprep.mubr.msk.f32.mxu1 %vm584_vm1, %v7096_v40 }
 0x1b3   : > { %5554 = vmatmul.mubr.msk.f32.gmra.mrb[8].mxu1 %vm584_vm1, %v7102_v33 }
 0x1b4   : > { %5556 = vmatprep.mubr.msk.f32.mxu1 %vm584_vm1, %v7108_v24 }
 0x1b7   : > { %5557 = vmatmul.mubr.msk.f32.gmra.mrb[10].mxu1 %vm584_vm1, %v7114_v44 }
 0x1b8   : > { %5559 = vmatprep.mubr.msk.f32.mxu1 %vm584_vm1, %v7120_v7 }
 0x1bb   : > { %5560 = vmatmul.mubr.msk.f32.gmra.mrb[12].mxu1 %vm584_vm1, %v7126_v27 }
 0x1bc   : > { %5562 = vmatprep.mubr.msk.f32.mxu1 %vm584_vm1, %v7132_v46 }
 0x1bf   : > { %5563 = vmatmul.mubr.msk.f32.gmra.mrb[14].mxu1 %vm584_vm1, %v7138_v50 }
 0x1c0   : > { %5565 = vmatprep.mubr.msk.f32.mxu1 %vm584_vm1, %v7144_v21 }
 0x1c3   : > { %5566 = vmatmul.mubr.msk.f32.gmra.mrb[16].mxu1 %vm584_vm1, %v7150_v29 }
 0x1c4   : > { %5568 = vmatprep.mubr.msk.f32.mxu1 %vm584_vm1, %v7156_v4 }
 0x1c7   : > { %5569 = vmatmul.mubr.msk.f32.gmra.mrb[18].mxu1 %vm584_vm1, %v7162_v60 }
 0x1c8   : > { %5571 = vmatprep.mubr.msk.f32.mxu1 %vm584_vm1, %v7168_v14 }
 0x1cb   : > { %5572 = vmatmul.mubr.msk.f32.gmra.mrb[20].mxu1 %vm584_vm1, %v6885_v42 }
 0x1cc   : > { %5574 = vmatprep.mubr.msk.f32.mxu1 %vm584_vm1, %v6898_v58 }
 0x1cf   : > { %5575 = vmatmul.mubr.msk.f32.gmra.mrb[22].mxu1 %vm584_vm1, %v7236_v34 }
 0x1d0   : > { %5577 = vmatprep.mubr.msk.f32.mxu1 %vm584_vm1, %v7240_v56 }
 0x1d3   : > { %5578 = vmatmul.mubr.msk.f32.gmra.mrb[0].mxu1 %vm584_vm1, %v7244_v16 }
 0x1d4   : > { %5582 = vmatprep.mubr.msk.f32.mxu1 %vm584_vm1, %v6924_v59  ;;  %v4060_v59 = vld [vmem:[%s7726_s11] sm:$0xf] }
 0x1d5   : > { %5694 = vmatprep.subr.msk.mxu0 %vm675_vm0, %v4060_v59 }
 0x1d6   : > { %5695 = vmatpush3.msk.msra.mxu0 %vm675_vm0, %v4060_v59  ;;  %v7852_v59 = vld [vmem:[#allocation19_spill] sm:$0xff] }
 0x1d7   : > { %5583 = vmatmul.mubr.msk.f32.vlgmr.msra.gmra.mrb[2].mxu1 %vm584_vm1, %v6930_v26  ;;  %v4059_v26 = vld [vmem:[%s7725_s10] sm:$0xf] }
 0x1d8   : > { %5619 = vmatpush3.msk.msra.mxu1 %vm675_vm0, %v3379_v19  ;;  %5585 = vmatprep.mubr.msk.f32.mxu1 %vm584_vm1, %v6937_v43  ;;  %v7818_v43 = vmax.f32 %v6355_v25, 0.0  ;;  %v7821_v25 = vmax.f32 %v6383_v41, 0.0  ;;  %v3068_v41 = vld [vmem:[#allocation2 + $0xe7] sm:$0xff]  ;;  %v7850_v19 = vld [vmem:[#allocation18_spill] sm:$0xff] }
 0x1d9   : > { %5656 = vmatprep.subr.msk.mxu1 %vm675_vm0, %v3688_v57  ;;  %5732 = vmatprep.subr.msk.mxu0 %vm675_vm0, %v4059_v26 }
 0x1da   : > { %5697 = vmatmul.mubr.msk.f32.vlgmr.msra.gmra.mrb[54].mxu0 %vm584_vm1, %v7818_v43  ;;  %v7854_v43 = vld [vmem:[#allocation31_spill] sm:$0xff] }
 0x1db   : > { %5586 = vmatmul.mubr.msk.f32.gmra.mrb[4].mxu1 %vm584_vm1, %v6941_v36  ;;  %5733 = vmatpush3.msk.msra.mxu0 %vm675_vm0, %v4059_v26  ;;  %v7819_v36 = vmax.f32 %v6365_v31, 0.0  ;;  %v7822_v31 = vmax.f32 %v6392_v45, 0.0  ;;  %v3069_v45 = vld [vmem:[#allocation2 + $0xef] sm:$0xff]  ;;  %v7853_v26 = vmax.f32 %v7852_v59, 0.0 }
 0x1dc   : > { %5588 = vmatprep.mubr.msk.f32.mxu1 %vm584_vm1, %v6949_v28  ;;  %v7820_v28 = vmax.f32 %v6372_v35, 0.0  ;;  %v3067_v35 = vld [vmem:[#allocation2 + $0xdf] sm:$0xff] }
 0x1dd   : > { %5699 = vmatprep.mubr.msk.f32.mxu0 %vm584_vm1, %v7819_v36  ;;  %v7855_v36 = vld [vmem:[#allocation32_spill] sm:$0xff] }
 0x1de   : > { %5700 = vmatmul.mubr.msk.f32.gmra.mrb[56].mxu0 %vm584_vm1, %v7820_v28  ;;  %v7856_v28 = vld [vmem:[#allocation20_spill] sm:$0xff] }
 0x1df   : > { %5589 = vmatmul.mubr.msk.f32.gmra.mrb[6].mxu1 %vm584_vm1, %v6953_v30  ;;  %5702 = vmatprep.mubr.msk.f32.mxu0 %vm584_vm1, %v7821_v25  ;;  %v7823_v30 = vmax.f32 %v6403_v51, 0.0  ;;  %v7826_v51 = vmax.f32 %v6432_v1, 0.0  ;;  %v7830_v1 = vld [vmem:[#allocation23_spill] sm:$0xff]  ;;  %v7857_v25 = vmax.f32 %v7856_v28, 0.0 }
 0x1e0   : > { %5591 = vmatprep.mubr.msk.f32.mxu1 %vm584_vm1, %v6961_v48  ;;  %v7824_v48 = vmax.f32 %v6412_v55, 0.0  ;;  %v7828_v55 = vmax.f32 %v6452_v13, 0.0  ;;  %v7836_v13 = vld [vmem:[#allocation25_spill] sm:$0xff] }
 0x1e2   : > { %5703 = vmatmul.mubr.msk.f32.gmra.mrb[58].mxu0 %vm584_vm1, %v7822_v31  ;;  %v7858_v31 = vld [vmem:[#allocation21_spill] sm:$0xff] }
 0x1e3   : > { %5592 = vmatmul.mubr.msk.f32.gmra.mrb[8].mxu1 %vm584_vm1, %v6965_v22  ;;  %5705 = vmatprep.mubr.msk.f32.mxu0 %vm584_vm1, %v7823_v30  ;;  %v7825_v22 = vmax.f32 %v6423_v61, 0.0  ;;  %v7829_v61 = vmax.f32 %v6463_v20, 0.0  ;;  %v7837_v20 = vld [vmem:[#allocation26_spill] sm:$0xff]  ;;  %v7859_v30 = vmax.f32 %v7858_v31, 0.0 }
 0x1e4   : > { %5594 = vmatprep.mubr.msk.f32.mxu1 %vm584_vm1, %v6973_v17  ;;  %v7827_v17 = vmax.f32 %v6443_v9, 0.0  ;;  %v7831_v9 = vld [vmem:[#allocation24_spill] sm:$0xff] }
 0x1e6   : > { %5706 = vmatmul.mubr.msk.f32.gmra.mrb[60].mxu0 %vm584_vm1, %v7824_v48  ;;  %v7862_v48 = vld [vmem:[#allocation22_spill] sm:$0xff] }
 0x1e7   : > { %5595 = vmatmul.mubr.msk.f32.gmra.mrb[10].mxu1 %vm584_vm1, %v6977_v11  ;;  %5708 = vmatprep.mubr.msk.f32.mxu0 %vm584_vm1, %v7825_v22  ;;  %v7834_v11 = vld [vmem:[#allocation13_spill] sm:$0xff]  ;;  %v7863_v22 = vmax.f32 %v7862_v48, 0.0 }
 0x1e8   : > { %5597 = vmatprep.mubr.msk.f32.mxu1 %vm584_vm1, %v6985_v38  ;;  %v7838_v38 = vld [vmem:[#allocation14_spill] sm:$0xff] }
 0x1ea   : > { %5709 = vmatmul.mubr.msk.f32.gmra.mrb[62].mxu0 %vm584_vm1, %v7826_v51  ;;  %v7865_v51 = vld [vmem:[#allocation36_spill] sm:$0xff] }
 0x1eb   : > { %5598 = vmatmul.mubr.msk.f32.gmra.mrb[12].mxu1 %vm584_vm1, %v6989_v49  ;;  %5711 = vmatprep.mubr.msk.f32.mxu0 %vm584_vm1, %v7827_v17  ;;  %v7839_v49 = vmax.f32 %v7838_v38, 0.0  ;;  %v3376_v17 = vld [vmem:[#allocation2 + $0xe0] sm:$0xff] }
 0x1ec   : > { %5600 = vmatprep.mubr.msk.f32.mxu1 %vm584_vm1, %v6997_v53  ;;  %v7840_v53 = vld [vmem:[#allocation15_spill] sm:$0xff] }
 0x1ee   : > { %5712 = vmatmul.mubr.msk.f32.gmra.mrb[64].mxu0 %vm584_vm1, %v7828_v55  ;;  %v3377_v55 = vld [vmem:[#allocation2 + $0xe8] sm:$0xff] }
 0x1ef   : > { %5601 = vmatmul.mubr.msk.f32.gmra.mrb[14].mxu1 %vm584_vm1, %v7001_v10  ;;  %5714 = vmatprep.mubr.msk.f32.mxu0 %vm584_vm1, %v7829_v61  ;;  %v7841_v10 = vmax.f32 %v7840_v53, 0.0  ;;  %v3378_v61 = vld [vmem:[#allocation2 + $0xf0] sm:$0xff] }
 0x1f0   : > { %5603 = vmatprep.mubr.msk.f32.mxu1 %vm584_vm1, %v7009_v23  ;;  %v7842_v23 = vld [vmem:[#allocation27_spill] sm:$0xff] }
 0x1f3   : > { %5604 = vmatmul.mubr.msk.f32.gmra.mrb[16].mxu1 %vm584_vm1, %v7013_v8  ;;  %v7843_v8 = vld [vmem:[#allocation28_spill] sm:$0xff] }
 0x1f4   : > { %5606 = vmatprep.mubr.msk.f32.mxu1 %vm584_vm1, %v7021_v47  ;;  %v7844_v47 = vld [vmem:[#allocation16_spill] sm:$0xff] }
 0x1f7   : > { %5607 = vmatmul.mubr.msk.f32.gmra.mrb[18].mxu1 %vm584_vm1, %v7025_v39  ;;  %v7845_v39 = vmax.f32 %v7844_v47, 0.0 }
 0x1f8   : > { %5609 = vmatprep.mubr.msk.f32.mxu1 %vm584_vm1, %v7033_v37  ;;  %v7846_v37 = vld [vmem:[#allocation17_spill] sm:$0xff] }
 0x1fb   : > { %5610 = vmatmul.mubr.msk.f32.gmra.mrb[20].mxu1 %vm584_vm1, %v7037_v12  ;;  %v7847_v12 = vmax.f32 %v7846_v37, 0.0 }
 0x1fc   : > { %5612 = vmatprep.mubr.msk.f32.mxu1 %vm584_vm1, %v7044_v0  ;;  %v7848_v0 = vld [vmem:[#allocation29_spill] sm:$0xff] }
 0x1ff   : > { %5613 = vmatmul.mubr.msk.f32.gmra.mrb[22].mxu1 %vm584_vm1, %v3067_v35  ;;  %v7860_v35 = vld [vmem:[#allocation33_spill] sm:$0xff] }
 0x200   : > { %5615 = vmatprep.mubr.msk.f32.mxu1 %vm584_vm1, %v3068_v41  ;;  %v7861_v41 = vld [vmem:[#allocation34_spill] sm:$0xff] }
 0x203   : > { %5616 = vmatmul.mubr.msk.f32.gmra.mrb[0].mxu1 %vm584_vm1, %v3069_v45  ;;  %v7864_v45 = vld [vmem:[#allocation35_spill] sm:$0xff] }
 0x204   : > { %5620 = vmatprep.mubr.msk.f32.mxu1 %vm584_vm1, %v6756_v5  ;;  %v7832_v5 = vld [vmem:[#allocation12_spill] sm:$0xff] }
 0x207   : > { %5621 = vmatmul.mubr.msk.f32.vlgmr.msra.gmra.mrb[2].mxu1 %vm584_vm1, %v6762_v62  ;;  %v7833_v62 = vmax.f32 %v7832_v5, 0.0 }
 0x208   : > { %5657 = vmatpush3.msk.msra.mxu1 %vm675_vm0, %v3688_v57  ;;  %5623 = vmatprep.mubr.msk.f32.mxu1 %vm584_vm1, %v6772_v15  ;;  %v7835_v15 = vmax.f32 %v7834_v11, 0.0  ;;  %v7851_v57 = vmax.f32 %v7850_v19, 0.0 }
 0x209   : > { %5715 = vmatmul.mubr.msk.f32.gmra.mrb[66].mxu0 %vm584_vm1, %v7833_v62  ;;  %v7503_v62 = vld [vmem:[%s7723_s8] ss:$0 sm:$0xff] }
 0x20a   : > { %5717 = vmatprep.mubr.msk.f32.mxu0 %vm584_vm1, %v7835_v15 }
 0x20b   : > { %5624 = vmatmul.mubr.msk.f32.gmra.mrb[4].mxu1 %vm584_vm1, %v7830_v1 }
 0x20c   : > { %5626 = vmatprep.mubr.msk.f32.mxu1 %vm584_vm1, %v7831_v9 }
 0x20d   : > { %5718 = vmatmul.mubr.msk.f32.gmra.mrb[68].mxu0 %vm584_vm1, %v7839_v49 }
 0x20e   : > { %5720 = vmatprep.mubr.msk.f32.mxu0 %vm584_vm1, %v7841_v10 }
 0x20f   : > { %5627 = vmatmul.mubr.msk.f32.gmra.mrb[6].mxu1 %vm584_vm1, %v7836_v13  ;;  %v7508_v13 = vld [vmem:[%s7724_s9] ss:$0 sm:$0xff] }
 0x210   : > { %5629 = vmatprep.mubr.msk.f32.mxu1 %vm584_vm1, %v7837_v20 }
 0x211   : > { %5721 = vmatmul.mubr.msk.f32.gmra.mrb[70].mxu0 %vm584_vm1, %v7845_v39 }
 0x212   : > { %5723 = vmatprep.mubr.msk.f32.mxu0 %vm584_vm1, %v7847_v12 }
 0x213   : > { %5630 = vmatmul.mubr.msk.f32.gmra.mrb[8].mxu1 %vm584_vm1, %v7842_v23 }
 0x214   : > { %5632 = vmatprep.mubr.msk.f32.mxu1 %vm584_vm1, %v7843_v8 }
 0x215   : > { %5724 = vmatmul.mubr.msk.f32.gmra.mrb[72].mxu0 %vm584_vm1, %v7851_v57 }
 0x216   : > { %5726 = vmatprep.mubr.msk.f32.mxu0 %vm584_vm1, %v7853_v26 }
 0x217   : > { %5633 = vmatmul.mubr.msk.f32.gmra.mrb[10].mxu1 %vm584_vm1, %v7848_v0 }
 0x218   : > { %5635 = vmatprep.mubr.msk.f32.mxu1 %vm584_vm1, %v7849_v54 }
 0x219   : > { %5727 = vmatmul.mubr.msk.f32.gmra.mrb[74].mxu0 %vm584_vm1, %v7857_v25 }
 0x21a   : > { %5729 = vmatprep.mubr.msk.f32.mxu0 %vm584_vm1, %v7859_v30 }
 0x21b   : > { %5636 = vmatmul.mubr.msk.f32.gmra.mrb[12].mxu1 %vm584_vm1, %v7854_v43 }
 0x21c   : > { %5638 = vmatprep.mubr.msk.f32.mxu1 %vm584_vm1, %v7855_v36 }
 0x21d   : > { %5730 = vmatmul.mubr.msk.f32.gmra.mrb[76].mxu0 %vm584_vm1, %v7863_v22 }
 0x21f   : > { %5639 = vmatmul.mubr.msk.f32.gmra.mrb[14].mxu1 %vm584_vm1, %v7860_v35 }
 0x220   : > { %5641 = vmatprep.mubr.msk.f32.mxu1 %vm584_vm1, %v7861_v41 }
 0x223   : > { %5642 = vmatmul.mubr.msk.f32.gmra.mrb[16].mxu1 %vm584_vm1, %v7864_v45 }
 0x224   : > { %5644 = vmatprep.mubr.msk.f32.mxu1 %vm584_vm1, %v7865_v51 }
 0x227   : > { %5645 = vmatmul.mubr.msk.f32.gmra.mrb[18].mxu1 %vm584_vm1, %v6892_v18  ;;  %v3686_v18 = vld [vmem:[#allocation2 + $0xe9] sm:$0xff] }
 0x228   : > { %5647 = vmatprep.mubr.msk.f32.mxu1 %vm584_vm1, %v7177_v6 }
 0x22b   : > { %5648 = vmatmul.mubr.msk.f32.gmra.mrb[20].mxu1 %vm584_vm1, %v7181_v63 }
 0x22c   : > { %5650 = vmatprep.mubr.msk.f32.mxu1 %vm584_vm1, %v7185_v32 }
 0x22f   : > { %5651 = vmatmul.mubr.msk.f32.gmra.mrb[22].mxu1 %vm584_vm1, %v3376_v17 }
 0x230   : > { %5653 = vmatprep.mubr.msk.f32.mxu1 %vm584_vm1, %v3377_v55 }
 0x233   : > { %5654 = vmatmul.mubr.msk.f32.gmra.mrb[0].mxu1 %vm584_vm1, %v3378_v61 }
 0x234   : > { %5658 = vmatprep.mubr.msk.f32.mxu1 %vm584_vm1, %v7078_v2  ;;  %v3687_v2 = vld [vmem:[#allocation2 + $0xf1] sm:$0xff] }
 0x237   : > { %5659 = vmatmul.mubr.msk.f32.vlgmr.msra.gmra.mrb[2].mxu1 %vm584_vm1, %v7084_v52 }
 0x238   : > { %5661 = vmatprep.mubr.msk.f32.mxu1 %vm584_vm1, %v7090_v3 }
 0x23b   : > { %5662 = vmatmul.mubr.msk.f32.gmra.mrb[4].mxu1 %vm584_vm1, %v7096_v40 }
 0x23c   : > { %5664 = vmatprep.mubr.msk.f32.mxu1 %vm584_vm1, %v7102_v33 }
 0x23f   : > { %5665 = vmatmul.mubr.msk.f32.gmra.mrb[6].mxu1 %vm584_vm1, %v7108_v24 }
 0x240   : > { %5667 = vmatprep.mubr.msk.f32.mxu1 %vm584_vm1, %v7114_v44 }
 0x243   : > { %v7437_v63 = vpop.f32.mrb[52].mxu0  ;;  %5668 = vmatmul.mubr.msk.f32.gmra.mrb[8].mxu1 %vm584_vm1, %v7120_v7 }
 0x244   : > { %v7441_v6 = vpop.f32.mrb[53].mxu0  ;;  %5670 = vmatprep.mubr.msk.f32.mxu1 %vm584_vm1, %v7126_v27 }
 0x247   : > { %v5432_v32 = vpop.f32.mrb[30].mxu0  ;;  %5671 = vmatmul.mubr.msk.f32.gmra.mrb[10].mxu1 %vm584_vm1, %v7132_v46 }
 0x248   : > { %v1976_v33 = vpop.f32.mrb[31].mxu0  ;;  %5673 = vmatprep.mubr.msk.f32.mxu1 %vm584_vm1, %v7138_v50 }
 0x24b   : > { %v5435_v24 = vpop.f32.mrb[32].mxu0  ;;  %5674 = vmatmul.mubr.msk.f32.gmra.mrb[12].mxu1 %vm584_vm1, %v7144_v21 }
 0x24c   : > { %v1986_v44 = vpop.f32.mrb[33].mxu0  ;;  %5676 = vmatprep.mubr.msk.f32.mxu1 %vm584_vm1, %v7150_v29 }
 0x24f   : > { %v5438_v7 = vpop.f32.mrb[34].mxu0  ;;  %5677 = vmatmul.mubr.msk.f32.gmra.mrb[14].mxu1 %vm584_vm1, %v7156_v4 }
 0x250   : > { %v1996_v27 = vpop.f32.mrb[35].mxu0  ;;  %5679 = vmatprep.mubr.msk.f32.mxu1 %vm584_vm1, %v7162_v60 }
 0x253   : > { %v5441_v46 = vpop.f32.mrb[36].mxu0  ;;  %5680 = vmatmul.mubr.msk.f32.gmra.mrb[16].mxu1 %vm584_vm1, %v7168_v14  ;;  %v3685_v14 = vld [vmem:[#allocation2 + $0xe1] sm:$0xff] }
 0x254   : > { %v2006_v50 = vpop.f32.mrb[37].mxu0  ;;  %5682 = vmatprep.mubr.msk.f32.mxu1 %vm584_vm1, %v6885_v42 }
 0x257   : > { %v7461_v21 = vpop.f32.mrb[38].mxu0  ;;  %5683 = vmatmul.mubr.msk.f32.gmra.mrb[18].mxu1 %vm584_vm1, %v6898_v58 }
 0x258   : > { %v7465_v29 = vpop.f32.mrb[39].mxu0  ;;  %5685 = vmatprep.mubr.msk.f32.mxu1 %vm584_vm1, %v7236_v34 }
 0x25b   : > { %v7469_v4 = vpop.f32.mrb[40].mxu0  ;;  %5686 = vmatmul.mubr.msk.f32.gmra.mrb[20].mxu1 %vm584_vm1, %v7240_v56 }
 0x25c   : > { %v7473_v60 = vpop.f32.mrb[41].mxu0  ;;  %5688 = vmatprep.mubr.msk.f32.mxu1 %vm584_vm1, %v7244_v16 }
 0x25f   : > { %v7477_v42 = vpop.f32.mrb[42].mxu0  ;;  %5689 = vmatmul.mubr.msk.f32.gmra.mrb[22].mxu1 %vm584_vm1, %v3685_v14 }
 0x260   : > { %v7480_v58 = vpop.f32.mrb[43].mxu0  ;;  %5691 = vmatprep.mubr.msk.f32.mxu1 %vm584_vm1, %v3686_v18 }
 0x263   : > { %v7483_v52 = vpop.f32.mrb[44].mxu0  ;;  %5692 = vmatmul.mubr.msk.f32.gmra.mrb[0].mxu1 %vm584_vm1, %v3687_v2 }
 0x264   : > { %v7486_v3 = vpop.f32.mrb[45].mxu0 }
 0x267   : > { %v7488_v40 = vpop.f32.mrb[46].mxu0 }
 0x268   : > { %v7490_v34 = vpop.f32.mrb[47].mxu0 }
 0x26b   : > { %v7492_v56 = vpop.f32.mrb[48].mxu0 }
 0x26c   : > { %v7494_v16 = vpop.f32.mrb[49].mxu0 }
 0x26f   : > { %v7496_v1 = vpop.f32.mrb[50].mxu0 }
 0x270   : > { %v7498_v9 = vpop.f32.mrb[51].mxu0 }
 0x30a   : > { %v5660_v5 = vpop.f32.mrb[2].mxu1 }
 0x30b   : > { %v5772_v11 = vadd.f32 %v5660_v5, %v5432_v32  ;;  %v3830_v15 = vpop.f32.mrb[3].mxu1 }
 0x30c   : > { %v5773_v20 = vadd.f32 %v3830_v15, %v1976_v33 }
 0x30d   : > { %v3981_v38 = vmul.f32 %v5772_v11, %v7503_v62 }
 0x30e   : > { %v3980_v49 = vmul.f32 %v5773_v20, %v7503_v62  ;;  %v5663_v53 = vpop.f32.mrb[4].mxu1 }
 0x30f   : > { %v4012_v10 = vadd.f32 %v7508_v13, %v3981_v38  ;;  %v5774_v23 = vadd.f32 %v5663_v53, %v5435_v24  ;;  %v3840_v8 = vpop.f32.mrb[5].mxu1 }
 0x310   : > { %v4011_v47 = vadd.f32 %v7508_v13, %v3980_v49  ;;  %v5775_v39 = vadd.f32 %v3840_v8, %v1986_v44 }
 0x311   : > { %v3983_v37 = vmul.f32 %v5774_v23, %v7503_v62  ;;  %v4036_v19 = vmax.f32 %v4012_v10, 0.0 }
 0x312   : > { %v4035_v12 = vmax.f32 %v4011_v47, 0.0  ;;  %v3982_v0 = vmul.f32 %v5775_v39, %v7503_v62  ;;  %v5666_v54 = vpop.f32.mrb[6].mxu1 }
 0x313   : > { %v4014_v57 = vadd.f32 %v7508_v13, %v3983_v37  ;;  %v5776_v59 = vadd.f32 %v5666_v54, %v5438_v7  ;;  %v3850_v26 = vpop.f32.mrb[7].mxu1 }
 0x314   : > { %v4013_v43 = vadd.f32 %v7508_v13, %v3982_v0  ;;  %v5777_v36 = vadd.f32 %v3850_v26, %v1996_v27  ;;  %5734 = vmatprep.mubr.msk.f32.mxu0 %vm584_vm1, %v4035_v12 }
 0x315   : > { %v3985_v28 = vmul.f32 %v5776_v59, %v7503_v62  ;;  %5735 = vmatmul.mubr.msk.f32.vlgmr.msra.gmra.mrb[54].mxu0 %vm584_vm1, %v4036_v19  ;;  %v4038_v35 = vmax.f32 %v4014_v57, 0.0 }
 0x316   : > { %v4037_v25 = vmax.f32 %v4013_v43, 0.0  ;;  %v3984_v31 = vmul.f32 %v5777_v36, %v7503_v62  ;;  %v5669_v30 = vpop.f32.mrb[8].mxu1 }
 0x317   : > { %v4016_v41 = vadd.f32 %v7508_v13, %v3985_v28  ;;  %v5778_v48 = vadd.f32 %v5669_v30, %v5441_v46  ;;  %v3860_v22 = vpop.f32.mrb[9].mxu1 }
 0x318   : > { %v4015_v45 = vadd.f32 %v7508_v13, %v3984_v31  ;;  %v5779_v51 = vadd.f32 %v3860_v22, %v2006_v50  ;;  %5737 = vmatprep.mubr.msk.f32.mxu0 %vm584_vm1, %v4037_v25 }
 0x319   : > { %v3987_v17 = vmul.f32 %v5778_v48, %v7503_v62  ;;  %5738 = vmatmul.mubr.msk.f32.gmra.mrb[56].mxu0 %vm584_vm1, %v4038_v35  ;;  %v4040_v33 = vmax.f32 %v4016_v41, 0.0 }
 0x31a   : > { %v4039_v55 = vmax.f32 %v4015_v45, 0.0  ;;  %v3986_v61 = vmul.f32 %v5779_v51, %v7503_v62  ;;  %v5672_v32 = vpop.f32.mrb[10].mxu1 }
 0x31b   : > { %v4018_v24 = vadd.f32 %v7508_v13, %v3987_v17  ;;  %v5780_v44 = vadd.f32 %v5672_v32, %v7461_v21  ;;  %v3870_v7 = vpop.f32.mrb[11].mxu1 }
 0x31c   : > { %v4017_v27 = vadd.f32 %v7508_v13, %v3986_v61  ;;  %v5781_v46 = vadd.f32 %v3870_v7, %v7465_v29  ;;  %5740 = vmatprep.mubr.msk.f32.mxu0 %vm584_vm1, %v4039_v55 }
 0x31d   : > { %v3989_v50 = vmul.f32 %v5780_v44, %v7503_v62  ;;  %5741 = vmatmul.mubr.msk.f32.gmra.mrb[58].mxu0 %vm584_vm1, %v4040_v33  ;;  %v4042_v5 = vmax.f32 %v4018_v24, 0.0 }
 0x31e   : > { %v4041_v14 = vmax.f32 %v4017_v27, 0.0  ;;  %v3988_v18 = vmul.f32 %v5781_v46, %v7503_v62  ;;  %v5675_v2 = vpop.f32.mrb[12].mxu1 }
 0x31f   : > { %v4020_v11 = vadd.f32 %v7508_v13, %v3989_v50  ;;  %v5782_v21 = vadd.f32 %v5675_v2, %v7469_v4  ;;  %v3880_v15 = vpop.f32.mrb[13].mxu1 }
 0x320   : > { %v4019_v20 = vadd.f32 %v7508_v13, %v3988_v18  ;;  %v5783_v29 = vadd.f32 %v3880_v15, %v7473_v60  ;;  %5743 = vmatprep.mubr.msk.f32.mxu0 %vm584_vm1, %v4041_v14 }
 0x321   : > { %v3991_v38 = vmul.f32 %v5782_v21, %v7503_v62  ;;  %5744 = vmatmul.mubr.msk.f32.gmra.mrb[60].mxu0 %vm584_vm1, %v4042_v5  ;;  %v4044_v23 = vmax.f32 %v4020_v11, 0.0 }
 0x322   : > { %v4043_v49 = vmax.f32 %v4019_v20, 0.0  ;;  %v3990_v53 = vmul.f32 %v5783_v29, %v7503_v62  ;;  %v5678_v10 = vpop.f32.mrb[14].mxu1 }
 0x323   : > { %v4022_v8 = vadd.f32 %v7508_v13, %v3991_v38  ;;  %v5784_v4 = vadd.f32 %v5678_v10, %v7477_v42  ;;  %v3890_v47 = vpop.f32.mrb[15].mxu1 }
 0x324   : > { %v4021_v39 = vadd.f32 %v7508_v13, %v3990_v53  ;;  %v5785_v60 = vadd.f32 %v3890_v47, %v7480_v58  ;;  %5746 = vmatprep.mubr.msk.f32.mxu0 %vm584_vm1, %v4043_v49 }
 0x325   : > { %v3993_v37 = vmul.f32 %v5784_v4, %v7503_v62  ;;  %5747 = vmatmul.mubr.msk.f32.gmra.mrb[62].mxu0 %vm584_vm1, %v4044_v23  ;;  %v4046_v19 = vmax.f32 %v4022_v8, 0.0 }
 0x326   : > { %v4045_v12 = vmax.f32 %v4021_v39, 0.0  ;;  %v3992_v0 = vmul.f32 %v5785_v60, %v7503_v62  ;;  %v5681_v54 = vpop.f32.mrb[16].mxu1 }
 0x327   : > { %v4024_v57 = vadd.f32 %v7508_v13, %v3993_v37  ;;  %v5786_v42 = vadd.f32 %v5681_v54, %v7483_v52  ;;  %v3900_v59 = vpop.f32.mrb[17].mxu1 }
 0x328   : > { %v4023_v26 = vadd.f32 %v7508_v13, %v3992_v0  ;;  %v5787_v58 = vadd.f32 %v3900_v59, %v7486_v3  ;;  %5749 = vmatprep.mubr.msk.f32.mxu0 %vm584_vm1, %v4045_v12 }
 0x329   : > { %v3995_v43 = vmul.f32 %v5786_v42, %v7503_v62  ;;  %5750 = vmatmul.mubr.msk.f32.gmra.mrb[64].mxu0 %vm584_vm1, %v4046_v19  ;;  %v4048_v31 = vmax.f32 %v4024_v57, 0.0 }
 0x32a   : > { %v4047_v36 = vmax.f32 %v4023_v26, 0.0  ;;  %v3994_v28 = vmul.f32 %v5787_v58, %v7503_v62  ;;  %v5684_v25 = vpop.f32.mrb[18].mxu1 }
 0x32b   : > { %v4026_v30 = vadd.f32 %v7508_v13, %v3995_v43  ;;  %v5788_v52 = vadd.f32 %v5684_v25, %v7488_v40  ;;  %v3910_v35 = vpop.f32.mrb[19].mxu1 }
 0x32c   : > { %v4025_v41 = vadd.f32 %v7508_v13, %v3994_v28  ;;  %v5789_v3 = vadd.f32 %v3910_v35, %v7490_v34  ;;  %5752 = vmatprep.mubr.msk.f32.mxu0 %vm584_vm1, %v4047_v36 }
 0x32d   : > { %v3997_v48 = vmul.f32 %v5788_v52, %v7503_v62  ;;  %5753 = vmatmul.mubr.msk.f32.gmra.mrb[66].mxu0 %vm584_vm1, %v4048_v31  ;;  %v4050_v17 = vmax.f32 %v4026_v30, 0.0 }
 0x32e   : > { %v4049_v22 = vmax.f32 %v4025_v41, 0.0  ;;  %v3996_v45 = vmul.f32 %v5789_v3, %v7503_v62  ;;  %v5687_v51 = vpop.f32.mrb[20].mxu1 }
 0x32f   : > { %v4028_v55 = vadd.f32 %v7508_v13, %v3997_v48  ;;  %v5790_v40 = vadd.f32 %v5687_v51, %v7492_v56  ;;  %v3920_v61 = vpop.f32.mrb[21].mxu1 }
 0x330   : > { %v4027_v32 = vadd.f32 %v7508_v13, %v3996_v45  ;;  %v5791_v34 = vadd.f32 %v3920_v61, %v7494_v16  ;;  %5755 = vmatprep.mubr.msk.f32.mxu0 %vm584_vm1, %v4049_v22 }
 0x331   : > { %v3999_v33 = vmul.f32 %v5790_v40, %v7503_v62  ;;  %5756 = vmatmul.mubr.msk.f32.gmra.mrb[68].mxu0 %vm584_vm1, %v4050_v17  ;;  %v4052_v27 = vmax.f32 %v4028_v55, 0.0 }
 0x332   : > { %v4051_v24 = vmax.f32 %v4027_v32, 0.0  ;;  %v3998_v44 = vmul.f32 %v5791_v34, %v7503_v62  ;;  %v5690_v7 = vpop.f32.mrb[22].mxu1 }
 0x333   : > { %v4030_v46 = vadd.f32 %v7508_v13, %v3999_v33  ;;  %v5792_v56 = vadd.f32 %v5690_v7, %v7496_v1  ;;  %v3930_v50 = vpop.f32.mrb[23].mxu1 }
 0x334   : > { %v4029_v14 = vadd.f32 %v7508_v13, %v3998_v44  ;;  %v5793_v16 = vadd.f32 %v3930_v50, %v7498_v9  ;;  %5758 = vmatprep.mubr.msk.f32.mxu0 %vm584_vm1, %v4051_v24 }
 0x335   : > { %v4001_v18 = vmul.f32 %v5792_v56, %v7503_v62  ;;  %5759 = vmatmul.mubr.msk.f32.gmra.mrb[70].mxu0 %vm584_vm1, %v4052_v27  ;;  %v4054_v21 = vmax.f32 %v4030_v46, 0.0 }
 0x336   : > { %v4053_v2 = vmax.f32 %v4029_v14, 0.0  ;;  %v4000_v5 = vmul.f32 %v5793_v16, %v7503_v62  ;;  %v5693_v11 = vpop.f32.mrb[0].mxu1 }
 0x337   : > { %v4032_v15 = vadd.f32 %v7508_v13, %v4001_v18  ;;  %v5794_v1 = vadd.f32 %v5693_v11, %v7437_v63  ;;  %v3940_v20 = vpop.f32.mrb[1].mxu1 }
 0x338   : > { %v4031_v29 = vadd.f32 %v7508_v13, %v4000_v5  ;;  %v5795_v9 = vadd.f32 %v3940_v20, %v7441_v6  ;;  %5761 = vmatprep.mubr.msk.f32.mxu0 %vm584_vm1, %v4053_v2 }
 0x339   : > { %v4003_v38 = vmul.f32 %v5794_v1, %v7503_v62  ;;  %5762 = vmatmul.mubr.msk.f32.gmra.mrb[72].mxu0 %vm584_vm1, %v4054_v21  ;;  %v4056_v10 = vmax.f32 %v4032_v15, 0.0 }
 0x33a   : > { %v4055_v49 = vmax.f32 %v4031_v29, 0.0  ;;  %v4002_v53 = vmul.f32 %v5795_v9, %v7503_v62 }
 0x33b   : > { %v4034_v23 = vadd.f32 %v7508_v13, %v4003_v38 }
 0x33c   : > { %v4033_v63 = vadd.f32 %v7508_v13, %v4002_v53  ;;  %5764 = vmatprep.mubr.msk.f32.mxu0 %vm584_vm1, %v4055_v49 }
 0x33d   : > { %5765 = vmatmul.mubr.msk.f32.gmra.mrb[74].mxu0 %vm584_vm1, %v4056_v10  ;;  %v4058_v8 = vmax.f32 %v4034_v23, 0.0 }
 0x33e   : > { %v4057_v6 = vmax.f32 %v4033_v63, 0.0 }
 0x340   : > { %5767 = vmatprep.mubr.msk.f32.mxu0 %vm584_vm1, %v4057_v6 }
 0x341   : > { %5768 = vmatmul.mubr.msk.f32.gmra.mrb[76].mxu0 %vm584_vm1, %v4058_v8 }
 0x3e8   : > { %v5736_v62 = vpop.f32.mrb[54].mxu0 }
 0x3e9   : > { %4512 = vst.msk [vmem:[%s7601_s15 + $0x7] sm:$0xff] %vm4511_vm2, %v5736_v62  ;;  %v4390_v13 = vpop.f32.mrb[55].mxu0 }
 0x3ea   : > { %4510 = vst.msk [vmem:[%s7601_s15 - $0x1] sm:$0xfe] %vm4509_vm3, %v4390_v13 }
 0x3ec   : > { %v5739_v4 = vpop.f32.mrb[56].mxu0 }
 0x3ed   : > { %4970 = vst.msk [vmem:[%s7601_s15 + $0xf] sm:$0xfe] %vm4509_vm3, %v5739_v4  ;;  %v4400_v47 = vpop.f32.mrb[57].mxu0 }
 0x3ee   : > { %4514 = vst.msk [vmem:[%s7601_s15 + $0xf] sm:$0x1] %vm4513_vm4, %v4400_v47 }
 0x3f0   : > { %v5742_v39 = vpop.f32.mrb[58].mxu0 }
 0x3f1   : > { %4972 = vst.msk [vmem:[%s7601_s15 + $0x1f] sm:$0x1] %vm4513_vm4, %v5742_v39  ;;  %v4410_v60 = vpop.f32.mrb[59].mxu0 }
 0x3f2   : > { %4971 = vst.msk [vmem:[%s7601_s15 + $0x17] sm:$0xff] %vm4511_vm2, %v4410_v60 }
 0x3f4   : > { %v5745_v37 = vpop.f32.mrb[60].mxu0 }
 0x3f5   : > { %4974 = vst.msk [vmem:[%s7601_s15 + $0x27] sm:$0xff] %vm4511_vm2, %v5745_v37  ;;  %v4420_v12 = vpop.f32.mrb[61].mxu0 }
 0x3f6   : > { %4973 = vst.msk [vmem:[%s7601_s15 + $0x1f] sm:$0xfe] %vm4509_vm3, %v4420_v12 }
 0x3f8   : > { %v5748_v0 = vpop.f32.mrb[62].mxu0 }
 0x3f9   : > { %4976 = vst.msk [vmem:[%s7601_s15 + $0x2f] sm:$0xfe] %vm4509_vm3, %v5748_v0  ;;  %v4430_v54 = vpop.f32.mrb[63].mxu0 }
 0x3fa   : > { %4975 = vst.msk [vmem:[%s7601_s15 + $0x2f] sm:$0x1] %vm4513_vm4, %v4430_v54 }
 0x3fc   : > { %v5751_v19 = vpop.f32.mrb[64].mxu0 }
 0x3fd   : > { %4978 = vst.msk [vmem:[%s7601_s15 + $0x3f] sm:$0x1] %vm4513_vm4, %v5751_v19  ;;  %v4440_v57 = vpop.f32.mrb[65].mxu0 }
 0x3fe   : > { %4977 = vst.msk [vmem:[%s7601_s15 + $0x37] sm:$0xff] %vm4511_vm2, %v4440_v57 }
 0x400   : > { %v5754_v42 = vpop.f32.mrb[66].mxu0 }
 0x401   : > { %4980 = vst.msk [vmem:[%s7601_s15 + $0x47] sm:$0xff] %vm4511_vm2, %v5754_v42  ;;  %v4450_v59 = vpop.f32.mrb[67].mxu0 }
 0x402   : > { %4979 = vst.msk [vmem:[%s7601_s15 + $0x3f] sm:$0xfe] %vm4509_vm3, %v4450_v59 }
 0x404   : > { %v5757_v26 = vpop.f32.mrb[68].mxu0 }
 0x405   : > { %4982 = vst.msk [vmem:[%s7601_s15 + $0x4f] sm:$0xfe] %vm4509_vm3, %v5757_v26  ;;  %v4460_v58 = vpop.f32.mrb[69].mxu0 }
 0x406   : > { %4981 = vst.msk [vmem:[%s7601_s15 + $0x4f] sm:$0x1] %vm4513_vm4, %v4460_v58 }
 0x408   : > { %v5760_v43 = vpop.f32.mrb[70].mxu0 }
 0x409   : > { %4984 = vst.msk [vmem:[%s7601_s15 + $0x5f] sm:$0x1] %vm4513_vm4, %v5760_v43  ;;  %v4470_v36 = vpop.f32.mrb[71].mxu0 }
 0x40a   : > { %4983 = vst.msk [vmem:[%s7601_s15 + $0x57] sm:$0xff] %vm4511_vm2, %v4470_v36 }
 0x40c   : > { %v5763_v28 = vpop.f32.mrb[72].mxu0 }
 0x40d   : > { %4986 = vst.msk [vmem:[%s7601_s15 + $0x67] sm:$0xff] %vm4511_vm2, %v5763_v28  ;;  %v4480_v25 = vpop.f32.mrb[73].mxu0 }
 0x40e   : > { %4985 = vst.msk [vmem:[%s7601_s15 + $0x5f] sm:$0xfe] %vm4509_vm3, %v4480_v25 }
 0x410   : > { %v5766_v31 = vpop.f32.mrb[74].mxu0 }
 0x411   : > { %4988 = vst.msk [vmem:[%s7601_s15 + $0x6f] sm:$0xfe] %vm4509_vm3, %v5766_v31  ;;  %v4490_v30 = vpop.f32.mrb[75].mxu0 }
 0x412   : > { %4987 = vst.msk [vmem:[%s7601_s15 + $0x6f] sm:$0x1] %vm4513_vm4, %v4490_v30 }
 0x414   : > { %v5769_v52 = vpop.f32.mrb[76].mxu0 }
 0x415   : > { %4990 = vst.msk [vmem:[%s7601_s15 + $0x7f] sm:$0x1] %vm4513_vm4, %v5769_v52  ;;  %v4500_v35 = vpop.f32.mrb[77].mxu0 }
 0x416   : > { %4989 = vst.msk [vmem:[%s7601_s15 + $0x77] sm:$0xff] %vm4511_vm2, %v4500_v35 }
 0x417   : > { %6080 = shalt.err (!%p6077_p7)
}
 0x418   : > { %s6081_s19 = scalar_lea.hbm %s7653_s30, 2048  ;;  %s6085_s14 = scalar_lea.hbm %s7727_s12, 8192 }
 0x419   : > { %p6082_p9 = scmp.ne.s32.totalorder %s7653_s30, %s6081_s19  ;;  %p6086_p12 = scmp.lt.u32.totalorder %s7653_s30, %s7727_s12 }
 0x41a   : > { %p6087_p13 = scmp.lt.u32.totalorder %s6085_s14, %s6081_s19  ;;  %p6089_p1 = scmp.lt.u32.totalorder %s6081_s19, %s7653_s30 }
 0x41b   : > { %p6083_p10 = pnand %p6082_p9, %p6284_p3 }
 0x41c   : > { %p6088_p0 = por %p6087_p13, %p6086_p12 }
 0x41d   : > { %p6084_p11 = pneg %p6083_p10 }
 0x41e   : > { %p6090_p2 = por %p6089_p1, %p6088_p0 }
 0x420   : > { %p6091_p4 = pnand %p6090_p2, %p6084_p11 }
 0x422   : > { %6094 = shalt.err (!%p6091_p4)
}
 0x423   : > { %s6166_s25 = smov 128   ;;  %s6167_s26 = smov 8  }
 0x424   : > { %5990 = dma.vmem_to_hbm [thread:$0]  (%p6284_p3), %s7655_s29, 2048, %s7653_s30, %s7663_s18, %s6166_s25, %s6166_s25, %s6167_s26  }
 0x425 PF: > { %p5996_p5 = scmp.ge.s32.totalorder %s6161_s28, 2  ;;  %s4575_s13 = sand.u32 1, %s6133_s21  }
 0x426   : > { %s4576_s20 = scalar_lea.sflag [#allocation4], %s4575_s13 }
 0x427   : > { %p5993_p6 = pnand %p5996_p5, %p6293_p8 }
 0x429   : > { %6128 = dma.done.wait (!%p5993_p6), %s4576_s20, 2048  }
 0x42a   : > { %6130 = vsyncadd (!%p5993_p6), %s4576_s20, 4294965248  ;;  %s25_s28 = sadd.s32 1, %s6161_s28   ;;  %s7866_s4 = sld [smem:[#allocation6_spill]] }
 0x42b   : > { %p22_p7 = scmp.ge.s32.totalorder %s25_s28, 6   ;;  %s7867_s23 = sld [smem:[#allocation11_spill]] }
 0x42c   : > { %s7868_s24 = sld [smem:[#allocation7_spill]]  ;;  %s7869_s25 = sld [smem:[#allocation8_spill]] }
 0x42d   : > { %s7870_s26 = sld [smem:[#allocation9_spill]]  ;;  %s7871_s27 = sld [smem:[#allocation10_spill]] }
 0x42e   : > { %s7872_s21 = smov %s6137_s22  ;;  %24 = sbr.rel (!%p22_p7) target bundleno = 7 (0x7), region = 114 }
 0x430   : > { %s7873_s22 = smov %s7866_s4 }
 0x435   :  { %4581 = vsyncpa [#allocation4], 1 }
 0x436   :  { %4583 = vsyncpa [#allocation4 + $0x1], 1 }

// kernel: tpu_custom_call.1
= control target key start
LH: loop header
LB: loop body
LE: loop exit
PB: predicated region body
PF: predicated region fallthrough
CT: control target
= control target key end

     0   :  { %s7715_s0 = inlined_call_operand.vmem [shape: f32[2,432,4], index: 0, kind: input, shape index: {}]   ;;  %s7716_s1 = inlined_call_operand.vmem [shape: f32[2,240,1], index: 1, kind: input, shape index: {}]   ;;  %s7717_s2 = inlined_call_operand.vmem [shape: f32[1,4], index: 2, kind: input, shape index: {}]   ;;  %s7718_s3 = inlined_call_operand.vmem [shape: f32[1,4], index: 3, kind: input, shape index: {}]   ;;  %s7719_s4 = inlined_call_operand.vmem [shape: f32[4,4], index: 4, kind: input, shape index: {}]   ;;  %s7720_s5 = inlined_call_operand.vmem [shape: f32[1,4], index: 5, kind: input, shape index: {}]   ;;  %s7721_s6 = inlined_call_operand.vmem [shape: f32[1,4], index: 6, kind: input, shape index: {}]   ;;  %s7722_s7 = inlined_call_operand.vmem [shape: f32[36,4], index: 7, kind: input, shape index: {}]   ;;  %s7723_s8 = inlined_call_operand.vmem [shape: f32[1,4], index: 8, kind: input, shape index: {}]   ;;  %s7724_s9 = inlined_call_operand.vmem [shape: f32[1,4], index: 9, kind: input, shape index: {}]   ;;  %s7725_s10 = inlined_call_operand.vmem [shape: f32[4,16], index: 10, kind: input, shape index: {}]   ;;  %s7726_s11 = inlined_call_operand.vmem [shape: f32[4,16], index: 11, kind: input, shape index: {}]   ;;  %s7727_s12 = inlined_call_operand.hbm [shape: f32[2,16,16,16], index: 12, kind: output, shape index: {}]  }
   0x1   :  { %7782 = sst [smem:[#allocation37_spill]] %s7719_s4 }
   0x2   :  { %17 = vsyncpa [#allocation4], 0 }
   0x3   :  { %19 = vsyncpa [#allocation4 + $0x1], 0  ;;  %s6233_s21 = smov 0   ;;  %s6235_s22 = smov 0  }
   0x4   :  { %s6237_s23 = smov 0   ;;  %s6239_s24 = smov 0  }
   0x5   :  { %s6241_s25 = smov 0   ;;  %s6243_s26 = smov 0  }
   0x6   :  { %s6245_s27 = smov 0   ;;  %s6247_s28 = smov 0  }
   0x7 LB: > { %7783 = sst [smem:[#allocation6_spill]] %s6141_s23  ;;  %s4650_s29 = sadd.s32 4294967295, %s6161_s28   ;;  %s6161_s28 = sphi %s6247_s28, %s25_s28   ;;  %s6157_s27 = sphi %s6245_s27, %s7871_s27   ;;  %s6153_s26 = sphi %s6243_s26, %s7870_s26   ;;  %s6149_s25 = sphi %s6241_s25, %s7869_s25   ;;  %s6145_s24 = sphi %s6239_s24, %s7868_s24   ;;  %s6141_s23 = sphi %s6237_s23, %s7867_s23   ;;  %s6137_s22 = sphi %s6235_s22, %s7873_s22   ;;  %s6133_s21 = sphi %s6233_s21, %s7872_s21  }
   0x8   : > { %7784 = sst [smem:[#allocation7_spill]] %s6153_s26  ;;  %s4651_s30 = sadd.s32 4294967294, %s6161_s28  }
   0x9   : > { %7785 = sst [smem:[#allocation8_spill]] %s6157_s27  ;;  %s34_s13 = sadd.s32 1, %s6153_s26 }
   0xa   : > { %p35_p0 = scmp.ge.s32.totalorder %s34_s13, 2  ;;  %s37_s14 = sadd.s32 1, %s6157_s27 }
   0xb   : > { %p318_p1 = scmp.ne.s32.totalorder %s6141_s23, %s6137_s22  ;;  %p319_p2 = scmp.eq.s32.totalorder %s4650_s29, 3 }
   0xc   : > { %s7875_s13 = smov (%p35_p0, %s34_s13), 0  ;;  %s7877_s14 = smov (!%p35_p0, %s37_s14), %s6157_s27 }
   0xd   : > { %7786 = sst [smem:[#allocation9_spill]] %s7875_s13  ;;  %s304_s15 = ssub.s32 %s6153_s26, %s7875_s13 }
   0xe   : > { %p6284_p3 = por %p319_p2, %p318_p1  ;;  %p39_p4 = scmp.ge.s32.totalorder %s7877_s14, 2 }
   0xf   : > { %p324_p5 = scmp.ne.s32.totalorder %s6137_s22, %s6133_s21  ;;  %p325_p6 = scmp.eq.s32.totalorder %s4651_s30, 3 }
  0x10   : > { %p4654_p7 = scmp.ge.s32.totalorder %s6161_s28, 1  ;;  %s7879_s14 = smov (%p39_p4, %s7877_s14), 0 }
  0x11   : > { %7788 = sst [smem:[#allocation10_spill]] %s7879_s14  ;;  %p6293_p8 = por %p325_p6, %p324_p5 }
  0x12   : > { %p389_p9 = scmp.lt.s32.totalorder %s6161_s28, 5  ;;  %s303_s18 = ssub.s32 %s6157_s27, %s7879_s14 }
  0x13   : > { %s308_s19 = sadd.s32 1, %s6141_s23  ;;  %s305_s20 = sor.u32 %s304_s15, %s303_s18 }
  0x14   : > { %p390_p10 = pnand %p4654_p7, %p389_p9  ;;  %p306_p11 = scmp.eq.s32.totalorder %s305_s20, 0 }
  0x16   : > { %s6302_s29 = scalar_select %p306_p11, %s6141_s23, %s308_s19  }
  0x17   : > { %393 = sbr.rel (%p390_p10) target bundleno = 1061 (0x425), region = 68 }
  0x18   : > { %7790 = sst [smem:[#allocation11_spill]] %s6302_s29 }
  0x1e   : > { %s7791_s4 = sld [smem:[#allocation37_spill]]  ;;  %vm675_vm0 = vcmask 1043456   ;;  %p436_p12 = scmp.lt.s32.totalorder %s6149_s25, 1  ;;  %v6163_v1 = vmov 0   ;;  %v6320_v2 = vld [vmem:[%s7717_s2] ss:$0 sm:$0xff] }
  0x1f   : > { %s447_s30 = smul.u32 192, %s6145_s24  ;;  %p441_p13 = scmp.lt.s32.totalorder %s6145_s24, 1  ;;  %6066 = vset.pattern.permute.xlu1 %v6163_v1  ;;  %6065 = vset.pattern.permute.xlu0 %v6163_v1  ;;  %v6327_v3 = vld [vmem:[%s7718_s3] ss:$0 sm:$0xff]  ;;  %vm584_vm1 = vcmask 31744   ;;  %vm4511_vm2 = vcmask 130048  }
  0x20   : > { %s437_s15 = scalar_select %p436_p12, %s6149_s25, 1  ;;  %vm4509_vm3 = vcmask 130049   ;;  %vm4513_vm4 = vcmask 122880  }
  0x21   : > { %s442_s18 = scalar_select %p441_p13, %s6145_s24, 1 }
  0x22   : > { %s5988_s26 = smul.u32 432, %s437_s15  ;;  %s433_s19 = sand.u32 1, %s6137_s22  }
  0x23   : > { %s5989_s15 = smul.u32 240, %s442_s18  ;;  %s4994_s23 = sshll.u32 %s6149_s25, 5 }
  0x24   : > { %v583_v0 = vld [vmem:[%s7791_s4] sm:$0xf]  ;;  %s440_s20 = scalar_lea.vmem %s7715_s0, %s5988_s26  ;;  %s4998_s4 = sshll.u32 %s6145_s24, 4 }
  0x25   : > { %5305 = vmatprep.subr.msk.mxu0 %vm675_vm0, %v583_v0  ;;  %s6322_s27 = scalar_lea.vmem %s440_s20, %s447_s30  ;;  %s6347_s14 = scalar_lea.vmem %s7716_s1, %s5989_s15 }
  0x26   : > { %5306 = vmatpush3.msk.msra.mxu0 %vm675_vm0, %v583_v0  ;;  %v449_v4 = vld [vmem:[%s6322_s27] sm:$0xff]  ;;  %v450_v5 = vld [vmem:[%s6322_s27 + $0x8] sm:$0xff]  ;;  %v451_v6 = vld [vmem:[%s6322_s27 + $0x10] sm:$0xff]  ;;  %s4655_s20 = sshll.u32 %s433_s19, 7  ;;  %s7663_s18 = scalar_lea.sflag [#allocation4], %s433_s19 }
  0x27   : > { %v486_v7 = vmul.f32 %v6320_v2, %v449_v4  ;;  %v487_v8 = vmul.f32 %v6320_v2, %v450_v5  ;;  %v488_v9 = vmul.f32 %v6320_v2, %v451_v6  ;;  %v452_v10 = vld [vmem:[%s6322_s27 + $0x18] sm:$0xff]  ;;  %v453_v11 = vld [vmem:[%s6322_s27 + $0x20] sm:$0xff]  ;;  %v454_v12 = vld [vmem:[%s6322_s27 + $0x28] sm:$0xff]  ;;  %s7601_s15 = scalar_lea.vmem [#allocation3], %s4655_s20  ;;  %s6165_s13 = smov [#allocation3]  }
  0x28   : > { %v489_v13 = vmul.f32 %v6320_v2, %v452_v10  ;;  %v490_v14 = vmul.f32 %v6320_v2, %v453_v11  ;;  %v455_v15 = vld [vmem:[%s6322_s27 + $0x30] sm:$0xff]  ;;  %v491_v20 = vmul.f32 %v6320_v2, %v454_v12  ;;  %v456_v26 = vld [vmem:[%s6322_s27 + $0x38] sm:$0xff]  ;;  %v457_v27 = vld [vmem:[%s6322_s27 + $0x40] sm:$0xff]  ;;  %s4560_s29 = sshll.u32 %s7601_s15, 4  ;;  %s6071_s20 = sshll.u32 %s6165_s13, 4  ;;  %s7655_s29 = int_to_ptr.vmem [resolvable:$true] %s4560_s29  ;;  %s6072_s20 = int_to_ptr.vmem [resolvable:$false] %s6071_s20 }
  0x29   : > { %v523_v16 = vadd.f32 %v6327_v3, %v486_v7  ;;  %v524_v17 = vadd.f32 %v6327_v3, %v487_v8  ;;  %v525_v18 = vadd.f32 %v6327_v3, %v488_v9  ;;  %v492_v21 = vmul.f32 %v6320_v2, %v455_v15  ;;  %v1022_v28 = vld [vmem:[%s6347_s14 + $0xc0] sm:$0xff]  ;;  %v1020_v29 = vld [vmem:[%s6347_s14 + $0xb0] sm:$0xff]  ;;  %v458_v37 = vld [vmem:[%s6322_s27 + $0x48] sm:$0xff]  ;;  %s6067_s26 = scalar_lea.vmem %s7655_s29, 2048  ;;  %p6074_p4 = scmp.lt.s32.totalorder %s7655_s29, %s6072_s20 }
  0x2a   : > { %v6350_v19 = vadd.f32 %v6327_v3, %v489_v13  ;;  %v6355_v25 = vadd.f32 %v6327_v3, %v490_v14  ;;  %1150 = vperm.xlu1 %6066, %v1022_v28   ;;  %v6365_v31 = vadd.f32 %v6327_v3, %v491_v20  ;;  %v493_v32 = vmul.f32 %v6320_v2, %v456_v26  ;;  %v1000_v33 = vld [vmem:[%s6347_s14 + $0x10] sm:$0xff]  ;;  %v1021_v38 = vld [vmem:[%s6347_s14 + $0xb8] sm:$0xff]  ;;  %v1002_v43 = vld [vmem:[%s6347_s14 + $0x20] sm:$0xff]  ;;  %p6068_p0 = scmp.ne.s32.totalorder %s7655_s29, %s6067_s26 }
  0x2b   : > { %v553_v22 = vmax.f32 %v523_v16, 0.0  ;;  %v554_v23 = vmax.f32 %v524_v17, 0.0  ;;  %v555_v24 = vmax.f32 %v525_v18, 0.0  ;;  %1140 = vperm.xlu0 %6065, %v1020_v29   ;;  %v6372_v35 = vadd.f32 %v6327_v3, %v492_v21  ;;  %v459_v39 = vld [vmem:[%s6322_s27 + $0x50] sm:$0xff]  ;;  %v460_v47 = vld [vmem:[%s6322_s27 + $0x58] sm:$0xff]  ;;  %v461_v48 = vld [vmem:[%s6322_s27 + $0x60] sm:$0xff] }
  0x2c   : > { %v7756_v30 = vmax.f32 %v6350_v19, 0.0  ;;  %v7755_v34 = vmax.f32 %v6355_v25, 0.0  ;;  %v494_v36 = vmul.f32 %v6320_v2, %v457_v27  ;;  %v7754_v40 = vmax.f32 %v6365_v31, 0.0  ;;  %v1001_v49 = vld [vmem:[%s6347_s14 + $0x18] sm:$0xff]  ;;  %v1004_v53 = vld [vmem:[%s6347_s14 + $0x30] sm:$0xff]  ;;  %v462_v57 = vld [vmem:[%s6322_s27 + $0x68] sm:$0xff]  ;;  %p6069_p1 = pnand %p6068_p0, %p6284_p3 }
  0x2d   : > { %5307 = vmatprep.mubr.msk.f32.mxu0 %vm584_vm1, %v553_v22  ;;  %v6383_v41 = vadd.f32 %v6327_v3, %v493_v32  ;;  %v495_v42 = vmul.f32 %v6320_v2, %v458_v37  ;;  %v7753_v44 = vmax.f32 %v6372_v35, 0.0  ;;  %v496_v46 = vmul.f32 %v6320_v2, %v459_v39  ;;  %v463_v58 = vld [vmem:[%s6322_s27 + $0x70] sm:$0xff]  ;;  %v1003_v59 = vld [vmem:[%s6347_s14 + $0x28] sm:$0xff]  ;;  %v1006_v63 = vld [vmem:[%s6347_s14 + $0x40] sm:$0xff] }
  0x2e   : > { %5308 = vmatmul.mubr.msk.f32.vlgmr.msra.gmra.mrb[0].mxu0 %vm584_vm1, %v554_v23  ;;  %1040 = vperm.xlu1 %6066, %v1000_v33   ;;  %v6392_v45 = vadd.f32 %v6327_v3, %v494_v36  ;;  %v497_v52 = vmul.f32 %v6320_v2, %v460_v47  ;;  %v498_v56 = vmul.f32 %v6320_v2, %v461_v48  ;;  %v464_v5 = vld [vmem:[%s6322_s27 + $0x78] sm:$0xff]  ;;  %v465_v6 = vld [vmem:[%s6322_s27 + $0x80] sm:$0xff]  ;;  %v1008_v11 = vld [vmem:[%s6347_s14 + $0x50] sm:$0xff]  ;;  %p6070_p2 = pneg %p6069_p1 }
  0x2f   : > { %5310 = vmatprep.mubr.msk.f32.mxu0 %vm584_vm1, %v555_v24  ;;  %1145 = vperm.xlu0 %6065, %v1021_v38   ;;  %v7752_v50 = vmax.f32 %v6383_v41, 0.0  ;;  %v6403_v51 = vadd.f32 %v6327_v3, %v495_v42  ;;  %v6412_v55 = vadd.f32 %v6327_v3, %v496_v46  ;;  %v499_v62 = vmul.f32 %v6320_v2, %v462_v57  ;;  %v1005_v7 = vld [vmem:[%s6347_s14 + $0x38] sm:$0xff]  ;;  %v466_v15 = vld [vmem:[%s6322_s27 + $0x88] sm:$0xff]  ;;  %v467_v16 = vld [vmem:[%s6322_s27 + $0x90] sm:$0xff] }
  0x30   : > { %v7751_v54 = vmax.f32 %v6392_v45, 0.0  ;;  %v6423_v61 = vadd.f32 %v6327_v3, %v497_v52  ;;  %v6432_v1 = vadd.f32 %v6327_v3, %v498_v56  ;;  %v500_v4 = vmul.f32 %v6320_v2, %v463_v58  ;;  %v1007_v17 = vld [vmem:[%s6347_s14 + $0x48] sm:$0xff]  ;;  %v1010_v22 = vld [vmem:[%s6347_s14 + $0x60] sm:$0xff]  ;;  %v468_v27 = vld [vmem:[%s6322_s27 + $0x98] sm:$0xff] }
  0x31   : > { %v7750_v60 = vmax.f32 %v6403_v51, 0.0  ;;  %v7749_v0 = vmax.f32 %v6412_v55, 0.0  ;;  %v6443_v9 = vadd.f32 %v6327_v3, %v499_v62  ;;  %v501_v10 = vmul.f32 %v6320_v2, %v464_v5  ;;  %v469_v28 = vld [vmem:[%s6322_s27 + $0xa0] sm:$0xff]  ;;  %v1009_v29 = vld [vmem:[%s6347_s14 + $0x58] sm:$0xff]  ;;  %v1012_v37 = vld [vmem:[%s6347_s14 + $0x70] sm:$0xff] }
  0x32   : > { %5311 = vmatmul.mubr.msk.f32.gmra.mrb[2].mxu0 %vm584_vm1, %v7756_v30  ;;  %1050 = vperm.xlu1 %6066, %v1002_v43   ;;  %v7748_v8 = vmax.f32 %v6423_v61, 0.0  ;;  %v7747_v12 = vmax.f32 %v6432_v1, 0.0  ;;  %v6452_v13 = vadd.f32 %v6327_v3, %v500_v4  ;;  %v502_v14 = vmul.f32 %v6320_v2, %v465_v6  ;;  %v470_v43 = vld [vmem:[%s6322_s27 + $0xa8] sm:$0xff]  ;;  %v471_v46 = vld [vmem:[%s6322_s27 + $0xb0] sm:$0xff]  ;;  %v473_v62 = vld [vmem:[%s6322_s27 + $0xc0] sm:$0xff] }
  0x33   : > { %5313 = vmatprep.mubr.msk.f32.mxu0 %vm584_vm1, %v7755_v34  ;;  %1045 = vperm.xlu0 %6065, %v1001_v49   ;;  %v7746_v18 = vmax.f32 %v6443_v9, 0.0  ;;  %v6463_v20 = vadd.f32 %v6327_v3, %v501_v10  ;;  %v503_v21 = vmul.f32 %v6320_v2, %v466_v15  ;;  %v504_v26 = vmul.f32 %v6320_v2, %v467_v16  ;;  %v1011_v47 = vld [vmem:[%s6347_s14 + $0x68] sm:$0xff]  ;;  %v475_v16 = vld [vmem:[%s6322_s27 + $0xd0] sm:$0xff] }
  0x34   : > { %v7745_v23 = vmax.f32 %v6452_v13, 0.0  ;;  %v6472_v24 = vadd.f32 %v6327_v3, %v502_v14  ;;  %v505_v36 = vmul.f32 %v6320_v2, %v468_v27  ;;  %v506_v42 = vmul.f32 %v6320_v2, %v469_v28  ;;  %v474_v15 = vld [vmem:[%s6322_s27 + $0xc8] sm:$0xff]  ;;  %v1018_v27 = vld [vmem:[%s6347_s14 + $0xa0] sm:$0xff] }
  0x35   : > { %v7744_v32 = vmax.f32 %v6463_v20, 0.0  ;;  %v6483_v33 = vadd.f32 %v6327_v3, %v503_v21  ;;  %v6492_v39 = vadd.f32 %v6327_v3, %v504_v26  ;;  %v507_v52 = vmul.f32 %v6320_v2, %v470_v43  ;;  %v1017_v43 = vld [vmem:[%s6347_s14 + $0x98] sm:$0xff] }
  0x36   : > { %5314 = vmatmul.mubr.msk.f32.gmra.mrb[4].mxu0 %vm584_vm1, %v7754_v40  ;;  %1060 = vperm.xlu1 %6066, %v1004_v53   ;;  %7792 = vst [vmem:[#allocation12_spill] sm:$0xff] %v6472_v24  ;;  %v7743_v38 = vmax.f32 %v6472_v24, 0.0  ;;  %v6503_v49 = vadd.f32 %v6327_v3, %v505_v36  ;;  %v1014_v53 = vld [vmem:[%s6347_s14 + $0x80] sm:$0xff]  ;;  %v6512_v57 = vadd.f32 %v6327_v3, %v506_v42 }
  0x37   : > { %5316 = vmatprep.mubr.msk.f32.mxu0 %vm584_vm1, %v7753_v44  ;;  %1055 = vperm.xlu0 %6065, %v1003_v59   ;;  %7793 = vst [vmem:[#allocation13_spill] sm:$0xff] %v6483_v33  ;;  %7794 = vst [vmem:[#allocation14_spill] sm:$0xff] %v6492_v39  ;;  %v7742_v48 = vmax.f32 %v6483_v33, 0.0  ;;  %v7741_v56 = vmax.f32 %v6492_v39, 0.0  ;;  %v508_v58 = vmul.f32 %v6320_v2, %v471_v46  ;;  %v472_v59 = vld [vmem:[%s6322_s27 + $0xb8] sm:$0xff]  ;;  %v477_v42 = vld [vmem:[%s6322_s27 + $0xe0] sm:$0xff] }
  0x38   : > { %7795 = vst [vmem:[#allocation15_spill] sm:$0xff] %v6503_v49  ;;  %7796 = vst [vmem:[#allocation16_spill] sm:$0xff] %v6512_v57  ;;  %v7740_v4 = vmax.f32 %v6503_v49, 0.0  ;;  %v6523_v5 = vadd.f32 %v6327_v3, %v507_v52  ;;  %v509_v6 = vmul.f32 %v6320_v2, %v472_v59  ;;  %v7739_v10 = vmax.f32 %v6512_v57, 0.0 }
  0x39   : > { %v510_v14 = vmul.f32 %v6320_v2, %v473_v62  ;;  %v511_v26 = vmul.f32 %v6320_v2, %v474_v15  ;;  %v512_v36 = vmul.f32 %v6320_v2, %v475_v16  ;;  %v514_v62 = vmul.f32 %v6320_v2, %v477_v42  ;;  %v1025_v16 = vld [vmem:[%s6347_s14 + $0xd8] sm:$0xff] }
  0x3a   : > { %5317 = vmatmul.mubr.msk.f32.gmra.mrb[6].mxu0 %vm584_vm1, %v7752_v50  ;;  %1070 = vperm.xlu1 %6066, %v1006_v63   ;;  %v1013_v63 = vld [vmem:[%s6347_s14 + $0x78] sm:$0xff]  ;;  %7797 = vst [vmem:[#allocation17_spill] sm:$0xff] %v6523_v5  ;;  %v7738_v21 = vmax.f32 %v6523_v5, 0.0 }
  0x3b   : > { %5319 = vmatprep.mubr.msk.f32.mxu0 %vm584_vm1, %v7751_v54  ;;  %1065 = vperm.xlu0 %6065, %v1005_v7   ;;  %v1016_v7 = vld [vmem:[%s6347_s14 + $0x90] sm:$0xff]  ;;  %v6572_v59 = vadd.f32 %v6327_v3, %v512_v36 }
  0x3d   : > { %7802 = vst [vmem:[#allocation22_spill] sm:$0xff] %v6572_v59 }
  0x3e   : > { %5320 = vmatmul.mubr.msk.f32.gmra.mrb[8].mxu0 %vm584_vm1, %v7750_v60  ;;  %1080 = vperm.xlu1 %6066, %v1008_v11   ;;  %v6532_v11 = vadd.f32 %v6327_v3, %v508_v58 }
  0x3f   : > { %5322 = vmatprep.mubr.msk.f32.mxu0 %vm584_vm1, %v7749_v0  ;;  %1075 = vperm.xlu0 %6065, %v1007_v17   ;;  %v1015_v17 = vld [vmem:[%s6347_s14 + $0x88] sm:$0xff] }
  0x40   : > { %7798 = vst [vmem:[#allocation18_spill] sm:$0xff] %v6532_v11  ;;  %v7737_v28 = vmax.f32 %v6532_v11, 0.0 }
  0x42   : > { %5323 = vmatmul.mubr.msk.f32.gmra.mrb[10].mxu0 %vm584_vm1, %v7748_v8  ;;  %1090 = vperm.xlu1 %6066, %v1010_v22   ;;  %v6543_v22 = vadd.f32 %v6327_v3, %v509_v6  ;;  %v1019_v6 = vld [vmem:[%s6347_s14 + $0xa8] sm:$0xff]  ;;  %v6688_v8 = vld [vmem:[%s7721_s6] ss:$0 sm:$0xff] }
  0x43   : > { %5325 = vmatprep.mubr.msk.f32.mxu0 %vm584_vm1, %v7747_v12  ;;  %1085 = vperm.xlu0 %6065, %v1009_v29   ;;  %v6552_v29 = vadd.f32 %v6327_v3, %v510_v14 }
  0x44   : > { %7799 = vst [vmem:[#allocation19_spill] sm:$0xff] %v6543_v22  ;;  %v7736_v46 = vmax.f32 %v6543_v22, 0.0 }
  0x45   : > { %7800 = vst [vmem:[#allocation20_spill] sm:$0xff] %v6552_v29  ;;  %v7735_v58 = vmax.f32 %v6552_v29, 0.0 }
  0x46   : > { %5326 = vmatmul.mubr.msk.f32.gmra.mrb[12].mxu0 %vm584_vm1, %v7746_v18  ;;  %1100 = vperm.xlu1 %6066, %v1012_v37   ;;  %v476_v37 = vld [vmem:[%s6322_s27 + $0xd8] sm:$0xff] }
  0x47   : > { %5328 = vmatprep.mubr.msk.f32.mxu0 %vm584_vm1, %v7745_v23  ;;  %1095 = vperm.xlu0 %6065, %v1011_v47   ;;  %v6563_v47 = vadd.f32 %v6327_v3, %v511_v26  ;;  %v513_v52 = vmul.f32 %v6320_v2, %v476_v37  ;;  %v551_v26 = vadd.f32 %v6327_v3, %v514_v62  ;;  %v999_v37 = vld [vmem:[%s6347_s14 + $0x8] sm:$0xff]  ;;  %v1026_v62 = vld [vmem:[%s6347_s14 + $0xe0] sm:$0xff] }
  0x49   : > { %7801 = vst [vmem:[#allocation21_spill] sm:$0xff] %v6563_v47  ;;  %v550_v14 = vadd.f32 %v6327_v3, %v513_v52  ;;  %v581_v42 = vmax.f32 %v551_v26, 0.0  ;;  %v6620_v26 = vld [vmem:[%s7722_s7 + $0x8] sm:$0xf] }
  0x4a   : > { %5329 = vmatmul.mubr.msk.f32.gmra.mrb[14].mxu0 %vm584_vm1, %v7744_v32  ;;  %1110 = vperm.xlu1 %6066, %v1014_v53   ;;  %v1023_v53 = vld [vmem:[%s6347_s14 + $0xc8] sm:$0xff]  ;;  %v6679_v32 = vld [vmem:[%s7720_s5] ss:$0 sm:$0xff] }
  0x4b   : > { %5331 = vmatprep.mubr.msk.f32.mxu0 %vm584_vm1, %v7743_v38  ;;  %1105 = vperm.xlu0 %6065, %v1013_v63   ;;  %v478_v63 = vld [vmem:[%s6322_s27 + $0xe8] sm:$0xff]  ;;  %v580_v36 = vmax.f32 %v550_v14, 0.0 }
  0x4c   : > { %v515_v15 = vmul.f32 %v6320_v2, %v478_v63  ;;  %v1289_v63 = vld [vmem:[%s7722_s7 + $0x4] sm:$0xf]  ;;  %5770 = vmatprep.subr.msk.mxu1 %vm675_vm0, %v6620_v26 }
  0x4d   : > { %5352 = vmatprep.subr.msk.mxu0 %vm675_vm0, %v1289_v63  ;;  %5771 = vmatpush3.msk.msra.mxu1 %vm675_vm0, %v6620_v26 }
  0x4e   : > { %5332 = vmatmul.mubr.msk.f32.gmra.mrb[16].mxu0 %vm584_vm1, %v7742_v48  ;;  %1120 = vperm.xlu1 %6066, %v1016_v7   ;;  %v7734_v7 = vmax.f32 %v6563_v47, 0.0  ;;  %v552_v2 = vadd.f32 %v6327_v3, %v515_v15  ;;  %v6164_v3 = vmov 0.0  }
  0x4f   : > { %5334 = vmatprep.mubr.msk.f32.mxu0 %vm584_vm1, %v7741_v56  ;;  %1115 = vperm.xlu0 %6065, %v1015_v17   ;;  %v7733_v17 = vmax.f32 %v6572_v59, 0.0  ;;  %1208 = vst.msk [vmem:[#allocation2] sm:$0xff] %vm584_vm1, %v6164_v3  ;;  %1239 = vst.msk [vmem:[#allocation2 + $0xf8] sm:$0xff] %vm584_vm1, %v6164_v3 }
  0x50   : > { %v582_v52 = vmax.f32 %v552_v2, 0.0  ;;  %5353 = vmatpush3.msk.msra.mxu0 %vm675_vm0, %v1289_v63  ;;  %v6638_v2 = vld [vmem:[%s7722_s7 + $0xc] sm:$0xf] }
  0x51   : > { %5466 = vmatprep.subr.msk.mxu1 %vm675_vm0, %v6638_v2 }
  0x52   : > { %5335 = vmatmul.mubr.msk.f32.gmra.mrb[18].mxu0 %vm584_vm1, %v7740_v4  ;;  %1130 = vperm.xlu1 %6066, %v1018_v27   ;;  %v1024_v27 = vld [vmem:[%s6347_s14 + $0xd0] sm:$0xff] }
  0x53   : > { %5337 = vmatprep.mubr.msk.f32.mxu0 %vm584_vm1, %v7739_v10  ;;  %1125 = vperm.xlu0 %6065, %v1017_v43   ;;  %v998_v43 = vld [vmem:[%s6347_s14] sm:$0xff] }
  0x56   : > { %5338 = vmatmul.mubr.msk.f32.gmra.mrb[20].mxu0 %vm584_vm1, %v7738_v21  ;;  %1155 = vperm.xlu1 %6066, %v1023_v53   ;;  %v1027_v53 = vld [vmem:[%s6347_s14 + $0xe8] sm:$0xff]  ;;  %s4557_s14 = sadd.s32 %s4998_s4, %s4994_s23  ;;  %s6073_s4 = scalar_lea.vmem %s6072_s20, 4096 }
  0x57   : > { %5340 = vmatprep.mubr.msk.f32.mxu0 %vm584_vm1, %v7737_v28  ;;  %1135 = vperm.xlu0 %6065, %v1019_v6   ;;  %s4995_s27 = sshll.u32 %s4557_s14, 7  ;;  %p6075_p5 = scmp.lt.s32.totalorder %s6073_s4, %s6067_s26 }
  0x58   : > { %s7653_s30 = scalar_lea.hbm %s7727_s12, %s4995_s27 }
  0x59   : > { %p6076_p6 = por %p6075_p5, %p6074_p4 }
  0x5a   : > { %5341 = vmatmul.mubr.msk.f32.gmra.mrb[22].mxu0 %vm584_vm1, %v7736_v46  ;;  %1165 = vperm.xlu1 %6066, %v1025_v16  }
  0x5b   : > { %5343 = vmatprep.mubr.msk.f32.mxu0 %vm584_vm1, %v7735_v58  ;;  %1160 = vperm.xlu0 %6065, %v1024_v27   ;;  %v6627_v27 = vld [vmem:[%s7722_s7] sm:$0xf]  ;;  %p6077_p7 = pnand %p6076_p6, %p6070_p2 }
  0x5c   : > { %5390 = vmatprep.subr.msk.mxu0 %vm675_vm0, %v6627_v27 }
  0x5e   : > { %5344 = vmatmul.mubr.msk.f32.gmra.mrb[24].mxu0 %vm584_vm1, %v7734_v7  ;;  %1035 = vperm.xlu1 %6066, %v999_v37  }
  0x5f   : > { %5346 = vmatprep.mubr.msk.f32.mxu0 %vm584_vm1, %v7733_v17  ;;  %1030 = vperm.xlu0 %6065, %v998_v43  }
  0x62   : > { %5347 = vmatmul.mubr.msk.f32.gmra.mrb[26].mxu0 %vm584_vm1, %v580_v36  ;;  %1175 = vperm.xlu1 %6066, %v1027_v53  }
  0x63   : > { %5349 = vmatprep.mubr.msk.f32.mxu0 %vm584_vm1, %v581_v42  ;;  %1170 = vperm.xlu0 %6065, %v1026_v62  }
  0x66   : > { %5350 = vmatmul.mubr.msk.f32.gmra.mrb[28].mxu0 %vm584_vm1, %v582_v52 }
  0xa9   : > { %v6611_v6 = vpop.permute.xlu1 %1150 }
  0xaa   : > { %v6613_v14 = vpop.permute.xlu0 %1140 }
  0xad   : > { %v1041_v15 = vpop.permute.xlu1 %1040 }
  0xae   : > { %v6615_v16 = vpop.permute.xlu0 %1145 }
  0xb1   : > { %v6633_v36 = vpop.permute.xlu1 %1050 }
  0xb2   : > { %v1046_v37 = vpop.permute.xlu0 %1045 }
  0xb5   : > { %v6642_v42 = vpop.permute.xlu1 %1060 }
  0xb6   : > { %v1056_v43 = vpop.permute.xlu0 %1055 }
  0xb9   : > { %v6644_v52 = vpop.permute.xlu1 %1070 }
  0xba   : > { %v6646_v53 = vpop.permute.xlu0 %1065 }
  0xbd   : > { %v6648_v62 = vpop.permute.xlu1 %1080 }
  0xbe   : > { %v6650_v3 = vpop.permute.xlu0 %1075 }
  0xc1   : > { %v6652_v63 = vpop.permute.xlu1 %1090 }
  0xc2   : > { %v6654_v17 = vpop.permute.xlu0 %1085 }
  0xc5   : > { %v6656_v7 = vpop.permute.xlu1 %1100 }
  0xc6   : > { %v6658_v58 = vpop.permute.xlu0 %1095 }
  0xc9   : > { %v6660_v46 = vpop.permute.xlu1 %1110 }
  0xca   : > { %v6662_v28 = vpop.permute.xlu0 %1105 }
  0xcd   : > { %v6664_v21 = vpop.permute.xlu1 %1120 }
  0xce   : > { %v6666_v10 = vpop.permute.xlu0 %1115 }
  0xd1   : > { %v6668_v4 = vpop.permute.xlu1 %1130 }
  0xd2   : > { %v6670_v56 = vpop.permute.xlu0 %1125 }
  0xd5   : > { %v6672_v48 = vpop.permute.xlu1 %1155 }
  0xd6   : > { %v6674_v38 = vpop.permute.xlu0 %1135 }
  0xd9   : > { %v6681_v23 = vpop.permute.xlu1 %1165 }
  0xda   : > { %v6683_v18 = vpop.permute.xlu0 %1160 }
  0xdd   : > { %v1036_v34 = vpop.permute.xlu1 %1035 }
  0xde   : > { %v1031_v29 = vpop.permute.xlu0 %1030 }
 0x101   : > { %v5309_v12 = vpop.f32.mrb[0].mxu0 }
 0x102   : > { %v902_v0 = vmul.f32 %v5309_v12, %v6679_v32  ;;  %v745_v60 = vpop.f32.mrb[1].mxu0 }
 0x103   : > { %v901_v54 = vmul.f32 %v6679_v32, %v745_v60 }
 0x104   : > { %v939_v50 = vadd.f32 %v6688_v8, %v902_v0 }
 0x105   : > { %v938_v44 = vadd.f32 %v6688_v8, %v901_v54  ;;  %v5312_v40 = vpop.f32.mrb[2].mxu0 }
 0x106   : > { %v904_v30 = vmul.f32 %v5312_v40, %v6679_v32  ;;  %v755_v59 = vpop.f32.mrb[3].mxu0  ;;  %v969_v47 = vmax.f32 %v939_v50, 0.0 }
 0x107   : > { %v903_v22 = vmul.f32 %v6679_v32, %v755_v59  ;;  %v968_v11 = vmax.f32 %v938_v44, 0.0 }
 0x108   : > { %v941_v5 = vadd.f32 %v6688_v8, %v904_v30  ;;  %v1179_v12 = vmul.f32 %v1036_v34, %v969_v47 }
 0x109   : > { %v940_v57 = vadd.f32 %v6688_v8, %v903_v22  ;;  %v1178_v60 = vmul.f32 %v1031_v29, %v968_v11  ;;  %v5315_v49 = vpop.f32.mrb[4].mxu0 }
 0x10a   : > { %v971_v0 = vmax.f32 %v941_v5, 0.0  ;;  %1210 = vst.msk [vmem:[#allocation2 + $0x10] sm:$0xff] %vm584_vm1, %v1179_v12  ;;  %v906_v54 = vmul.f32 %v5315_v49, %v6679_v32  ;;  %v765_v39 = vpop.f32.mrb[5].mxu0 }
 0x10b   : > { %v970_v40 = vmax.f32 %v940_v57, 0.0  ;;  %1209 = vst.msk [vmem:[#allocation2 + $0x8] sm:$0xff] %vm584_vm1, %v1178_v60  ;;  %v905_v50 = vmul.f32 %v6679_v32, %v765_v39 }
 0x10c   : > { %v1181_v59 = vmul.f32 %v1046_v37, %v971_v0  ;;  %v943_v44 = vadd.f32 %v6688_v8, %v906_v54 }
 0x10d   : > { %v1180_v30 = vmul.f32 %v1041_v15, %v970_v40  ;;  %v942_v34 = vadd.f32 %v6688_v8, %v905_v50  ;;  %v5318_v22 = vpop.f32.mrb[6].mxu0 }
 0x10e   : > { %1212 = vst.msk [vmem:[#allocation2 + $0x20] sm:$0xff] %vm584_vm1, %v1181_v59  ;;  %v973_v5 = vmax.f32 %v943_v44, 0.0  ;;  %v908_v11 = vmul.f32 %v5318_v22, %v6679_v32  ;;  %v775_v29 = vpop.f32.mrb[7].mxu0 }
 0x10f   : > { %1211 = vst.msk [vmem:[#allocation2 + $0x18] sm:$0xff] %vm584_vm1, %v1180_v30  ;;  %v972_v49 = vmax.f32 %v942_v34, 0.0  ;;  %v907_v57 = vmul.f32 %v6679_v32, %v775_v29 }
 0x110   : > { %v1183_v47 = vmul.f32 %v1056_v43, %v973_v5  ;;  %v945_v39 = vadd.f32 %v6688_v8, %v908_v11 }
 0x111   : > { %v1182_v37 = vmul.f32 %v6633_v36, %v972_v49  ;;  %v944_v15 = vadd.f32 %v6688_v8, %v907_v57  ;;  %v5321_v12 = vpop.f32.mrb[8].mxu0  ;;  %v1266_v43 = vld [vmem:[#allocation2 + $0x10] sm:$0xff] }
 0x112   : > { %1214 = vst.msk [vmem:[#allocation2 + $0x30] sm:$0xff] %vm584_vm1, %v1183_v47  ;;  %v975_v60 = vmax.f32 %v945_v39, 0.0  ;;  %v910_v0 = vmul.f32 %v5321_v12, %v6679_v32  ;;  %v785_v54 = vpop.f32.mrb[9].mxu0  ;;  %v1265_v40 = vld [vmem:[#allocation2 + $0x8] sm:$0xff] }
 0x113   : > { %1213 = vst.msk [vmem:[#allocation2 + $0x28] sm:$0xff] %vm584_vm1, %v1182_v37  ;;  %v974_v50 = vmax.f32 %v944_v15, 0.0  ;;  %v909_v59 = vmul.f32 %v6679_v32, %v785_v54  ;;  %5354 = vmatprep.mubr.msk.f32.mxu0 %vm584_vm1, %v1265_v40 }
 0x114   : > { %v1185_v36 = vmul.f32 %v6646_v53, %v975_v60  ;;  %v947_v44 = vadd.f32 %v6688_v8, %v910_v0  ;;  %5355 = vmatmul.mubr.msk.f32.vlgmr.msra.gmra.mrb[30].mxu0 %vm584_vm1, %v1266_v43 }
 0x115   : > { %v1184_v30 = vmul.f32 %v6642_v42, %v974_v50  ;;  %v946_v34 = vadd.f32 %v6688_v8, %v909_v59  ;;  %v5324_v22 = vpop.f32.mrb[10].mxu0  ;;  %5391 = vmatpush3.msk.msra.mxu0 %vm675_vm0, %v6627_v27  ;;  %v6730_v57 = vld [vmem:[#allocation2 + $0x20] sm:$0xff] }
 0x116   : > { %1216 = vst.msk [vmem:[#allocation2 + $0x40] sm:$0xff] %vm584_vm1, %v1185_v36  ;;  %v977_v5 = vmax.f32 %v947_v44, 0.0  ;;  %v912_v11 = vmul.f32 %v5324_v22, %v6679_v32  ;;  %v795_v29 = vpop.f32.mrb[11].mxu0  ;;  %v1267_v49 = vld [vmem:[#allocation2 + $0x18] sm:$0xff]  ;;  %5428 = vmatprep.subr.msk.mxu0 %vm675_vm0, %v6620_v26 }
 0x117   : > { %1215 = vst.msk [vmem:[#allocation2 + $0x38] sm:$0xff] %vm584_vm1, %v1184_v30  ;;  %v976_v53 = vmax.f32 %v946_v34, 0.0  ;;  %v911_v42 = vmul.f32 %v6679_v32, %v795_v29  ;;  %5357 = vmatprep.mubr.msk.f32.mxu0 %vm584_vm1, %v1267_v49 }
 0x118   : > { %v1187_v27 = vmul.f32 %v6650_v3, %v977_v5  ;;  %v949_v47 = vadd.f32 %v6688_v8, %v912_v11  ;;  %5358 = vmatmul.mubr.msk.f32.gmra.mrb[32].mxu0 %vm584_vm1, %v6730_v57 }
 0x119   : > { %v1186_v39 = vmul.f32 %v6644_v52, %v976_v53  ;;  %v948_v37 = vadd.f32 %v6688_v8, %v911_v42  ;;  %v5327_v15 = vpop.f32.mrb[12].mxu0  ;;  %v6746_v52 = vld [vmem:[#allocation2 + $0x30] sm:$0xff] }
 0x11a   : > { %1218 = vst.msk [vmem:[#allocation2 + $0x50] sm:$0xff] %vm584_vm1, %v1187_v27  ;;  %v979_v12 = vmax.f32 %v949_v47, 0.0  ;;  %v914_v60 = vmul.f32 %v5327_v15, %v6679_v32  ;;  %v805_v0 = vpop.f32.mrb[13].mxu0  ;;  %v6740_v54 = vld [vmem:[#allocation2 + $0x28] sm:$0xff] }
 0x11b   : > { %1217 = vst.msk [vmem:[#allocation2 + $0x48] sm:$0xff] %vm584_vm1, %v1186_v39  ;;  %v978_v3 = vmax.f32 %v948_v37, 0.0  ;;  %v913_v40 = vmul.f32 %v6679_v32, %v805_v0  ;;  %5360 = vmatprep.mubr.msk.f32.mxu0 %vm584_vm1, %v6740_v54 }
 0x11c   : > { %v1189_v50 = vmul.f32 %v6654_v17, %v979_v12  ;;  %v951_v59 = vadd.f32 %v6688_v8, %v914_v60  ;;  %5361 = vmatmul.mubr.msk.f32.gmra.mrb[34].mxu0 %vm584_vm1, %v6746_v52 }
 0x11d   : > { %v1188_v43 = vmul.f32 %v6648_v62, %v978_v3  ;;  %v950_v36 = vadd.f32 %v6688_v8, %v913_v40  ;;  %v5330_v44 = vpop.f32.mrb[14].mxu0  ;;  %v6762_v62 = vld [vmem:[#allocation2 + $0x40] sm:$0xff] }
 0x11e   : > { %1220 = vst.msk [vmem:[#allocation2 + $0x60] sm:$0xff] %vm584_vm1, %v1189_v50  ;;  %v981_v30 = vmax.f32 %v951_v59, 0.0  ;;  %v916_v34 = vmul.f32 %v5330_v44, %v6679_v32  ;;  %v815_v22 = vpop.f32.mrb[15].mxu0  ;;  %v6756_v5 = vld [vmem:[#allocation2 + $0x38] sm:$0xff] }
 0x11f   : > { %1219 = vst.msk [vmem:[#allocation2 + $0x58] sm:$0xff] %vm584_vm1, %v1188_v43  ;;  %v980_v17 = vmax.f32 %v950_v36, 0.0  ;;  %v915_v11 = vmul.f32 %v6679_v32, %v815_v22  ;;  %5363 = vmatprep.mubr.msk.f32.mxu0 %vm584_vm1, %v6756_v5 }
 0x120   : > { %v1191_v29 = vmul.f32 %v6658_v58, %v981_v30  ;;  %v953_v49 = vadd.f32 %v6688_v8, %v916_v34  ;;  %5364 = vmatmul.mubr.msk.f32.gmra.mrb[36].mxu0 %vm584_vm1, %v6762_v62 }
 0x121   : > { %v1190_v53 = vmul.f32 %v6652_v63, %v980_v17  ;;  %v952_v42 = vadd.f32 %v6688_v8, %v915_v11  ;;  %v5333_v27 = vpop.f32.mrb[16].mxu0  ;;  %v6778_v63 = vld [vmem:[#allocation2 + $0x50] sm:$0xff] }
 0x122   : > { %1222 = vst.msk [vmem:[#allocation2 + $0x70] sm:$0xff] %vm584_vm1, %v1191_v29  ;;  %v983_v47 = vmax.f32 %v953_v49, 0.0  ;;  %v918_v39 = vmul.f32 %v5333_v27, %v6679_v32  ;;  %v825_v37 = vpop.f32.mrb[17].mxu0  ;;  %v6772_v15 = vld [vmem:[#allocation2 + $0x48] sm:$0xff]  ;;  %7803 = vst [vmem:[#allocation23_spill] sm:$0xff] %v6778_v63 }
 0x123   : > { %1221 = vst.msk [vmem:[#allocation2 + $0x68] sm:$0xff] %vm584_vm1, %v1190_v53  ;;  %v982_v58 = vmax.f32 %v952_v42, 0.0  ;;  %v917_v12 = vmul.f32 %v6679_v32, %v825_v37  ;;  %5366 = vmatprep.mubr.msk.f32.mxu0 %vm584_vm1, %v6772_v15 }
 0x124   : > { %v1193_v60 = vmul.f32 %v6662_v28, %v983_v47  ;;  %v955_v0 = vadd.f32 %v6688_v8, %v918_v39  ;;  %5367 = vmatmul.mubr.msk.f32.gmra.mrb[38].mxu0 %vm584_vm1, %v6778_v63 }
 0x125   : > { %v1192_v3 = vmul.f32 %v6656_v7, %v982_v58  ;;  %v954_v40 = vadd.f32 %v6688_v8, %v917_v12  ;;  %v5336_v50 = vpop.f32.mrb[18].mxu0  ;;  %v6794_v7 = vld [vmem:[#allocation2 + $0x60] sm:$0xff] }
 0x126   : > { %1224 = vst.msk [vmem:[#allocation2 + $0x80] sm:$0xff] %vm584_vm1, %v1193_v60  ;;  %v985_v59 = vmax.f32 %v955_v0, 0.0  ;;  %v920_v43 = vmul.f32 %v5336_v50, %v6679_v32  ;;  %v835_v36 = vpop.f32.mrb[19].mxu0  ;;  %v6788_v44 = vld [vmem:[#allocation2 + $0x58] sm:$0xff]  ;;  %7805 = vst [vmem:[#allocation25_spill] sm:$0xff] %v6794_v7 }
 0x127   : > { %7804 = vst [vmem:[#allocation24_spill] sm:$0xff] %v6788_v44  ;;  %1223 = vst.msk [vmem:[#allocation2 + $0x78] sm:$0xff] %vm584_vm1, %v1192_v3  ;;  %v984_v28 = vmax.f32 %v954_v40, 0.0  ;;  %v919_v30 = vmul.f32 %v6679_v32, %v835_v36  ;;  %5369 = vmatprep.mubr.msk.f32.mxu0 %vm584_vm1, %v6788_v44  ;;  %v7102_v33 = vld [vmem:[#allocation2 + $0x59] sm:$0xff] }
 0x128   : > { %v1195_v34 = vmul.f32 %v6666_v10, %v985_v59  ;;  %v957_v22 = vadd.f32 %v6688_v8, %v920_v43  ;;  %5370 = vmatmul.mubr.msk.f32.gmra.mrb[40].mxu0 %vm584_vm1, %v6794_v7 }
 0x129   : > { %v1194_v17 = vmul.f32 %v6660_v46, %v984_v28  ;;  %v956_v11 = vadd.f32 %v6688_v8, %v919_v30  ;;  %v5339_v29 = vpop.f32.mrb[20].mxu0  ;;  %v6810_v46 = vld [vmem:[#allocation2 + $0x70] sm:$0xff] }
 0x12a   : > { %1226 = vst.msk [vmem:[#allocation2 + $0x90] sm:$0xff] %vm584_vm1, %v1195_v34  ;;  %v987_v49 = vmax.f32 %v957_v22, 0.0  ;;  %v922_v53 = vmul.f32 %v5339_v29, %v6679_v32  ;;  %v845_v42 = vpop.f32.mrb[21].mxu0  ;;  %v6804_v27 = vld [vmem:[#allocation2 + $0x68] sm:$0xff]  ;;  %7807 = vst [vmem:[#allocation27_spill] sm:$0xff] %v6810_v46 }
 0x12b   : > { %7806 = vst [vmem:[#allocation26_spill] sm:$0xff] %v6804_v27  ;;  %1225 = vst.msk [vmem:[#allocation2 + $0x88] sm:$0xff] %vm584_vm1, %v1194_v17  ;;  %v986_v10 = vmax.f32 %v956_v11, 0.0  ;;  %v921_v47 = vmul.f32 %v6679_v32, %v845_v42  ;;  %5372 = vmatprep.mubr.msk.f32.mxu0 %vm584_vm1, %v6804_v27  ;;  %v7108_v24 = vld [vmem:[#allocation2 + $0x61] sm:$0xff] }
 0x12c   : > { %v1197_v39 = vmul.f32 %v6670_v56, %v987_v49  ;;  %v959_v37 = vadd.f32 %v6688_v8, %v922_v53  ;;  %5373 = vmatmul.mubr.msk.f32.gmra.mrb[42].mxu0 %vm584_vm1, %v6810_v46 }
 0x12d   : > { %v1196_v58 = vmul.f32 %v6664_v21, %v986_v10  ;;  %v958_v12 = vadd.f32 %v6688_v8, %v921_v47  ;;  %v5342_v60 = vpop.f32.mrb[22].mxu0  ;;  %v6826_v21 = vld [vmem:[#allocation2 + $0x80] sm:$0xff] }
 0x12e   : > { %1228 = vst.msk [vmem:[#allocation2 + $0xa0] sm:$0xff] %vm584_vm1, %v1197_v39  ;;  %v989_v0 = vmax.f32 %v959_v37, 0.0  ;;  %v924_v3 = vmul.f32 %v5342_v60, %v6679_v32  ;;  %v855_v40 = vpop.f32.mrb[23].mxu0  ;;  %v6820_v50 = vld [vmem:[#allocation2 + $0x78] sm:$0xff]  ;;  %7809 = vst [vmem:[#allocation29_spill] sm:$0xff] %v6826_v21 }
 0x12f   : > { %7808 = vst [vmem:[#allocation28_spill] sm:$0xff] %v6820_v50  ;;  %1227 = vst.msk [vmem:[#allocation2 + $0x98] sm:$0xff] %vm584_vm1, %v1196_v58  ;;  %v988_v56 = vmax.f32 %v958_v12, 0.0  ;;  %v923_v59 = vmul.f32 %v6679_v32, %v855_v40  ;;  %5375 = vmatprep.mubr.msk.f32.mxu0 %vm584_vm1, %v6820_v50 }
 0x130   : > { %v1199_v43 = vmul.f32 %v6674_v38, %v989_v0  ;;  %v961_v36 = vadd.f32 %v6688_v8, %v924_v3  ;;  %5376 = vmatmul.mubr.msk.f32.gmra.mrb[44].mxu0 %vm584_vm1, %v6826_v21 }
 0x131   : > { %v1198_v28 = vmul.f32 %v6668_v4, %v988_v56  ;;  %v960_v30 = vadd.f32 %v6688_v8, %v923_v59  ;;  %v5345_v34 = vpop.f32.mrb[24].mxu0  ;;  %v6842_v4 = vld [vmem:[#allocation2 + $0x90] sm:$0xff] }
 0x132   : > { %1230 = vst.msk [vmem:[#allocation2 + $0xb0] sm:$0xff] %vm584_vm1, %v1199_v43  ;;  %v991_v22 = vmax.f32 %v961_v36, 0.0  ;;  %v926_v17 = vmul.f32 %v5345_v34, %v6679_v32  ;;  %v865_v11 = vpop.f32.mrb[25].mxu0  ;;  %v6836_v29 = vld [vmem:[#allocation2 + $0x88] sm:$0xff]  ;;  %7811 = vst [vmem:[#allocation31_spill] sm:$0xff] %v6842_v4 }
 0x133   : > { %7810 = vst [vmem:[#allocation30_spill] sm:$0xff] %v6836_v29  ;;  %1229 = vst.msk [vmem:[#allocation2 + $0xa8] sm:$0xff] %vm584_vm1, %v1198_v28  ;;  %v990_v38 = vmax.f32 %v960_v30, 0.0  ;;  %v925_v49 = vmul.f32 %v6679_v32, %v865_v11  ;;  %5378 = vmatprep.mubr.msk.f32.mxu0 %vm584_vm1, %v6836_v29 }
 0x134   : > { %v1201_v53 = vmul.f32 %v6615_v16, %v991_v22  ;;  %v963_v42 = vadd.f32 %v6688_v8, %v926_v17  ;;  %5379 = vmatmul.mubr.msk.f32.gmra.mrb[46].mxu0 %vm584_vm1, %v6842_v4 }
 0x135   : > { %v1200_v10 = vmul.f32 %v6613_v14, %v990_v38  ;;  %v962_v47 = vadd.f32 %v6688_v8, %v925_v49  ;;  %v5348_v39 = vpop.f32.mrb[26].mxu0  ;;  %v6858_v14 = vld [vmem:[#allocation2 + $0xa0] sm:$0xff] }
 0x136   : > { %1232 = vst.msk [vmem:[#allocation2 + $0xc0] sm:$0xff] %vm584_vm1, %v1201_v53  ;;  %v993_v37 = vmax.f32 %v963_v42, 0.0  ;;  %v928_v58 = vmul.f32 %v5348_v39, %v6679_v32  ;;  %v875_v12 = vpop.f32.mrb[27].mxu0  ;;  %v6852_v60 = vld [vmem:[#allocation2 + $0x98] sm:$0xff]  ;;  %7813 = vst [vmem:[#allocation33_spill] sm:$0xff] %v6858_v14  ;;  %v1240_v39 = vld [vmem:[#allocation2 + $0x7] sm:$0xff] }
 0x137   : > { %7812 = vst [vmem:[#allocation32_spill] sm:$0xff] %v6852_v60  ;;  %1231 = vst.msk [vmem:[#allocation2 + $0xb8] sm:$0xff] %vm584_vm1, %v1200_v10  ;;  %v992_v16 = vmax.f32 %v962_v47, 0.0  ;;  %v927_v0 = vmul.f32 %v6679_v32, %v875_v12  ;;  %5381 = vmatprep.mubr.msk.f32.mxu0 %vm584_vm1, %v6852_v60  ;;  %v1176_v10 = vpop.permute.xlu1 %1175  ;;  %v1241_v12 = vld [vmem:[#allocation2 + $0xf] sm:$0xff] }
 0x138   : > { %v1203_v3 = vmul.f32 %v6672_v48, %v993_v37  ;;  %v965_v40 = vadd.f32 %v6688_v8, %v928_v58  ;;  %5382 = vmatmul.mubr.msk.f32.gmra.mrb[48].mxu0 %vm584_vm1, %v6858_v14 }
 0x139   : > { %v1202_v56 = vmul.f32 %v6611_v6, %v992_v16  ;;  %v964_v59 = vadd.f32 %v6688_v8, %v927_v0  ;;  %v5351_v43 = vpop.f32.mrb[28].mxu0  ;;  %v6874_v6 = vld [vmem:[#allocation2 + $0xb0] sm:$0xff]  ;;  %v2119_v0 = vld [vmem:[#allocation2 + $0x1f] sm:$0xff] }
 0x13a   : > { %1234 = vst.msk [vmem:[#allocation2 + $0xd0] sm:$0xff] %vm584_vm1, %v1203_v3  ;;  %v995_v36 = vmax.f32 %v965_v40, 0.0  ;;  %v930_v28 = vmul.f32 %v5351_v43, %v6679_v32  ;;  %v885_v30 = vpop.f32.mrb[29].mxu0  ;;  %v6868_v34 = vld [vmem:[#allocation2 + $0xa8] sm:$0xff]  ;;  %7815 = vst [vmem:[#allocation35_spill] sm:$0xff] %v6874_v6  ;;  %v1242_v3 = vld [vmem:[#allocation2 + $0x17] sm:$0xff] }
 0x13b   : > { %7814 = vst [vmem:[#allocation34_spill] sm:$0xff] %v6868_v34  ;;  %1233 = vst.msk [vmem:[#allocation2 + $0xc8] sm:$0xff] %vm584_vm1, %v1202_v56  ;;  %v994_v48 = vmax.f32 %v964_v59, 0.0  ;;  %v929_v22 = vmul.f32 %v6679_v32, %v885_v30  ;;  %5384 = vmatprep.mubr.msk.f32.mxu0 %vm584_vm1, %v6868_v34  ;;  %v2452_v16 = vld [vmem:[%s7722_s7 + $0x10] sm:$0xf]  ;;  %v2120_v40 = vld [vmem:[#allocation2 + $0x27] sm:$0xff] }
 0x13c   : > { %v1205_v17 = vmul.f32 %v6681_v23, %v995_v36  ;;  %v967_v11 = vadd.f32 %v6688_v8, %v930_v28  ;;  %5385 = vmatmul.mubr.msk.f32.gmra.mrb[50].mxu0 %vm584_vm1, %v6874_v6  ;;  %v2121_v56 = vld [vmem:[#allocation2 + $0x2f] sm:$0xff]  ;;  %v6924_v59 = vld [vmem:[#allocation2 + $0x37] sm:$0xff]  ;;  %v6937_v43 = vld [vmem:[#allocation2 + $0x47] sm:$0xff] }
 0x13d   : > { %v1204_v38 = vmul.f32 %v6683_v18, %v994_v48  ;;  %v966_v49 = vadd.f32 %v6688_v8, %v929_v22  ;;  %v6892_v18 = vld [vmem:[#allocation2 + $0xc0] sm:$0xff]  ;;  %v1171_v8 = vpop.permute.xlu0 %1170  ;;  %v6941_v36 = vld [vmem:[#allocation2 + $0x4f] sm:$0xff]  ;;  %v6949_v28 = vld [vmem:[#allocation2 + $0x57] sm:$0xff] }
 0x13e   : > { %1236 = vst.msk [vmem:[#allocation2 + $0xe0] sm:$0xff] %vm584_vm1, %v1205_v17  ;;  %v997_v53 = vmax.f32 %v967_v11, 0.0  ;;  %v6883_v32 = vld [vmem:[#allocation2 + $0xb8] sm:$0xff]  ;;  %v6961_v48 = vld [vmem:[#allocation2 + $0x67] sm:$0xff]  ;;  %v6965_v22 = vld [vmem:[#allocation2 + $0x6f] sm:$0xff] }
 0x13f   : > { %7816 = vst [vmem:[#allocation36_spill] sm:$0xff] %v6883_v32  ;;  %v6885_v42 = vld [vmem:[#allocation2 + $0xb9] sm:$0xff]  ;;  %1235 = vst.msk [vmem:[#allocation2 + $0xd8] sm:$0xff] %vm584_vm1, %v1204_v38  ;;  %v996_v23 = vmax.f32 %v966_v49, 0.0  ;;  %5387 = vmatprep.mubr.msk.f32.mxu0 %vm584_vm1, %v6883_v32  ;;  %v6985_v38 = vld [vmem:[#allocation2 + $0x87] sm:$0xff] }
 0x140   : > { %5463 = vmatprep.mubr.msk.f32.mxu1 %vm584_vm1, %v6885_v42  ;;  %v1207_v47 = vmul.f32 %v1176_v10, %v997_v53  ;;  %5388 = vmatmul.mubr.msk.f32.gmra.mrb[52].mxu0 %vm584_vm1, %v6892_v18  ;;  %v6953_v30 = vld [vmem:[#allocation2 + $0x5f] sm:$0xff]  ;;  %v6973_v17 = vld [vmem:[#allocation2 + $0x77] sm:$0xff]  ;;  %v6989_v49 = vld [vmem:[#allocation2 + $0x8f] sm:$0xff] }
 0x141   : > { %v1206_v37 = vmul.f32 %v1171_v8, %v996_v23  ;;  %5392 = vmatprep.mubr.msk.f32.mxu0 %vm584_vm1, %v1240_v39  ;;  %v6977_v11 = vld [vmem:[#allocation2 + $0x7f] sm:$0xff]  ;;  %v6997_v53 = vld [vmem:[#allocation2 + $0x97] sm:$0xff]  ;;  %v7009_v23 = vld [vmem:[#allocation2 + $0xa7] sm:$0xff] }
 0x142   : > { %1238 = vst.msk [vmem:[#allocation2 + $0xf0] sm:$0xff] %vm584_vm1, %v1207_v47  ;;  %v6898_v58 = vld [vmem:[#allocation2 + $0xc1] sm:$0xff]  ;;  %v7013_v8 = vld [vmem:[#allocation2 + $0xaf] sm:$0xff]  ;;  %v7021_v47 = vld [vmem:[#allocation2 + $0xb7] sm:$0xff] }
 0x143   : > { %1237 = vst.msk [vmem:[#allocation2 + $0xe8] sm:$0xff] %vm584_vm1, %v1206_v37  ;;  %5464 = vmatmul.mubr.msk.f32.vlgmr.msra.gmra.mrb[0].mxu1 %vm584_vm1, %v6898_v58  ;;  %v7001_v10 = vld [vmem:[#allocation2 + $0x9f] sm:$0xff]  ;;  %v7033_v37 = vld [vmem:[#allocation2 + $0xc7] sm:$0xff] }
 0x144   : > { %5467 = vmatpush3.msk.msra.mxu1 %vm675_vm0, %v6638_v2  ;;  %5393 = vmatmul.mubr.msk.f32.vlgmr.msra.gmra.mrb[30].mxu0 %vm584_vm1, %v1241_v12  ;;  %v6918_v2 = vld [vmem:[%s7722_s7 + $0x14] sm:$0xf]  ;;  %v7025_v39 = vld [vmem:[#allocation2 + $0xbf] sm:$0xff] }
 0x145   : > { %5468 = vmatprep.mubr.msk.f32.mxu1 %vm584_vm1, %v2119_v0  ;;  %5395 = vmatprep.mubr.msk.f32.mxu0 %vm584_vm1, %v1242_v3  ;;  %v7037_v12 = vld [vmem:[#allocation2 + $0xcf] sm:$0xff] }
 0x146   : > { %5504 = vmatprep.subr.msk.mxu1 %vm675_vm0, %v2452_v16  ;;  %5429 = vmatpush3.msk.msra.mxu0 %vm675_vm0, %v6620_v26  ;;  %v6930_v26 = vld [vmem:[#allocation2 + $0x3f] sm:$0xff]  ;;  %v1811_v3 = vld [vmem:[#allocation2 + $0x11] sm:$0xff] }
 0x147   : > { %5469 = vmatmul.mubr.msk.f32.vlgmr.msra.gmra.mrb[2].mxu1 %vm584_vm1, %v2120_v40 }
 0x148   : > { %5505 = vmatpush3.msk.msra.mxu1 %vm675_vm0, %v2452_v16  ;;  %5396 = vmatmul.mubr.msk.f32.gmra.mrb[32].mxu0 %vm584_vm1, %v2119_v0  ;;  %v1810_v16 = vld [vmem:[#allocation2 + $0x9] sm:$0xff]  ;;  %v7044_v0 = vld [vmem:[#allocation2 + $0xd7] sm:$0xff] }
 0x149   : > { %5471 = vmatprep.mubr.msk.f32.mxu1 %vm584_vm1, %v2121_v56  ;;  %5398 = vmatprep.mubr.msk.f32.mxu0 %vm584_vm1, %v2120_v40  ;;  %v1812_v40 = vld [vmem:[#allocation2 + $0x19] sm:$0xff] }
 0x14a   : > { %5542 = vmatprep.subr.msk.mxu1 %vm675_vm0, %v6918_v2 }
 0x14b   : > { %5472 = vmatmul.mubr.msk.f32.gmra.mrb[4].mxu1 %vm584_vm1, %v6924_v59 }
 0x14c   : > { %5399 = vmatmul.mubr.msk.f32.gmra.mrb[34].mxu0 %vm584_vm1, %v2121_v56  ;;  %5474 = vmatprep.mubr.msk.f32.mxu1 %vm584_vm1, %v6930_v26  ;;  %v7054_v56 = vld [vmem:[#allocation2 + $0x21] sm:$0xff] }
 0x14d   : > { %5401 = vmatprep.mubr.msk.f32.mxu0 %vm584_vm1, %v6924_v59 }
 0x14f   : > { %5475 = vmatmul.mubr.msk.f32.gmra.mrb[6].mxu1 %vm584_vm1, %v6937_v43 }
 0x150   : > { %5402 = vmatmul.mubr.msk.f32.gmra.mrb[36].mxu0 %vm584_vm1, %v6930_v26  ;;  %5477 = vmatprep.mubr.msk.f32.mxu1 %vm584_vm1, %v6941_v36 }
 0x151   : > { %5404 = vmatprep.mubr.msk.f32.mxu0 %vm584_vm1, %v6937_v43 }
 0x153   : > { %5478 = vmatmul.mubr.msk.f32.gmra.mrb[8].mxu1 %vm584_vm1, %v6949_v28 }
 0x154   : > { %5405 = vmatmul.mubr.msk.f32.gmra.mrb[38].mxu0 %vm584_vm1, %v6941_v36  ;;  %5480 = vmatprep.mubr.msk.f32.mxu1 %vm584_vm1, %v6953_v30 }
 0x155   : > { %5407 = vmatprep.mubr.msk.f32.mxu0 %vm584_vm1, %v6949_v28 }
 0x157   : > { %5481 = vmatmul.mubr.msk.f32.gmra.mrb[10].mxu1 %vm584_vm1, %v6961_v48 }
 0x158   : > { %5408 = vmatmul.mubr.msk.f32.gmra.mrb[40].mxu0 %vm584_vm1, %v6953_v30  ;;  %5483 = vmatprep.mubr.msk.f32.mxu1 %vm584_vm1, %v6965_v22 }
 0x159   : > { %5410 = vmatprep.mubr.msk.f32.mxu0 %vm584_vm1, %v6961_v48 }
 0x15b   : > { %5484 = vmatmul.mubr.msk.f32.gmra.mrb[12].mxu1 %vm584_vm1, %v6973_v17 }
 0x15c   : > { %5411 = vmatmul.mubr.msk.f32.gmra.mrb[42].mxu0 %vm584_vm1, %v6965_v22  ;;  %5486 = vmatprep.mubr.msk.f32.mxu1 %vm584_vm1, %v6977_v11 }
 0x15d   : > { %5413 = vmatprep.mubr.msk.f32.mxu0 %vm584_vm1, %v6973_v17 }
 0x15f   : > { %5487 = vmatmul.mubr.msk.f32.gmra.mrb[14].mxu1 %vm584_vm1, %v6985_v38 }
 0x160   : > { %5414 = vmatmul.mubr.msk.f32.gmra.mrb[44].mxu0 %vm584_vm1, %v6977_v11  ;;  %5489 = vmatprep.mubr.msk.f32.mxu1 %vm584_vm1, %v6989_v49 }
 0x161   : > { %5416 = vmatprep.mubr.msk.f32.mxu0 %vm584_vm1, %v6985_v38 }
 0x163   : > { %5490 = vmatmul.mubr.msk.f32.gmra.mrb[16].mxu1 %vm584_vm1, %v6997_v53 }
 0x164   : > { %5417 = vmatmul.mubr.msk.f32.gmra.mrb[46].mxu0 %vm584_vm1, %v6989_v49  ;;  %5492 = vmatprep.mubr.msk.f32.mxu1 %vm584_vm1, %v7001_v10 }
 0x165   : > { %5419 = vmatprep.mubr.msk.f32.mxu0 %vm584_vm1, %v6997_v53 }
 0x167   : > { %5493 = vmatmul.mubr.msk.f32.gmra.mrb[18].mxu1 %vm584_vm1, %v7009_v23 }
 0x168   : > { %5420 = vmatmul.mubr.msk.f32.gmra.mrb[48].mxu0 %vm584_vm1, %v7001_v10  ;;  %5495 = vmatprep.mubr.msk.f32.mxu1 %vm584_vm1, %v7013_v8 }
 0x169   : > { %5422 = vmatprep.mubr.msk.f32.mxu0 %vm584_vm1, %v7009_v23 }
 0x16b   : > { %5496 = vmatmul.mubr.msk.f32.gmra.mrb[20].mxu1 %vm584_vm1, %v7021_v47 }
 0x16c   : > { %5423 = vmatmul.mubr.msk.f32.gmra.mrb[50].mxu0 %vm584_vm1, %v7013_v8  ;;  %5498 = vmatprep.mubr.msk.f32.mxu1 %vm584_vm1, %v7025_v39 }
 0x16d   : > { %5425 = vmatprep.mubr.msk.f32.mxu0 %vm584_vm1, %v7021_v47 }
 0x16f   : > { %5499 = vmatmul.mubr.msk.f32.gmra.mrb[22].mxu1 %vm584_vm1, %v7033_v37 }
 0x170   : > { %5426 = vmatmul.mubr.msk.f32.gmra.mrb[52].mxu0 %vm584_vm1, %v7025_v39  ;;  %5501 = vmatprep.mubr.msk.f32.mxu1 %vm584_vm1, %v7037_v12 }
 0x171   : > { %5430 = vmatprep.mubr.msk.f32.mxu0 %vm584_vm1, %v1810_v16  ;;  %v7059_v16 = vld [vmem:[%s7722_s7 + $0x18] sm:$0xf] }
 0x173   : > { %5502 = vmatmul.mubr.msk.f32.gmra.mrb[0].mxu1 %vm584_vm1, %v7044_v0 }
 0x174   : > { %5431 = vmatmul.mubr.msk.f32.vlgmr.msra.gmra.mrb[30].mxu0 %vm584_vm1, %v1811_v3  ;;  %5506 = vmatprep.mubr.msk.f32.mxu1 %vm584_vm1, %v6730_v57  ;;  %v7065_v57 = vld [vmem:[#allocation2 + $0x29] sm:$0xff] }
 0x175   : > { %5433 = vmatprep.mubr.msk.f32.mxu0 %vm584_vm1, %v1812_v40  ;;  %v7090_v3 = vld [vmem:[#allocation2 + $0x49] sm:$0xff]  ;;  %v7096_v40 = vld [vmem:[#allocation2 + $0x51] sm:$0xff] }
 0x177   : > { %5507 = vmatmul.mubr.msk.f32.vlgmr.msra.gmra.mrb[2].mxu1 %vm584_vm1, %v6740_v54  ;;  %v1815_v54 = vld [vmem:[#allocation2 + $0x31] sm:$0xff] }
 0x178   : > { %5543 = vmatpush3.msk.msra.mxu1 %vm675_vm0, %v6918_v2  ;;  %5434 = vmatmul.mubr.msk.f32.gmra.mrb[32].mxu0 %vm584_vm1, %v7054_v56  ;;  %v7078_v2 = vld [vmem:[#allocation2 + $0x39] sm:$0xff] }
 0x179   : > { %5509 = vmatprep.mubr.msk.f32.mxu1 %vm584_vm1, %v6746_v52  ;;  %5436 = vmatprep.mubr.msk.f32.mxu0 %vm584_vm1, %v7065_v57  ;;  %v7084_v52 = vld [vmem:[#allocation2 + $0x41] sm:$0xff] }
 0x17a   : > { %5580 = vmatprep.subr.msk.mxu1 %vm675_vm0, %v7059_v16 }
 0x17b   : > { %5510 = vmatmul.mubr.msk.f32.gmra.mrb[4].mxu1 %vm584_vm1, %v6756_v5 }
 0x17c   : > { %5437 = vmatmul.mubr.msk.f32.gmra.mrb[34].mxu0 %vm584_vm1, %v1815_v54  ;;  %5512 = vmatprep.mubr.msk.f32.mxu1 %vm584_vm1, %v6762_v62 }
 0x17d   : > { %5439 = vmatprep.mubr.msk.f32.mxu0 %vm584_vm1, %v7078_v2 }
 0x17f   : > { %5513 = vmatmul.mubr.msk.f32.gmra.mrb[6].mxu1 %vm584_vm1, %v6772_v15 }
 0x180   : > { %5440 = vmatmul.mubr.msk.f32.gmra.mrb[36].mxu0 %vm584_vm1, %v7084_v52  ;;  %5515 = vmatprep.mubr.msk.f32.mxu1 %vm584_vm1, %v6778_v63  ;;  %v7181_v63 = vld [vmem:[#allocation2 + $0xd0] sm:$0xff] }
 0x181   : > { %5442 = vmatprep.mubr.msk.f32.mxu0 %vm584_vm1, %v7090_v3 }
 0x183   : > { %5516 = vmatmul.mubr.msk.f32.gmra.mrb[8].mxu1 %vm584_vm1, %v6788_v44  ;;  %v7114_v44 = vld [vmem:[#allocation2 + $0x69] sm:$0xff] }
 0x184   : > { %5443 = vmatmul.mubr.msk.f32.gmra.mrb[38].mxu0 %vm584_vm1, %v7096_v40  ;;  %5518 = vmatprep.mubr.msk.f32.mxu1 %vm584_vm1, %v6794_v7  ;;  %v7120_v7 = vld [vmem:[#allocation2 + $0x71] sm:$0xff] }
 0x185   : > { %5445 = vmatprep.mubr.msk.f32.mxu0 %vm584_vm1, %v7102_v33 }
 0x187   : > { %5519 = vmatmul.mubr.msk.f32.gmra.mrb[10].mxu1 %vm584_vm1, %v6804_v27  ;;  %v7126_v27 = vld [vmem:[#allocation2 + $0x79] sm:$0xff] }
 0x188   : > { %5446 = vmatmul.mubr.msk.f32.gmra.mrb[40].mxu0 %vm584_vm1, %v7108_v24  ;;  %5521 = vmatprep.mubr.msk.f32.mxu1 %vm584_vm1, %v6810_v46  ;;  %v7132_v46 = vld [vmem:[#allocation2 + $0x81] sm:$0xff] }
 0x189   : > { %5448 = vmatprep.mubr.msk.f32.mxu0 %vm584_vm1, %v7114_v44 }
 0x18b   : > { %5522 = vmatmul.mubr.msk.f32.gmra.mrb[12].mxu1 %vm584_vm1, %v6820_v50  ;;  %v7138_v50 = vld [vmem:[#allocation2 + $0x89] sm:$0xff] }
 0x18c   : > { %5449 = vmatmul.mubr.msk.f32.gmra.mrb[42].mxu0 %vm584_vm1, %v7120_v7  ;;  %5524 = vmatprep.mubr.msk.f32.mxu1 %vm584_vm1, %v6826_v21  ;;  %v7144_v21 = vld [vmem:[#allocation2 + $0x91] sm:$0xff] }
 0x18d   : > { %5451 = vmatprep.mubr.msk.f32.mxu0 %vm584_vm1, %v7126_v27 }
 0x18f   : > { %5525 = vmatmul.mubr.msk.f32.gmra.mrb[14].mxu1 %vm584_vm1, %v6836_v29  ;;  %v7150_v29 = vld [vmem:[#allocation2 + $0x99] sm:$0xff] }
 0x190   : > { %5452 = vmatmul.mubr.msk.f32.gmra.mrb[44].mxu0 %vm584_vm1, %v7132_v46  ;;  %5527 = vmatprep.mubr.msk.f32.mxu1 %vm584_vm1, %v6842_v4  ;;  %v7156_v4 = vld [vmem:[#allocation2 + $0xa1] sm:$0xff] }
 0x191   : > { %5454 = vmatprep.mubr.msk.f32.mxu0 %vm584_vm1, %v7138_v50 }
 0x193   : > { %5528 = vmatmul.mubr.msk.f32.gmra.mrb[16].mxu1 %vm584_vm1, %v6852_v60  ;;  %v7162_v60 = vld [vmem:[#allocation2 + $0xa9] sm:$0xff] }
 0x194   : > { %5455 = vmatmul.mubr.msk.f32.gmra.mrb[46].mxu0 %vm584_vm1, %v7144_v21  ;;  %5530 = vmatprep.mubr.msk.f32.mxu1 %vm584_vm1, %v6858_v14  ;;  %v7168_v14 = vld [vmem:[#allocation2 + $0xb1] sm:$0xff] }
 0x195   : > { %5457 = vmatprep.mubr.msk.f32.mxu0 %vm584_vm1, %v7150_v29 }
 0x197   : > { %5531 = vmatmul.mubr.msk.f32.gmra.mrb[18].mxu1 %vm584_vm1, %v6868_v34  ;;  %v7817_v34 = vmax.f32 %v6350_v19, 0.0  ;;  %v3379_v19 = vld [vmem:[%s7722_s7 + $0x1c] sm:$0xf] }
 0x198   : > { %5458 = vmatmul.mubr.msk.f32.gmra.mrb[48].mxu0 %vm584_vm1, %v7156_v4  ;;  %5533 = vmatprep.mubr.msk.f32.mxu1 %vm584_vm1, %v6874_v6  ;;  %v7177_v6 = vld [vmem:[#allocation2 + $0xc8] sm:$0xff] }
 0x199   : > { %5460 = vmatprep.mubr.msk.f32.mxu0 %vm584_vm1, %v7162_v60 }
 0x19b   : > { %5534 = vmatmul.mubr.msk.f32.gmra.mrb[20].mxu1 %vm584_vm1, %v6883_v32  ;;  %v7185_v32 = vld [vmem:[#allocation2 + $0xd8] sm:$0xff] }
 0x19c   : > { %5461 = vmatmul.mubr.msk.f32.gmra.mrb[50].mxu0 %vm584_vm1, %v7168_v14  ;;  %5536 = vmatprep.mubr.msk.f32.mxu1 %vm584_vm1, %v6892_v18 }
 0x19d   : > { %5696 = vmatprep.mubr.msk.f32.mxu0 %vm584_vm1, %v7817_v34  ;;  %v7236_v34 = vld [vmem:[#allocation2 + $0xc9] sm:$0xff] }
 0x19f   : > { %5537 = vmatmul.mubr.msk.f32.gmra.mrb[22].mxu1 %vm584_vm1, %v7177_v6 }
 0x1a0   : > { %5539 = vmatprep.mubr.msk.f32.mxu1 %vm584_vm1, %v7181_v63 }
 0x1a3   : > { %5540 = vmatmul.mubr.msk.f32.gmra.mrb[0].mxu1 %vm584_vm1, %v7185_v32 }
 0x1a4   : > { %5544 = vmatprep.mubr.msk.f32.mxu1 %vm584_vm1, %v7054_v56  ;;  %v7240_v56 = vld [vmem:[#allocation2 + $0xd1] sm:$0xff] }
 0x1a7   : > { %5545 = vmatmul.mubr.msk.f32.vlgmr.msra.gmra.mrb[2].mxu1 %vm584_vm1, %v7065_v57  ;;  %v3688_v57 = vld [vmem:[%s7722_s7 + $0x20] sm:$0xf] }
 0x1a8   : > { %5581 = vmatpush3.msk.msra.mxu1 %vm675_vm0, %v7059_v16  ;;  %5547 = vmatprep.mubr.msk.f32.mxu1 %vm584_vm1, %v1815_v54  ;;  %v7244_v16 = vld [vmem:[#allocation2 + $0xd9] sm:$0xff]  ;;  %v7849_v54 = vld [vmem:[#allocation30_spill] sm:$0xff] }
 0x1a9   : > { %5618 = vmatprep.subr.msk.mxu1 %vm675_vm0, %v3379_v19 }
 0x1ab   : > { %5548 = vmatmul.mubr.msk.f32.gmra.mrb[4].mxu1 %vm584_vm1, %v7078_v2 }
 0x1ac   : > { %5550 = vmatprep.mubr.msk.f32.mxu1 %vm584_vm1, %v7084_v52 }
 0x1af   : > { %5551 = vmatmul.mubr.msk.f32.gmra.mrb[6].mxu1 %vm584_vm1, %v7090_v3 }
 0x1b0   : > { %5553 = vmatprep.mubr.msk.f32.mxu1 %vm584_vm1, %v7096_v40 }
 0x1b3   : > { %5554 = vmatmul.mubr.msk.f32.gmra.mrb[8].mxu1 %vm584_vm1, %v7102_v33 }
 0x1b4   : > { %5556 = vmatprep.mubr.msk.f32.mxu1 %vm584_vm1, %v7108_v24 }
 0x1b7   : > { %5557 = vmatmul.mubr.msk.f32.gmra.mrb[10].mxu1 %vm584_vm1, %v7114_v44 }
 0x1b8   : > { %5559 = vmatprep.mubr.msk.f32.mxu1 %vm584_vm1, %v7120_v7 }
 0x1bb   : > { %5560 = vmatmul.mubr.msk.f32.gmra.mrb[12].mxu1 %vm584_vm1, %v7126_v27 }
 0x1bc   : > { %5562 = vmatprep.mubr.msk.f32.mxu1 %vm584_vm1, %v7132_v46 }
 0x1bf   : > { %5563 = vmatmul.mubr.msk.f32.gmra.mrb[14].mxu1 %vm584_vm1, %v7138_v50 }
 0x1c0   : > { %5565 = vmatprep.mubr.msk.f32.mxu1 %vm584_vm1, %v7144_v21 }
 0x1c3   : > { %5566 = vmatmul.mubr.msk.f32.gmra.mrb[16].mxu1 %vm584_vm1, %v7150_v29 }
 0x1c4   : > { %5568 = vmatprep.mubr.msk.f32.mxu1 %vm584_vm1, %v7156_v4 }
 0x1c7   : > { %5569 = vmatmul.mubr.msk.f32.gmra.mrb[18].mxu1 %vm584_vm1, %v7162_v60 }
 0x1c8   : > { %5571 = vmatprep.mubr.msk.f32.mxu1 %vm584_vm1, %v7168_v14 }
 0x1cb   : > { %5572 = vmatmul.mubr.msk.f32.gmra.mrb[20].mxu1 %vm584_vm1, %v6885_v42 }
 0x1cc   : > { %5574 = vmatprep.mubr.msk.f32.mxu1 %vm584_vm1, %v6898_v58 }
 0x1cf   : > { %5575 = vmatmul.mubr.msk.f32.gmra.mrb[22].mxu1 %vm584_vm1, %v7236_v34 }
 0x1d0   : > { %5577 = vmatprep.mubr.msk.f32.mxu1 %vm584_vm1, %v7240_v56 }
 0x1d3   : > { %5578 = vmatmul.mubr.msk.f32.gmra.mrb[0].mxu1 %vm584_vm1, %v7244_v16 }
 0x1d4   : > { %5582 = vmatprep.mubr.msk.f32.mxu1 %vm584_vm1, %v6924_v59  ;;  %v4060_v59 = vld [vmem:[%s7726_s11] sm:$0xf] }
 0x1d5   : > { %5694 = vmatprep.subr.msk.mxu0 %vm675_vm0, %v4060_v59 }
 0x1d6   : > { %5695 = vmatpush3.msk.msra.mxu0 %vm675_vm0, %v4060_v59  ;;  %v7852_v59 = vld [vmem:[#allocation19_spill] sm:$0xff] }
 0x1d7   : > { %5583 = vmatmul.mubr.msk.f32.vlgmr.msra.gmra.mrb[2].mxu1 %vm584_vm1, %v6930_v26  ;;  %v4059_v26 = vld [vmem:[%s7725_s10] sm:$0xf] }
 0x1d8   : > { %5619 = vmatpush3.msk.msra.mxu1 %vm675_vm0, %v3379_v19  ;;  %5585 = vmatprep.mubr.msk.f32.mxu1 %vm584_vm1, %v6937_v43  ;;  %v7818_v43 = vmax.f32 %v6355_v25, 0.0  ;;  %v7821_v25 = vmax.f32 %v6383_v41, 0.0  ;;  %v3068_v41 = vld [vmem:[#allocation2 + $0xe7] sm:$0xff]  ;;  %v7850_v19 = vld [vmem:[#allocation18_spill] sm:$0xff] }
 0x1d9   : > { %5656 = vmatprep.subr.msk.mxu1 %vm675_vm0, %v3688_v57  ;;  %5732 = vmatprep.subr.msk.mxu0 %vm675_vm0, %v4059_v26 }
 0x1da   : > { %5697 = vmatmul.mubr.msk.f32.vlgmr.msra.gmra.mrb[54].mxu0 %vm584_vm1, %v7818_v43  ;;  %v7854_v43 = vld [vmem:[#allocation31_spill] sm:$0xff] }
 0x1db   : > { %5586 = vmatmul.mubr.msk.f32.gmra.mrb[4].mxu1 %vm584_vm1, %v6941_v36  ;;  %5733 = vmatpush3.msk.msra.mxu0 %vm675_vm0, %v4059_v26  ;;  %v7819_v36 = vmax.f32 %v6365_v31, 0.0  ;;  %v7822_v31 = vmax.f32 %v6392_v45, 0.0  ;;  %v3069_v45 = vld [vmem:[#allocation2 + $0xef] sm:$0xff]  ;;  %v7853_v26 = vmax.f32 %v7852_v59, 0.0 }
 0x1dc   : > { %5588 = vmatprep.mubr.msk.f32.mxu1 %vm584_vm1, %v6949_v28  ;;  %v7820_v28 = vmax.f32 %v6372_v35, 0.0  ;;  %v3067_v35 = vld [vmem:[#allocation2 + $0xdf] sm:$0xff] }
 0x1dd   : > { %5699 = vmatprep.mubr.msk.f32.mxu0 %vm584_vm1, %v7819_v36  ;;  %v7855_v36 = vld [vmem:[#allocation32_spill] sm:$0xff] }
 0x1de   : > { %5700 = vmatmul.mubr.msk.f32.gmra.mrb[56].mxu0 %vm584_vm1, %v7820_v28  ;;  %v7856_v28 = vld [vmem:[#allocation20_spill] sm:$0xff] }
 0x1df   : > { %5589 = vmatmul.mubr.msk.f32.gmra.mrb[6].mxu1 %vm584_vm1, %v6953_v30  ;;  %5702 = vmatprep.mubr.msk.f32.mxu0 %vm584_vm1, %v7821_v25  ;;  %v7823_v30 = vmax.f32 %v6403_v51, 0.0  ;;  %v7826_v51 = vmax.f32 %v6432_v1, 0.0  ;;  %v7830_v1 = vld [vmem:[#allocation23_spill] sm:$0xff]  ;;  %v7857_v25 = vmax.f32 %v7856_v28, 0.0 }
 0x1e0   : > { %5591 = vmatprep.mubr.msk.f32.mxu1 %vm584_vm1, %v6961_v48  ;;  %v7824_v48 = vmax.f32 %v6412_v55, 0.0  ;;  %v7828_v55 = vmax.f32 %v6452_v13, 0.0  ;;  %v7836_v13 = vld [vmem:[#allocation25_spill] sm:$0xff] }
 0x1e2   : > { %5703 = vmatmul.mubr.msk.f32.gmra.mrb[58].mxu0 %vm584_vm1, %v7822_v31  ;;  %v7858_v31 = vld [vmem:[#allocation21_spill] sm:$0xff] }
 0x1e3   : > { %5592 = vmatmul.mubr.msk.f32.gmra.mrb[8].mxu1 %vm584_vm1, %v6965_v22  ;;  %5705 = vmatprep.mubr.msk.f32.mxu0 %vm584_vm1, %v7823_v30  ;;  %v7825_v22 = vmax.f32 %v6423_v61, 0.0  ;;  %v7829_v61 = vmax.f32 %v6463_v20, 0.0  ;;  %v7837_v20 = vld [vmem:[#allocation26_spill] sm:$0xff]  ;;  %v7859_v30 = vmax.f32 %v7858_v31, 0.0 }
 0x1e4   : > { %5594 = vmatprep.mubr.msk.f32.mxu1 %vm584_vm1, %v6973_v17  ;;  %v7827_v17 = vmax.f32 %v6443_v9, 0.0  ;;  %v7831_v9 = vld [vmem:[#allocation24_spill] sm:$0xff] }
 0x1e6   : > { %5706 = vmatmul.mubr.msk.f32.gmra.mrb[60].mxu0 %vm584_vm1, %v7824_v48  ;;  %v7862_v48 = vld [vmem:[#allocation22_spill] sm:$0xff] }
 0x1e7   : > { %5595 = vmatmul.mubr.msk.f32.gmra.mrb[10].mxu1 %vm584_vm1, %v6977_v11  ;;  %5708 = vmatprep.mubr.msk.f32.mxu0 %vm584_vm1, %v7825_v22  ;;  %v7834_v11 = vld [vmem:[#allocation13_spill] sm:$0xff]  ;;  %v7863_v22 = vmax.f32 %v7862_v48, 0.0 }
 0x1e8   : > { %5597 = vmatprep.mubr.msk.f32.mxu1 %vm584_vm1, %v6985_v38  ;;  %v7838_v38 = vld [vmem:[#allocation14_spill] sm:$0xff] }
 0x1ea   : > { %5709 = vmatmul.mubr.msk.f32.gmra.mrb[62].mxu0 %vm584_vm1, %v7826_v51  ;;  %v7865_v51 = vld [vmem:[#allocation36_spill] sm:$0xff] }
 0x1eb   : > { %5598 = vmatmul.mubr.msk.f32.gmra.mrb[12].mxu1 %vm584_vm1, %v6989_v49  ;;  %5711 = vmatprep.mubr.msk.f32.mxu0 %vm584_vm1, %v7827_v17  ;;  %v7839_v49 = vmax.f32 %v7838_v38, 0.0  ;;  %v3376_v17 = vld [vmem:[#allocation2 + $0xe0] sm:$0xff] }
 0x1ec   : > { %5600 = vmatprep.mubr.msk.f32.mxu1 %vm584_vm1, %v6997_v53  ;;  %v7840_v53 = vld [vmem:[#allocation15_spill] sm:$0xff] }
 0x1ee   : > { %5712 = vmatmul.mubr.msk.f32.gmra.mrb[64].mxu0 %vm584_vm1, %v7828_v55  ;;  %v3377_v55 = vld [vmem:[#allocation2 + $0xe8] sm:$0xff] }
 0x1ef   : > { %5601 = vmatmul.mubr.msk.f32.gmra.mrb[14].mxu1 %vm584_vm1, %v7001_v10  ;;  %5714 = vmatprep.mubr.msk.f32.mxu0 %vm584_vm1, %v7829_v61  ;;  %v7841_v10 = vmax.f32 %v7840_v53, 0.0  ;;  %v3378_v61 = vld [vmem:[#allocation2 + $0xf0] sm:$0xff] }
 0x1f0   : > { %5603 = vmatprep.mubr.msk.f32.mxu1 %vm584_vm1, %v7009_v23  ;;  %v7842_v23 = vld [vmem:[#allocation27_spill] sm:$0xff] }
 0x1f3   : > { %5604 = vmatmul.mubr.msk.f32.gmra.mrb[16].mxu1 %vm584_vm1, %v7013_v8  ;;  %v7843_v8 = vld [vmem:[#allocation28_spill] sm:$0xff] }
 0x1f4   : > { %5606 = vmatprep.mubr.msk.f32.mxu1 %vm584_vm1, %v7021_v47  ;;  %v7844_v47 = vld [vmem:[#allocation16_spill] sm:$0xff] }
 0x1f7   : > { %5607 = vmatmul.mubr.msk.f32.gmra.mrb[18].mxu1 %vm584_vm1, %v7025_v39  ;;  %v7845_v39 = vmax.f32 %v7844_v47, 0.0 }
 0x1f8   : > { %5609 = vmatprep.mubr.msk.f32.mxu1 %vm584_vm1, %v7033_v37  ;;  %v7846_v37 = vld [vmem:[#allocation17_spill] sm:$0xff] }
 0x1fb   : > { %5610 = vmatmul.mubr.msk.f32.gmra.mrb[20].mxu1 %vm584_vm1, %v7037_v12  ;;  %v7847_v12 = vmax.f32 %v7846_v37, 0.0 }
 0x1fc   : > { %5612 = vmatprep.mubr.msk.f32.mxu1 %vm584_vm1, %v7044_v0  ;;  %v7848_v0 = vld [vmem:[#allocation29_spill] sm:$0xff] }
 0x1ff   : > { %5613 = vmatmul.mubr.msk.f32.gmra.mrb[22].mxu1 %vm584_vm1, %v3067_v35  ;;  %v7860_v35 = vld [vmem:[#allocation33_spill] sm:$0xff] }
 0x200   : > { %5615 = vmatprep.mubr.msk.f32.mxu1 %vm584_vm1, %v3068_v41  ;;  %v7861_v41 = vld [vmem:[#allocation34_spill] sm:$0xff] }
 0x203   : > { %5616 = vmatmul.mubr.msk.f32.gmra.mrb[0].mxu1 %vm584_vm1, %v3069_v45  ;;  %v7864_v45 = vld [vmem:[#allocation35_spill] sm:$0xff] }
 0x204   : > { %5620 = vmatprep.mubr.msk.f32.mxu1 %vm584_vm1, %v6756_v5  ;;  %v7832_v5 = vld [vmem:[#allocation12_spill] sm:$0xff] }
 0x207   : > { %5621 = vmatmul.mubr.msk.f32.vlgmr.msra.gmra.mrb[2].mxu1 %vm584_vm1, %v6762_v62  ;;  %v7833_v62 = vmax.f32 %v7832_v5, 0.0 }
 0x208   : > { %5657 = vmatpush3.msk.msra.mxu1 %vm675_vm0, %v3688_v57  ;;  %5623 = vmatprep.mubr.msk.f32.mxu1 %vm584_vm1, %v6772_v15  ;;  %v7835_v15 = vmax.f32 %v7834_v11, 0.0  ;;  %v7851_v57 = vmax.f32 %v7850_v19, 0.0 }
 0x209   : > { %5715 = vmatmul.mubr.msk.f32.gmra.mrb[66].mxu0 %vm584_vm1, %v7833_v62  ;;  %v7503_v62 = vld [vmem:[%s7723_s8] ss:$0 sm:$0xff] }
 0x20a   : > { %5717 = vmatprep.mubr.msk.f32.mxu0 %vm584_vm1, %v7835_v15 }
 0x20b   : > { %5624 = vmatmul.mubr.msk.f32.gmra.mrb[4].mxu1 %vm584_vm1, %v7830_v1 }
 0x20c   : > { %5626 = vmatprep.mubr.msk.f32.mxu1 %vm584_vm1, %v7831_v9 }
 0x20d   : > { %5718 = vmatmul.mubr.msk.f32.gmra.mrb[68].mxu0 %vm584_vm1, %v7839_v49 }
 0x20e   : > { %5720 = vmatprep.mubr.msk.f32.mxu0 %vm584_vm1, %v7841_v10 }
 0x20f   : > { %5627 = vmatmul.mubr.msk.f32.gmra.mrb[6].mxu1 %vm584_vm1, %v7836_v13  ;;  %v7508_v13 = vld [vmem:[%s7724_s9] ss:$0 sm:$0xff] }
 0x210   : > { %5629 = vmatprep.mubr.msk.f32.mxu1 %vm584_vm1, %v7837_v20 }
 0x211   : > { %5721 = vmatmul.mubr.msk.f32.gmra.mrb[70].mxu0 %vm584_vm1, %v7845_v39 }
 0x212   : > { %5723 = vmatprep.mubr.msk.f32.mxu0 %vm584_vm1, %v7847_v12 }
 0x213   : > { %5630 = vmatmul.mubr.msk.f32.gmra.mrb[8].mxu1 %vm584_vm1, %v7842_v23 }
 0x214   : > { %5632 = vmatprep.mubr.msk.f32.mxu1 %vm584_vm1, %v7843_v8 }
 0x215   : > { %5724 = vmatmul.mubr.msk.f32.gmra.mrb[72].mxu0 %vm584_vm1, %v7851_v57 }
 0x216   : > { %5726 = vmatprep.mubr.msk.f32.mxu0 %vm584_vm1, %v7853_v26 }
 0x217   : > { %5633 = vmatmul.mubr.msk.f32.gmra.mrb[10].mxu1 %vm584_vm1, %v7848_v0 }
 0x218   : > { %5635 = vmatprep.mubr.msk.f32.mxu1 %vm584_vm1, %v7849_v54 }
 0x219   : > { %5727 = vmatmul.mubr.msk.f32.gmra.mrb[74].mxu0 %vm584_vm1, %v7857_v25 }
 0x21a   : > { %5729 = vmatprep.mubr.msk.f32.mxu0 %vm584_vm1, %v7859_v30 }
 0x21b   : > { %5636 = vmatmul.mubr.msk.f32.gmra.mrb[12].mxu1 %vm584_vm1, %v7854_v43 }
 0x21c   : > { %5638 = vmatprep.mubr.msk.f32.mxu1 %vm584_vm1, %v7855_v36 }
 0x21d   : > { %5730 = vmatmul.mubr.msk.f32.gmra.mrb[76].mxu0 %vm584_vm1, %v7863_v22 }
 0x21f   : > { %5639 = vmatmul.mubr.msk.f32.gmra.mrb[14].mxu1 %vm584_vm1, %v7860_v35 }
 0x220   : > { %5641 = vmatprep.mubr.msk.f32.mxu1 %vm584_vm1, %v7861_v41 }
 0x223   : > { %5642 = vmatmul.mubr.msk.f32.gmra.mrb[16].mxu1 %vm584_vm1, %v7864_v45 }
 0x224   : > { %5644 = vmatprep.mubr.msk.f32.mxu1 %vm584_vm1, %v7865_v51 }
 0x227   : > { %5645 = vmatmul.mubr.msk.f32.gmra.mrb[18].mxu1 %vm584_vm1, %v6892_v18  ;;  %v3686_v18 = vld [vmem:[#allocation2 + $0xe9] sm:$0xff] }
 0x228   : > { %5647 = vmatprep.mubr.msk.f32.mxu1 %vm584_vm1, %v7177_v6 }
 0x22b   : > { %5648 = vmatmul.mubr.msk.f32.gmra.mrb[20].mxu1 %vm584_vm1, %v7181_v63 }
 0x22c   : > { %5650 = vmatprep.mubr.msk.f32.mxu1 %vm584_vm1, %v7185_v32 }
 0x22f   : > { %5651 = vmatmul.mubr.msk.f32.gmra.mrb[22].mxu1 %vm584_vm1, %v3376_v17 }
 0x230   : > { %5653 = vmatprep.mubr.msk.f32.mxu1 %vm584_vm1, %v3377_v55 }
 0x233   : > { %5654 = vmatmul.mubr.msk.f32.gmra.mrb[0].mxu1 %vm584_vm1, %v3378_v61 }
 0x234   : > { %5658 = vmatprep.mubr.msk.f32.mxu1 %vm584_vm1, %v7078_v2  ;;  %v3687_v2 = vld [vmem:[#allocation2 + $0xf1] sm:$0xff] }
 0x237   : > { %5659 = vmatmul.mubr.msk.f32.vlgmr.msra.gmra.mrb[2].mxu1 %vm584_vm1, %v7084_v52 }
 0x238   : > { %5661 = vmatprep.mubr.msk.f32.mxu1 %vm584_vm1, %v7090_v3 }
 0x23b   : > { %5662 = vmatmul.mubr.msk.f32.gmra.mrb[4].mxu1 %vm584_vm1, %v7096_v40 }
 0x23c   : > { %5664 = vmatprep.mubr.msk.f32.mxu1 %vm584_vm1, %v7102_v33 }
 0x23f   : > { %5665 = vmatmul.mubr.msk.f32.gmra.mrb[6].mxu1 %vm584_vm1, %v7108_v24 }
 0x240   : > { %5667 = vmatprep.mubr.msk.f32.mxu1 %vm584_vm1, %v7114_v44 }
 0x243   : > { %v7437_v63 = vpop.f32.mrb[52].mxu0  ;;  %5668 = vmatmul.mubr.msk.f32.gmra.mrb[8].mxu1 %vm584_vm1, %v7120_v7 }
 0x244   : > { %v7441_v6 = vpop.f32.mrb[53].mxu0  ;;  %5670 = vmatprep.mubr.msk.f32.mxu1 %vm584_vm1, %v7126_v27 }
 0x247   : > { %v5432_v32 = vpop.f32.mrb[30].mxu0  ;;  %5671 = vmatmul.mubr.msk.f32.gmra.mrb[10].mxu1 %vm584_vm1, %v7132_v46 }
 0x248   : > { %v1976_v33 = vpop.f32.mrb[31].mxu0  ;;  %5673 = vmatprep.mubr.msk.f32.mxu1 %vm584_vm1, %v7138_v50 }
 0x24b   : > { %v5435_v24 = vpop.f32.mrb[32].mxu0  ;;  %5674 = vmatmul.mubr.msk.f32.gmra.mrb[12].mxu1 %vm584_vm1, %v7144_v21 }
 0x24c   : > { %v1986_v44 = vpop.f32.mrb[33].mxu0  ;;  %5676 = vmatprep.mubr.msk.f32.mxu1 %vm584_vm1, %v7150_v29 }
 0x24f   : > { %v5438_v7 = vpop.f32.mrb[34].mxu0  ;;  %5677 = vmatmul.mubr.msk.f32.gmra.mrb[14].mxu1 %vm584_vm1, %v7156_v4 }
 0x250   : > { %v1996_v27 = vpop.f32.mrb[35].mxu0  ;;  %5679 = vmatprep.mubr.msk.f32.mxu1 %vm584_vm1, %v7162_v60 }
 0x253   : > { %v5441_v46 = vpop.f32.mrb[36].mxu0  ;;  %5680 = vmatmul.mubr.msk.f32.gmra.mrb[16].mxu1 %vm584_vm1, %v7168_v14  ;;  %v3685_v14 = vld [vmem:[#allocation2 + $0xe1] sm:$0xff] }
 0x254   : > { %v2006_v50 = vpop.f32.mrb[37].mxu0  ;;  %5682 = vmatprep.mubr.msk.f32.mxu1 %vm584_vm1, %v6885_v42 }
 0x257   : > { %v7461_v21 = vpop.f32.mrb[38].mxu0  ;;  %5683 = vmatmul.mubr.msk.f32.gmra.mrb[18].mxu1 %vm584_vm1, %v6898_v58 }
 0x258   : > { %v7465_v29 = vpop.f32.mrb[39].mxu0  ;;  %5685 = vmatprep.mubr.msk.f32.mxu1 %vm584_vm1, %v7236_v34 }
 0x25b   : > { %v7469_v4 = vpop.f32.mrb[40].mxu0  ;;  %5686 = vmatmul.mubr.msk.f32.gmra.mrb[20].mxu1 %vm584_vm1, %v7240_v56 }
 0x25c   : > { %v7473_v60 = vpop.f32.mrb[41].mxu0  ;;  %5688 = vmatprep.mubr.msk.f32.mxu1 %vm584_vm1, %v7244_v16 }
 0x25f   : > { %v7477_v42 = vpop.f32.mrb[42].mxu0  ;;  %5689 = vmatmul.mubr.msk.f32.gmra.mrb[22].mxu1 %vm584_vm1, %v3685_v14 }
 0x260   : > { %v7480_v58 = vpop.f32.mrb[43].mxu0  ;;  %5691 = vmatprep.mubr.msk.f32.mxu1 %vm584_vm1, %v3686_v18 }
 0x263   : > { %v7483_v52 = vpop.f32.mrb[44].mxu0  ;;  %5692 = vmatmul.mubr.msk.f32.gmra.mrb[0].mxu1 %vm584_vm1, %v3687_v2 }
 0x264   : > { %v7486_v3 = vpop.f32.mrb[45].mxu0 }
 0x267   : > { %v7488_v40 = vpop.f32.mrb[46].mxu0 }
 0x268   : > { %v7490_v34 = vpop.f32.mrb[47].mxu0 }
 0x26b   : > { %v7492_v56 = vpop.f32.mrb[48].mxu0 }
 0x26c   : > { %v7494_v16 = vpop.f32.mrb[49].mxu0 }
 0x26f   : > { %v7496_v1 = vpop.f32.mrb[50].mxu0 }
 0x270   : > { %v7498_v9 = vpop.f32.mrb[51].mxu0 }
 0x30a   : > { %v5660_v5 = vpop.f32.mrb[2].mxu1 }
 0x30b   : > { %v5772_v11 = vadd.f32 %v5660_v5, %v5432_v32  ;;  %v3830_v15 = vpop.f32.mrb[3].mxu1 }
 0x30c   : > { %v5773_v20 = vadd.f32 %v3830_v15, %v1976_v33 }
 0x30d   : > { %v3981_v38 = vmul.f32 %v5772_v11, %v7503_v62 }
 0x30e   : > { %v3980_v49 = vmul.f32 %v5773_v20, %v7503_v62  ;;  %v5663_v53 = vpop.f32.mrb[4].mxu1 }
 0x30f   : > { %v4012_v10 = vadd.f32 %v7508_v13, %v3981_v38  ;;  %v5774_v23 = vadd.f32 %v5663_v53, %v5435_v24  ;;  %v3840_v8 = vpop.f32.mrb[5].mxu1 }
 0x310   : > { %v4011_v47 = vadd.f32 %v7508_v13, %v3980_v49  ;;  %v5775_v39 = vadd.f32 %v3840_v8, %v1986_v44 }
 0x311   : > { %v3983_v37 = vmul.f32 %v5774_v23, %v7503_v62  ;;  %v4036_v19 = vmax.f32 %v4012_v10, 0.0 }
 0x312   : > { %v4035_v12 = vmax.f32 %v4011_v47, 0.0  ;;  %v3982_v0 = vmul.f32 %v5775_v39, %v7503_v62  ;;  %v5666_v54 = vpop.f32.mrb[6].mxu1 }
 0x313   : > { %v4014_v57 = vadd.f32 %v7508_v13, %v3983_v37  ;;  %v5776_v59 = vadd.f32 %v5666_v54, %v5438_v7  ;;  %v3850_v26 = vpop.f32.mrb[7].mxu1 }
 0x314   : > { %v4013_v43 = vadd.f32 %v7508_v13, %v3982_v0  ;;  %v5777_v36 = vadd.f32 %v3850_v26, %v1996_v27  ;;  %5734 = vmatprep.mubr.msk.f32.mxu0 %vm584_vm1, %v4035_v12 }
 0x315   : > { %v3985_v28 = vmul.f32 %v5776_v59, %v7503_v62  ;;  %5735 = vmatmul.mubr.msk.f32.vlgmr.msra.gmra.mrb[54].mxu0 %vm584_vm1, %v4036_v19  ;;  %v4038_v35 = vmax.f32 %v4014_v57, 0.0 }
 0x316   : > { %v4037_v25 = vmax.f32 %v4013_v43, 0.0  ;;  %v3984_v31 = vmul.f32 %v5777_v36, %v7503_v62  ;;  %v5669_v30 = vpop.f32.mrb[8].mxu1 }
 0x317   : > { %v4016_v41 = vadd.f32 %v7508_v13, %v3985_v28  ;;  %v5778_v48 = vadd.f32 %v5669_v30, %v5441_v46  ;;  %v3860_v22 = vpop.f32.mrb[9].mxu1 }
 0x318   : > { %v4015_v45 = vadd.f32 %v7508_v13, %v3984_v31  ;;  %v5779_v51 = vadd.f32 %v3860_v22, %v2006_v50  ;;  %5737 = vmatprep.mubr.msk.f32.mxu0 %vm584_vm1, %v4037_v25 }
 0x319   : > { %v3987_v17 = vmul.f32 %v5778_v48, %v7503_v62  ;;  %5738 = vmatmul.mubr.msk.f32.gmra.mrb[56].mxu0 %vm584_vm1, %v4038_v35  ;;  %v4040_v33 = vmax.f32 %v4016_v41, 0.0 }
 0x31a   : > { %v4039_v55 = vmax.f32 %v4015_v45, 0.0  ;;  %v3986_v61 = vmul.f32 %v5779_v51, %v7503_v62  ;;  %v5672_v32 = vpop.f32.mrb[10].mxu1 }
 0x31b   : > { %v4018_v24 = vadd.f32 %v7508_v13, %v3987_v17  ;;  %v5780_v44 = vadd.f32 %v5672_v32, %v7461_v21  ;;  %v3870_v7 = vpop.f32.mrb[11].mxu1 }
 0x31c   : > { %v4017_v27 = vadd.f32 %v7508_v13, %v3986_v61  ;;  %v5781_v46 = vadd.f32 %v3870_v7, %v7465_v29  ;;  %5740 = vmatprep.mubr.msk.f32.mxu0 %vm584_vm1, %v4039_v55 }
 0x31d   : > { %v3989_v50 = vmul.f32 %v5780_v44, %v7503_v62  ;;  %5741 = vmatmul.mubr.msk.f32.gmra.mrb[58].mxu0 %vm584_vm1, %v4040_v33  ;;  %v4042_v5 = vmax.f32 %v4018_v24, 0.0 }
 0x31e   : > { %v4041_v14 = vmax.f32 %v4017_v27, 0.0  ;;  %v3988_v18 = vmul.f32 %v5781_v46, %v7503_v62  ;;  %v5675_v2 = vpop.f32.mrb[12].mxu1 }
 0x31f   : > { %v4020_v11 = vadd.f32 %v7508_v13, %v3989_v50  ;;  %v5782_v21 = vadd.f32 %v5675_v2, %v7469_v4  ;;  %v3880_v15 = vpop.f32.mrb[13].mxu1 }
 0x320   : > { %v4019_v20 = vadd.f32 %v7508_v13, %v3988_v18  ;;  %v5783_v29 = vadd.f32 %v3880_v15, %v7473_v60  ;;  %5743 = vmatprep.mubr.msk.f32.mxu0 %vm584_vm1, %v4041_v14 }
 0x321   : > { %v3991_v38 = vmul.f32 %v5782_v21, %v7503_v62  ;;  %5744 = vmatmul.mubr.msk.f32.gmra.mrb[60].mxu0 %vm584_vm1, %v4042_v5  ;;  %v4044_v23 = vmax.f32 %v4020_v11, 0.0 }
 0x322   : > { %v4043_v49 = vmax.f32 %v4019_v20, 0.0  ;;  %v3990_v53 = vmul.f32 %v5783_v29, %v7503_v62  ;;  %v5678_v10 = vpop.f32.mrb[14].mxu1 }
 0x323   : > { %v4022_v8 = vadd.f32 %v7508_v13, %v3991_v38  ;;  %v5784_v4 = vadd.f32 %v5678_v10, %v7477_v42  ;;  %v3890_v47 = vpop.f32.mrb[15].mxu1 }
 0x324   : > { %v4021_v39 = vadd.f32 %v7508_v13, %v3990_v53  ;;  %v5785_v60 = vadd.f32 %v3890_v47, %v7480_v58  ;;  %5746 = vmatprep.mubr.msk.f32.mxu0 %vm584_vm1, %v4043_v49 }
 0x325   : > { %v3993_v37 = vmul.f32 %v5784_v4, %v7503_v62  ;;  %5747 = vmatmul.mubr.msk.f32.gmra.mrb[62].mxu0 %vm584_vm1, %v4044_v23  ;;  %v4046_v19 = vmax.f32 %v4022_v8, 0.0 }
 0x326   : > { %v4045_v12 = vmax.f32 %v4021_v39, 0.0  ;;  %v3992_v0 = vmul.f32 %v5785_v60, %v7503_v62  ;;  %v5681_v54 = vpop.f32.mrb[16].mxu1 }
 0x327   : > { %v4024_v57 = vadd.f32 %v7508_v13, %v3993_v37  ;;  %v5786_v42 = vadd.f32 %v5681_v54, %v7483_v52  ;;  %v3900_v59 = vpop.f32.mrb[17].mxu1 }
 0x328   : > { %v4023_v26 = vadd.f32 %v7508_v13, %v3992_v0  ;;  %v5787_v58 = vadd.f32 %v3900_v59, %v7486_v3  ;;  %5749 = vmatprep.mubr.msk.f32.mxu0 %vm584_vm1, %v4045_v12 }
 0x329   : > { %v3995_v43 = vmul.f32 %v5786_v42, %v7503_v62  ;;  %5750 = vmatmul.mubr.msk.f32.gmra.mrb[64].mxu0 %vm584_vm1, %v4046_v19  ;;  %v4048_v31 = vmax.f32 %v4024_v57, 0.0 }
 0x32a   : > { %v4047_v36 = vmax.f32 %v4023_v26, 0.0  ;;  %v3994_v28 = vmul.f32 %v5787_v58, %v7503_v62  ;;  %v5684_v25 = vpop.f32.mrb[18].mxu1 }
 0x32b   : > { %v4026_v30 = vadd.f32 %v7508_v13, %v3995_v43  ;;  %v5788_v52 = vadd.f32 %v5684_v25, %v7488_v40  ;;  %v3910_v35 = vpop.f32.mrb[19].mxu1 }
 0x32c   : > { %v4025_v41 = vadd.f32 %v7508_v13, %v3994_v28  ;;  %v5789_v3 = vadd.f32 %v3910_v35, %v7490_v34  ;;  %5752 = vmatprep.mubr.msk.f32.mxu0 %vm584_vm1, %v4047_v36 }
 0x32d   : > { %v3997_v48 = vmul.f32 %v5788_v52, %v7503_v62  ;;  %5753 = vmatmul.mubr.msk.f32.gmra.mrb[66].mxu0 %vm584_vm1, %v4048_v31  ;;  %v4050_v17 = vmax.f32 %v4026_v30, 0.0 }
 0x32e   : > { %v4049_v22 = vmax.f32 %v4025_v41, 0.0  ;;  %v3996_v45 = vmul.f32 %v5789_v3, %v7503_v62  ;;  %v5687_v51 = vpop.f32.mrb[20].mxu1 }
 0x32f   : > { %v4028_v55 = vadd.f32 %v7508_v13, %v3997_v48  ;;  %v5790_v40 = vadd.f32 %v5687_v51, %v7492_v56  ;;  %v3920_v61 = vpop.f32.mrb[21].mxu1 }
 0x330   : > { %v4027_v32 = vadd.f32 %v7508_v13, %v3996_v45  ;;  %v5791_v34 = vadd.f32 %v3920_v61, %v7494_v16  ;;  %5755 = vmatprep.mubr.msk.f32.mxu0 %vm584_vm1, %v4049_v22 }
 0x331   : > { %v3999_v33 = vmul.f32 %v5790_v40, %v7503_v62  ;;  %5756 = vmatmul.mubr.msk.f32.gmra.mrb[68].mxu0 %vm584_vm1, %v4050_v17  ;;  %v4052_v27 = vmax.f32 %v4028_v55, 0.0 }
 0x332   : > { %v4051_v24 = vmax.f32 %v4027_v32, 0.0  ;;  %v3998_v44 = vmul.f32 %v5791_v34, %v7503_v62  ;;  %v5690_v7 = vpop.f32.mrb[22].mxu1 }
 0x333   : > { %v4030_v46 = vadd.f32 %v7508_v13, %v3999_v33  ;;  %v5792_v56 = vadd.f32 %v5690_v7, %v7496_v1  ;;  %v3930_v50 = vpop.f32.mrb[23].mxu1 }
 0x334   : > { %v4029_v14 = vadd.f32 %v7508_v13, %v3998_v44  ;;  %v5793_v16 = vadd.f32 %v3930_v50, %v7498_v9  ;;  %5758 = vmatprep.mubr.msk.f32.mxu0 %vm584_vm1, %v4051_v24 }
 0x335   : > { %v4001_v18 = vmul.f32 %v5792_v56, %v7503_v62  ;;  %5759 = vmatmul.mubr.msk.f32.gmra.mrb[70].mxu0 %vm584_vm1, %v4052_v27  ;;  %v4054_v21 = vmax.f32 %v4030_v46, 0.0 }
 0x336   : > { %v4053_v2 = vmax.f32 %v4029_v14, 0.0  ;;  %v4000_v5 = vmul.f32 %v5793_v16, %v7503_v62  ;;  %v5693_v11 = vpop.f32.mrb[0].mxu1 }
 0x337   : > { %v4032_v15 = vadd.f32 %v7508_v13, %v4001_v18  ;;  %v5794_v1 = vadd.f32 %v5693_v11, %v7437_v63  ;;  %v3940_v20 = vpop.f32.mrb[1].mxu1 }
 0x338   : > { %v4031_v29 = vadd.f32 %v7508_v13, %v4000_v5  ;;  %v5795_v9 = vadd.f32 %v3940_v20, %v7441_v6  ;;  %5761 = vmatprep.mubr.msk.f32.mxu0 %vm584_vm1, %v4053_v2 }
 0x339   : > { %v4003_v38 = vmul.f32 %v5794_v1, %v7503_v62  ;;  %5762 = vmatmul.mubr.msk.f32.gmra.mrb[72].mxu0 %vm584_vm1, %v4054_v21  ;;  %v4056_v10 = vmax.f32 %v4032_v15, 0.0 }
 0x33a   : > { %v4055_v49 = vmax.f32 %v4031_v29, 0.0  ;;  %v4002_v53 = vmul.f32 %v5795_v9, %v7503_v62 }
 0x33b   : > { %v4034_v23 = vadd.f32 %v7508_v13, %v4003_v38 }
 0x33c   : > { %v4033_v63 = vadd.f32 %v7508_v13, %v4002_v53  ;;  %5764 = vmatprep.mubr.msk.f32.mxu0 %vm584_vm1, %v4055_v49 }
 0x33d   : > { %5765 = vmatmul.mubr.msk.f32.gmra.mrb[74].mxu0 %vm584_vm1, %v4056_v10  ;;  %v4058_v8 = vmax.f32 %v4034_v23, 0.0 }
 0x33e   : > { %v4057_v6 = vmax.f32 %v4033_v63, 0.0 }
 0x340   : > { %5767 = vmatprep.mubr.msk.f32.mxu0 %vm584_vm1, %v4057_v6 }
 0x341   : > { %5768 = vmatmul.mubr.msk.f32.gmra.mrb[76].mxu0 %vm584_vm1, %v4058_v8 }
 0x3e8   : > { %v5736_v62 = vpop.f32.mrb[54].mxu0 }
 0x3e9   : > { %4512 = vst.msk [vmem:[%s7601_s15 + $0x7] sm:$0xff] %vm4511_vm2, %v5736_v62  ;;  %v4390_v13 = vpop.f32.mrb[55].mxu0 }
 0x3ea   : > { %4510 = vst.msk [vmem:[%s7601_s15 - $0x1] sm:$0xfe] %vm4509_vm3, %v4390_v13 }
 0x3ec   : > { %v5739_v4 = vpop.f32.mrb[56].mxu0 }
 0x3ed   : > { %4970 = vst.msk [vmem:[%s7601_s15 + $0xf] sm:$0xfe] %vm4509_vm3, %v5739_v4  ;;  %v4400_v47 = vpop.f32.mrb[57].mxu0 }
 0x3ee   : > { %4514 = vst.msk [vmem:[%s7601_s15 + $0xf] sm:$0x1] %vm4513_vm4, %v4400_v47 }
 0x3f0   : > { %v5742_v39 = vpop.f32.mrb[58].mxu0 }
 0x3f1   : > { %4972 = vst.msk [vmem:[%s7601_s15 + $0x1f] sm:$0x1] %vm4513_vm4, %v5742_v39  ;;  %v4410_v60 = vpop.f32.mrb[59].mxu0 }
 0x3f2   : > { %4971 = vst.msk [vmem:[%s7601_s15 + $0x17] sm:$0xff] %vm4511_vm2, %v4410_v60 }
 0x3f4   : > { %v5745_v37 = vpop.f32.mrb[60].mxu0 }
 0x3f5   : > { %4974 = vst.msk [vmem:[%s7601_s15 + $0x27] sm:$0xff] %vm4511_vm2, %v5745_v37  ;;  %v4420_v12 = vpop.f32.mrb[61].mxu0 }
 0x3f6   : > { %4973 = vst.msk [vmem:[%s7601_s15 + $0x1f] sm:$0xfe] %vm4509_vm3, %v4420_v12 }
 0x3f8   : > { %v5748_v0 = vpop.f32.mrb[62].mxu0 }
 0x3f9   : > { %4976 = vst.msk [vmem:[%s7601_s15 + $0x2f] sm:$0xfe] %vm4509_vm3, %v5748_v0  ;;  %v4430_v54 = vpop.f32.mrb[63].mxu0 }
 0x3fa   : > { %4975 = vst.msk [vmem:[%s7601_s15 + $0x2f] sm:$0x1] %vm4513_vm4, %v4430_v54 }
 0x3fc   : > { %v5751_v19 = vpop.f32.mrb[64].mxu0 }
 0x3fd   : > { %4978 = vst.msk [vmem:[%s7601_s15 + $0x3f] sm:$0x1] %vm4513_vm4, %v5751_v19  ;;  %v4440_v57 = vpop.f32.mrb[65].mxu0 }
 0x3fe   : > { %4977 = vst.msk [vmem:[%s7601_s15 + $0x37] sm:$0xff] %vm4511_vm2, %v4440_v57 }
 0x400   : > { %v5754_v42 = vpop.f32.mrb[66].mxu0 }
 0x401   : > { %4980 = vst.msk [vmem:[%s7601_s15 + $0x47] sm:$0xff] %vm4511_vm2, %v5754_v42  ;;  %v4450_v59 = vpop.f32.mrb[67].mxu0 }
 0x402   : > { %4979 = vst.msk [vmem:[%s7601_s15 + $0x3f] sm:$0xfe] %vm4509_vm3, %v4450_v59 }
 0x404   : > { %v5757_v26 = vpop.f32.mrb[68].mxu0 }
 0x405   : > { %4982 = vst.msk [vmem:[%s7601_s15 + $0x4f] sm:$0xfe] %vm4509_vm3, %v5757_v26  ;;  %v4460_v58 = vpop.f32.mrb[69].mxu0 }
 0x406   : > { %4981 = vst.msk [vmem:[%s7601_s15 + $0x4f] sm:$0x1] %vm4513_vm4, %v4460_v58 }
 0x408   : > { %v5760_v43 = vpop.f32.mrb[70].mxu0 }
 0x409   : > { %4984 = vst.msk [vmem:[%s7601_s15 + $0x5f] sm:$0x1] %vm4513_vm4, %v5760_v43  ;;  %v4470_v36 = vpop.f32.mrb[71].mxu0 }
 0x40a   : > { %4983 = vst.msk [vmem:[%s7601_s15 + $0x57] sm:$0xff] %vm4511_vm2, %v4470_v36 }
 0x40c   : > { %v5763_v28 = vpop.f32.mrb[72].mxu0 }
 0x40d   : > { %4986 = vst.msk [vmem:[%s7601_s15 + $0x67] sm:$0xff] %vm4511_vm2, %v5763_v28  ;;  %v4480_v25 = vpop.f32.mrb[73].mxu0 }
 0x40e   : > { %4985 = vst.msk [vmem:[%s7601_s15 + $0x5f] sm:$0xfe] %vm4509_vm3, %v4480_v25 }
 0x410   : > { %v5766_v31 = vpop.f32.mrb[74].mxu0 }
 0x411   : > { %4988 = vst.msk [vmem:[%s7601_s15 + $0x6f] sm:$0xfe] %vm4509_vm3, %v5766_v31  ;;  %v4490_v30 = vpop.f32.mrb[75].mxu0 }
 0x412   : > { %4987 = vst.msk [vmem:[%s7601_s15 + $0x6f] sm:$0x1] %vm4513_vm4, %v4490_v30 }
 0x414   : > { %v5769_v52 = vpop.f32.mrb[76].mxu0 }
 0x415   : > { %4990 = vst.msk [vmem:[%s7601_s15 + $0x7f] sm:$0x1] %vm4513_vm4, %v5769_v52  ;;  %v4500_v35 = vpop.f32.mrb[77].mxu0 }
 0x416   : > { %4989 = vst.msk [vmem:[%s7601_s15 + $0x77] sm:$0xff] %vm4511_vm2, %v4500_v35 }
 0x417   : > { %6080 = shalt.err (!%p6077_p7)
}
 0x418   : > { %s6081_s19 = scalar_lea.hbm %s7653_s30, 2048  ;;  %s6085_s14 = scalar_lea.hbm %s7727_s12, 8192 }
 0x419   : > { %p6082_p9 = scmp.ne.s32.totalorder %s7653_s30, %s6081_s19  ;;  %p6086_p12 = scmp.lt.u32.totalorder %s7653_s30, %s7727_s12 }
 0x41a   : > { %p6087_p13 = scmp.lt.u32.totalorder %s6085_s14, %s6081_s19  ;;  %p6089_p1 = scmp.lt.u32.totalorder %s6081_s19, %s7653_s30 }
 0x41b   : > { %p6083_p10 = pnand %p6082_p9, %p6284_p3 }
 0x41c   : > { %p6088_p0 = por %p6087_p13, %p6086_p12 }
 0x41d   : > { %p6084_p11 = pneg %p6083_p10 }
 0x41e   : > { %p6090_p2 = por %p6089_p1, %p6088_p0 }
 0x420   : > { %p6091_p4 = pnand %p6090_p2, %p6084_p11 }
 0x422   : > { %6094 = shalt.err (!%p6091_p4)
}
 0x423   : > { %s6166_s25 = smov 128   ;;  %s6167_s26 = smov 8  }
 0x424   : > { %5990 = dma.vmem_to_hbm [thread:$0]  (%p6284_p3), %s7655_s29, 2048, %s7653_s30, %s7663_s18, %s6166_s25, %s6166_s25, %s6167_s26  }
 0x425 PF: > { %p5996_p5 = scmp.ge.s32.totalorder %s6161_s28, 2  ;;  %s4575_s13 = sand.u32 1, %s6133_s21  }
 0x426   : > { %s4576_s20 = scalar_lea.sflag [#allocation4], %s4575_s13 }
 0x427   : > { %p5993_p6 = pnand %p5996_p5, %p6293_p8 }
 0x429   : > { %6128 = dma.done.wait (!%p5993_p6), %s4576_s20, 2048  }
 0x42a   : > { %6130 = vsyncadd (!%p5993_p6), %s4576_s20, 4294965248  ;;  %s25_s28 = sadd.s32 1, %s6161_s28   ;;  %s7866_s4 = sld [smem:[#allocation6_spill]] }
 0x42b   : > { %p22_p7 = scmp.ge.s32.totalorder %s25_s28, 6   ;;  %s7867_s23 = sld [smem:[#allocation11_spill]] }
 0x42c   : > { %s7868_s24 = sld [smem:[#allocation7_spill]]  ;;  %s7869_s25 = sld [smem:[#allocation8_spill]] }
 0x42d   : > { %s7870_s26 = sld [smem:[#allocation9_spill]]  ;;  %s7871_s27 = sld [smem:[#allocation10_spill]] }
 0x42e   : > { %s7872_s21 = smov %s6137_s22  ;;  %24 = sbr.rel (!%p22_p7) target bundleno = 7 (0x7), region = 114 }
 0x430   : > { %s7873_s22 = smov %s7866_s4 }
 0x435   :  { %4581 = vsyncpa [#allocation4], 1 }
 0x436   :  { %4583 = vsyncpa [#allocation4 + $0x1], 1 }

</bundles_post_ra>
